<compile_context>
chip_gen: v7x
topology: tpu7x:2x2x1
jax: 0.10.0
libtpu: 0.0.40
codegen_flags: <defaults>
</compile_context>

<pallas_src>
import functools

import jax
import jax.numpy as jnp
from jax.experimental import pallas as pl
from jax.experimental.pallas import tpu as pltpu

KERNEL_SIZES = (5, 9, 13)
NEG = -1e30  # see numerical note above


def _pool5_same(m, w_masks, h_masks, W):
    """Stride-1, k=5, 'same' (-inf padded) 2-D max pool, separable, applied to
    the flat channels-last view m:(H*W, C).

    Shifted window elements come from pltpu.roll on the sublane axis; edges
    (and the row-to-row wrap of the flat view) are handled by the precomputed
    masks.  No padded temporaries, no unaligned sublane slices, no reshapes.
    """
    L = m.shape[0]
    neg = jnp.asarray(NEG, dtype=m.dtype)

    def axis_max(x, step, masks):
        # masks correspond to window offsets d = (-2, -1, +1, +2); the window
        # element at flat offset f + d*step is x rolled by (-d*step) mod L.
        def term(d, mask):
            rolled = pltpu.roll(x, shift=(-d * step) % L, axis=0)
            return jnp.where(mask, rolled, neg)

        # Balanced tree (depth ~3) so the 4 VALUs can co-issue the maxima.
        a = jnp.maximum(term(-2, masks[0]), term(-1, masks[1]))
        b = jnp.maximum(term(1, masks[2]), term(2, masks[3]))
        return jnp.maximum(x, jnp.maximum(a, b))

    m = axis_max(m, 1, w_masks)   # width direction (within image rows)
    m = axis_max(m, W, h_masks)   # height direction (across image rows)
    return m


def _spp_kernel(x_ref, w1t_ref, b1_ref, w2_ref, b2_ref, o_ref, *, W, pool_dtype):
    L = x_ref.shape[1]
    xf = x_ref[0]                                   # (H*W, C_in), channels on lanes

    # conv1: 1x1 conv (BN folded) + SiLU  ->  (H*W, Ch)
    h = jnp.dot(xf, w1t_ref[...], preferred_element_type=jnp.float32) + b1_ref[...]
    h = (h * jax.nn.sigmoid(h)).astype(pool_dtype)

    # Edge-validity masks: built once, shared by all three cascade stages.
    flat = jax.lax.broadcasted_iota(jnp.int32, (L, 1), 0)
    col = flat % W
    w_masks = (col >= 2, col >= 1, col < W - 1, col < W - 2)          # d=-2,-1,+1,+2
    h_masks = (flat >= 2 * W, flat >= W, flat < L - W, flat < L - 2 * W)

    # SPPF cascade: pool5, pool5∘pool5 == pool9, pool5^3 == pool13 (exact for
    # stride-1 max pools with -inf-style padding).
    p5 = _pool5_same(h, w_masks, h_masks, W)
    p9 = _pool5_same(p5, w_masks, h_masks, W)
    p13 = _pool5_same(p9, w_masks, h_masks, W)

    # conv2: 1x1 conv (BN folded) + SiLU as four adjacent accumulated matmuls
    # into one f32 accumulator — no channel concat, no relayouts, weights were
    # pre-cast in the wrapper.
    acc = jnp.dot(h, w2_ref[0], preferred_element_type=jnp.float32)
    acc = acc + jnp.dot(p5, w2_ref[1], preferred_element_type=jnp.float32)
    acc = acc + jnp.dot(p9, w2_ref[2], preferred_element_type=jnp.float32)
    acc = acc + jnp.dot(p13, w2_ref[3], preferred_element_type=jnp.float32)
    y = acc + b2_ref[...]
    y = y * jax.nn.sigmoid(y)
    o_ref[0] = y.astype(o_ref.dtype)                # (H*W, C_out); lane-dense once C_out>=128


def _vmem_limit_bytes(L, C_in, Ch, C_out, act_itemsize, pool_itemsize, w_itemsize):
    """Per-step footprint with headroom, capped at ~75% of physical VMEM."""
    per_step = (
        2 * L * C_in * act_itemsize                 # double-buffered input block
        + 2 * L * C_out * act_itemsize              # double-buffered output block
        + (C_in * Ch + Ch) * w_itemsize             # w1t + b1
        + (4 * Ch * C_out + C_out) * w_itemsize     # w2t4 + b2
        + 6 * L * Ch * pool_itemsize                # h, p5, p9, p13 + live temps
        + 2 * L * C_out * 4                         # f32 accumulator + y
        + 10 * L * 4                                # iota / masks
    )
    try:
        phys = getattr(pltpu.get_tpu_info(), "vmem_capacity_bytes",
                       128 * 1024 * 1024)
    except Exception:
        phys = 128 * 1024 * 1024
    return int(min(max(2 * per_step, 32 * 1024 * 1024), 0.75 * phys))


@functools.partial(jax.jit, static_argnames=("pool_dtype",))
def spp_bottleneck(x, w1t, b1, w2t4, b2, pool_dtype=jnp.float32):
    """x: (N, C_in, H, W) NCHW.  w1t: (C_in, Ch).  b1: (1, Ch).
    w2t4: (4, Ch, C_out) — conv2 weight transposed, split per SPP branch.
    b2: (1, C_out).  Returns (N, C_out, H, W)."""
    N, C_in, H, W = x.shape
    Ch = w1t.shape[1]
    C_out = w2t4.shape[2]
    L = H * W

    # Channels-last, flat spatial dim.  The NCHW<->NHWC transposes live outside
    # the kernel; drop them if the surrounding graph is already NHWC.
    x_flat = jnp.transpose(x, (0, 2, 3, 1)).reshape(N, L, C_in)

    # Pre-cast matmul/pooling operands ONCE in the wrapper (never per grid step
    # in the kernel).  Biases stay f32; accumulation is always f32.
    if pool_dtype != jnp.float32:
        x_flat = x_flat.astype(pool_dtype)
        w1t_k = w1t.astype(pool_dtype)
        w2t4_k = w2t4.astype(pool_dtype)
    else:
        w1t_k, w2t4_k = w1t, w2t4
    b1_k = b1.astype(jnp.float32)
    b2_k = b2.astype(jnp.float32)

    cost = pl.CostEstimate(
        flops=2 * N * L * (C_in * Ch + 4 * Ch * C_out),
        transcendentals=2 * N * L * (Ch + C_out),
        bytes_accessed=(x_flat.size * x_flat.dtype.itemsize
                        + N * L * C_out * jnp.dtype(x.dtype).itemsize
                        + w1t_k.size * w1t_k.dtype.itemsize
                        + w2t4_k.size * w2t4_k.dtype.itemsize
                        + b1_k.size * 4 + b2_k.size * 4),
    )

    out_flat = pl.pallas_call(
        functools.partial(_spp_kernel, W=W, pool_dtype=pool_dtype),
        out_shape=jax.ShapeDtypeStruct((N, L, C_out), x.dtype),
        grid_spec=pltpu.PrefetchScalarGridSpec(
            num_scalar_prefetch=0,
            grid=(N,),
            in_specs=[
                pl.BlockSpec((1, L, C_in), lambda n: (n, 0, 0)),
                pl.BlockSpec(w1t_k.shape, lambda n: (0, 0)),
                pl.BlockSpec(b1_k.shape, lambda n: (0, 0)),
                pl.BlockSpec(w2t4_k.shape, lambda n: (0, 0, 0)),
                pl.BlockSpec(b2_k.shape, lambda n: (0, 0)),
            ],
            out_specs=pl.BlockSpec((1, L, C_out), lambda n: (n, 0, 0)),
        ),
        compiler_params=pltpu.CompilerParams(
            dimension_semantics=("parallel",),
            vmem_limit_bytes=_vmem_limit_bytes(
                L, C_in, Ch, C_out,
                jnp.dtype(x_flat.dtype).itemsize,
                jnp.dtype(pool_dtype).itemsize,
                jnp.dtype(w1t_k.dtype).itemsize),
        ),
        cost_estimate=cost,
    )(x_flat, w1t_k, b1_k, w2t4_k, b2_k)

    # Back to NCHW outside the kernel.
    return jnp.transpose(out_flat.reshape(N, H, W, C_out), (0, 3, 1, 2))


def _fold_bn_1x1(conv_w, gamma, beta, mean, var, eps=1e-5):
    """Fold eval-mode BatchNorm into a 1x1 conv: (C_out, C_in) weight, (C_out,) bias."""
    scale = gamma / jnp.sqrt(var + eps)
    w_eff = conv_w * scale[:, None]
    b_eff = beta - mean * scale
    return w_eff, b_eff


def _reference(x, w1, b1, w2, b2):
    """Plain-JAX reference (eval-mode BN already folded).  NCHW weights."""
    def conv_bn_silu(z, w, b):
        y = jnp.einsum('oc,nchw->nohw', w, z) + b.reshape(1, -1, 1, 1)
        return y * jax.nn.sigmoid(y)

    def maxpool(z, k):
        p = k // 2
        zp = jnp.pad(z, ((0, 0), (0, 0), (p, p), (p, p)),
                     constant_values=-jnp.inf)
        return jax.lax.reduce_window(zp, -jnp.inf, jax.lax.max,
                                     (1, 1, k, k), (1, 1, 1, 1), 'VALID')

    h = conv_bn_silu(x, w1, b1)
    cat = jnp.concatenate([h] + [maxpool(h, k) for k in KERNEL_SIZES], axis=1)
    return conv_bn_silu(cat, w2, b2)


if __name__ == "__main__":
    # SPPBottleneck(in_channels=4, out_channels=8), input (N=2, C=4, H=16, W=16)
    N, C_in, H, W = 2, 4, 16, 16
    C_out = 8
    Ch = C_in // 2                                   # hidden_channels
    C_cat = Ch * (len(KERNEL_SIZES) + 1)             # conv2 in-channels

    key = jax.random.PRNGKey(0)
    ks = jax.random.split(key, 8)

    x = jax.random.normal(ks[0], (N, C_in, H, W), dtype=jnp.float32)

    # conv1: Conv2d(C_in, Ch, 1, bias=False) + BatchNorm2d(Ch) (eval-mode, folded)
    conv1_w = 0.3 * jax.random.normal(ks[1], (Ch, C_in), dtype=jnp.float32)
    bn1_g = 1.0 + 0.1 * jax.random.normal(ks[2], (Ch,), dtype=jnp.float32)
    bn1_b = 0.1 * jax.random.normal(ks[3], (Ch,), dtype=jnp.float32)
    bn1_m = 0.1 * jax.random.normal(ks[4], (Ch,), dtype=jnp.float32)
    bn1_v = jnp.abs(jax.random.normal(ks[5], (Ch,), dtype=jnp.float32)) + 0.5
    w1, b1v = _fold_bn_1x1(conv1_w, bn1_g, bn1_b, bn1_m, bn1_v)   # (Ch,C_in),(Ch,)

    # conv2: Conv2d(4*Ch, C_out, 1, bias=False) + BatchNorm2d(C_out) (folded)
    conv2_w = 0.3 * jax.random.normal(ks[6], (C_out, C_cat), dtype=jnp.float32)
    bn2_g = jnp.ones((C_out,), jnp.float32)
    bn2_b = jnp.zeros((C_out,), jnp.float32)
    bn2_m = jnp.zeros((C_out,), jnp.float32)
    bn2_v = jnp.ones((C_out,), jnp.float32)
    w2, b2v = _fold_bn_1x1(conv2_w, bn2_g, bn2_b, bn2_m, bn2_v)   # (C_out,4Ch),(C_out,)

    # Kernel-layout parameters (channels-last, conv2 split per SPP branch).
    w1t = w1.T                                        # (C_in, Ch)
    b1k = b1v[None, :]                                # (1, Ch)
    w2t4 = w2.T.reshape(len(KERNEL_SIZES) + 1, Ch, C_out)   # (4, Ch, C_out)
    b2k = b2v[None, :]                                # (1, C_out)

    out = spp_bottleneck(x, w1t, b1k, w2t4, b2k)      # pool_dtype=f32 (exact path)
    out = jax.block_until_ready(out)

    ref = jax.block_until_ready(_reference(x, w1, b1v, w2, b2v))
    assert out.shape == (N, C_out, H, W)
    assert jnp.allclose(out, ref, atol=1e-5, rtol=1e-5), (
        float(jnp.max(jnp.abs(out - ref))))

    print("KERNEL_OK")
</pallas_src>

<mosaic_0001>
module attributes {stable_mosaic.version = 11 : i64} {
  func.func @_spp_kernel(%arg0: i32, %arg1: memref<1x256x4xf32, #tpu.memory_space<vmem>>, %arg2: memref<4x2xf32, #tpu.memory_space<vmem>>, %arg3: memref<1x2xf32, #tpu.memory_space<vmem>>, %arg4: memref<4x2x8xf32, #tpu.memory_space<vmem>>, %arg5: memref<1x8xf32, #tpu.memory_space<vmem>>, %arg6: memref<1x256x8xf32, #tpu.memory_space<vmem>>) attributes {dimension_semantics = [#tpu.dimension_semantics<parallel>], iteration_bounds = array<i64: 2>, scalar_prefetch = 0 : i64, scratch_operands = 0 : i64, tpu.core_type = #tpu.core_type<tc>, window_params = [{transform_indices = @transform_0, window_bounds = array<i64: 1, 256, 4>}, {pipeline_mode = #tpu.pipeline_mode<synchronous>, transform_indices = @transform_1, window_bounds = array<i64: 4, 2>}, {pipeline_mode = #tpu.pipeline_mode<synchronous>, transform_indices = @transform_2, window_bounds = array<i64: 1, 2>}, {pipeline_mode = #tpu.pipeline_mode<synchronous>, transform_indices = @transform_3, window_bounds = array<i64: 4, 2, 8>}, {pipeline_mode = #tpu.pipeline_mode<synchronous>, transform_indices = @transform_4, window_bounds = array<i64: 1, 8>}, {transform_indices = @transform_5, window_bounds = array<i64: 1, 256, 8>}]} {
    %c0 = arith.constant 0 : index
    %c0_0 = arith.constant 0 : index
    %c0_1 = arith.constant 0 : index
    %0 = vector.load %arg1[%c0, %c0_0, %c0_1] : memref<1x256x4xf32, #tpu.memory_space<vmem>>, vector<1x256x4xf32>
    %1 = vector.shape_cast %0 : vector<1x256x4xf32> to vector<256x4xf32>
    %c0_2 = arith.constant 0 : index
    %c0_3 = arith.constant 0 : index
    %2 = vector.load %arg2[%c0_2, %c0_3] : memref<4x2xf32, #tpu.memory_space<vmem>>, vector<4x2xf32>
    %cst = arith.constant dense<0.000000e+00> : vector<256x2xf32>
    %3 = tpu.matmul %1, %2, %cst {dimension_numbers = #tpu.dot_dimension_numbers<[1], [0], [0], [1], [0, 0, 1, 1], [], []>} : vector<256x4xf32>, vector<4x2xf32>, vector<256x2xf32> -> vector<256x2xf32>
    %c0_4 = arith.constant 0 : index
    %c0_5 = arith.constant 0 : index
    %4 = vector.load %arg3[%c0_4, %c0_5] : memref<1x2xf32, #tpu.memory_space<vmem>>, vector<1x2xf32>
    %5 = vector.broadcast %4 : vector<1x2xf32> to vector<256x2xf32>
    %6 = arith.addf %3, %5 : vector<256x2xf32>
    %7 = arith.negf %6 : vector<256x2xf32>
    %8 = math.exp %7 : vector<256x2xf32>
    %cst_6 = arith.constant 1.000000e+00 : f32
    %9 = vector.broadcast %cst_6 : f32 to vector<256x2xf32>
    %10 = arith.addf %9, %8 : vector<256x2xf32>
    %11 = arith.divf %9, %10 : vector<256x2xf32>
    %12 = arith.mulf %6, %11 : vector<256x2xf32>
    %13 = tpu.iota {dimensions = array<i32: 0>} : vector<256x1xi32>
    %c16_i32 = arith.constant 16 : i32
    %c0_i32 = arith.constant 0 : i32
    %14 = arith.cmpi eq, %c16_i32, %c0_i32 : i32
    %c1_i32 = arith.constant 1 : i32
    %15 = arith.select %14, %c1_i32, %c16_i32 : i32
    %16 = vector.broadcast %15 : i32 to vector<256x1xi32>
    %17 = arith.remsi %13, %16 : vector<256x1xi32>
    %c0_i32_7 = arith.constant 0 : i32
    %18 = vector.broadcast %c0_i32_7 : i32 to vector<256x1xi32>
    %19 = arith.cmpi ne, %17, %18 : vector<256x1xi32>
    %c0_i32_8 = arith.constant 0 : i32
    %20 = vector.broadcast %c0_i32_8 : i32 to vector<256x1xi32>
    %21 = arith.cmpi slt, %17, %20 : vector<256x1xi32>
    %c0_i32_9 = arith.constant 0 : i32
    %22 = arith.cmpi slt, %15, %c0_i32_9 : i32
    %23 = vector.broadcast %22 : i1 to vector<256x1xi1>
    %24 = vector.broadcast %23 : vector<256x1xi1> to vector<256x1xi1>
    %25 = arith.xori %21, %24 : vector<256x1xi1>
    %26 = arith.andi %25, %19 : vector<256x1xi1>
    %27 = vector.broadcast %15 : i32 to vector<256x1xi32>
    %28 = arith.addi %17, %27 : vector<256x1xi32>
    %29 = arith.select %26, %28, %17 : vector<256x1xi1>, vector<256x1xi32>
    %c2_i32 = arith.constant 2 : i32
    %30 = vector.broadcast %c2_i32 : i32 to vector<256x1xi32>
    %31 = arith.cmpi sge, %29, %30 : vector<256x1xi32>
    %c1_i32_10 = arith.constant 1 : i32
    %32 = vector.broadcast %c1_i32_10 : i32 to vector<256x1xi32>
    %33 = arith.cmpi sge, %29, %32 : vector<256x1xi32>
    %c15_i32 = arith.constant 15 : i32
    %34 = vector.broadcast %c15_i32 : i32 to vector<256x1xi32>
    %35 = arith.cmpi slt, %29, %34 : vector<256x1xi32>
    %c14_i32 = arith.constant 14 : i32
    %36 = vector.broadcast %c14_i32 : i32 to vector<256x1xi32>
    %37 = arith.cmpi slt, %29, %36 : vector<256x1xi32>
    %c32_i32 = arith.constant 32 : i32
    %38 = vector.broadcast %c32_i32 : i32 to vector<256x1xi32>
    %39 = arith.cmpi sge, %13, %38 : vector<256x1xi32>
    %c16_i32_11 = arith.constant 16 : i32
    %40 = vector.broadcast %c16_i32_11 : i32 to vector<256x1xi32>
    %41 = arith.cmpi sge, %13, %40 : vector<256x1xi32>
    %c240_i32 = arith.constant 240 : i32
    %42 = vector.broadcast %c240_i32 : i32 to vector<256x1xi32>
    %43 = arith.cmpi slt, %13, %42 : vector<256x1xi32>
    %c224_i32 = arith.constant 224 : i32
    %44 = vector.broadcast %c224_i32 : i32 to vector<256x1xi32>
    %45 = arith.cmpi slt, %13, %44 : vector<256x1xi32>
    %c2_i32_12 = arith.constant 2 : i32
    %46 = tpu.dynamic_rotate %12 by %c2_i32_12 dim 0 : vector<256x2xf32>, i32 -> vector<256x2xf32>
    %cst_13 = arith.constant -1.000000e+30 : f32
    %47 = vector.shape_cast %31 : vector<256x1xi1> to vector<256x1xi1>
    %48 = vector.broadcast %47 : vector<256x1xi1> to vector<256x2xi1>
    %49 = vector.broadcast %cst_13 : f32 to vector<256x2xf32>
    %50 = arith.select %48, %46, %49 : vector<256x2xi1>, vector<256x2xf32>
    %c1_i32_14 = arith.constant 1 : i32
    %51 = tpu.dynamic_rotate %12 by %c1_i32_14 dim 0 : vector<256x2xf32>, i32 -> vector<256x2xf32>
    %cst_15 = arith.constant -1.000000e+30 : f32
    %52 = vector.shape_cast %33 : vector<256x1xi1> to vector<256x1xi1>
    %53 = vector.broadcast %52 : vector<256x1xi1> to vector<256x2xi1>
    %54 = vector.broadcast %cst_15 : f32 to vector<256x2xf32>
    %55 = arith.select %53, %51, %54 : vector<256x2xi1>, vector<256x2xf32>
    %56 = arith.maximumf %50, %55 : vector<256x2xf32>
    %c255_i32 = arith.constant 255 : i32
    %57 = tpu.dynamic_rotate %12 by %c255_i32 dim 0 : vector<256x2xf32>, i32 -> vector<256x2xf32>
    %cst_16 = arith.constant -1.000000e+30 : f32
    %58 = vector.shape_cast %35 : vector<256x1xi1> to vector<256x1xi1>
    %59 = vector.broadcast %58 : vector<256x1xi1> to vector<256x2xi1>
    %60 = vector.broadcast %cst_16 : f32 to vector<256x2xf32>
    %61 = arith.select %59, %57, %60 : vector<256x2xi1>, vector<256x2xf32>
    %c254_i32 = arith.constant 254 : i32
    %62 = tpu.dynamic_rotate %12 by %c254_i32 dim 0 : vector<256x2xf32>, i32 -> vector<256x2xf32>
    %cst_17 = arith.constant -1.000000e+30 : f32
    %63 = vector.shape_cast %37 : vector<256x1xi1> to vector<256x1xi1>
    %64 = vector.broadcast %63 : vector<256x1xi1> to vector<256x2xi1>
    %65 = vector.broadcast %cst_17 : f32 to vector<256x2xf32>
    %66 = arith.select %64, %62, %65 : vector<256x2xi1>, vector<256x2xf32>
    %67 = arith.maximumf %61, %66 : vector<256x2xf32>
    %68 = arith.maximumf %56, %67 : vector<256x2xf32>
    %69 = arith.maximumf %12, %68 : vector<256x2xf32>
    %c32_i32_18 = arith.constant 32 : i32
    %70 = tpu.dynamic_rotate %69 by %c32_i32_18 dim 0 : vector<256x2xf32>, i32 -> vector<256x2xf32>
    %cst_19 = arith.constant -1.000000e+30 : f32
    %71 = vector.shape_cast %39 : vector<256x1xi1> to vector<256x1xi1>
    %72 = vector.broadcast %71 : vector<256x1xi1> to vector<256x2xi1>
    %73 = vector.broadcast %cst_19 : f32 to vector<256x2xf32>
    %74 = arith.select %72, %70, %73 : vector<256x2xi1>, vector<256x2xf32>
    %c16_i32_20 = arith.constant 16 : i32
    %75 = tpu.dynamic_rotate %69 by %c16_i32_20 dim 0 : vector<256x2xf32>, i32 -> vector<256x2xf32>
    %cst_21 = arith.constant -1.000000e+30 : f32
    %76 = vector.shape_cast %41 : vector<256x1xi1> to vector<256x1xi1>
    %77 = vector.broadcast %76 : vector<256x1xi1> to vector<256x2xi1>
    %78 = vector.broadcast %cst_21 : f32 to vector<256x2xf32>
    %79 = arith.select %77, %75, %78 : vector<256x2xi1>, vector<256x2xf32>
    %80 = arith.maximumf %74, %79 : vector<256x2xf32>
    %c240_i32_22 = arith.constant 240 : i32
    %81 = tpu.dynamic_rotate %69 by %c240_i32_22 dim 0 : vector<256x2xf32>, i32 -> vector<256x2xf32>
    %cst_23 = arith.constant -1.000000e+30 : f32
    %82 = vector.shape_cast %43 : vector<256x1xi1> to vector<256x1xi1>
    %83 = vector.broadcast %82 : vector<256x1xi1> to vector<256x2xi1>
    %84 = vector.broadcast %cst_23 : f32 to vector<256x2xf32>
    %85 = arith.select %83, %81, %84 : vector<256x2xi1>, vector<256x2xf32>
    %c224_i32_24 = arith.constant 224 : i32
    %86 = tpu.dynamic_rotate %69 by %c224_i32_24 dim 0 : vector<256x2xf32>, i32 -> vector<256x2xf32>
    %cst_25 = arith.constant -1.000000e+30 : f32
    %87 = vector.shape_cast %45 : vector<256x1xi1> to vector<256x1xi1>
    %88 = vector.broadcast %87 : vector<256x1xi1> to vector<256x2xi1>
    %89 = vector.broadcast %cst_25 : f32 to vector<256x2xf32>
    %90 = arith.select %88, %86, %89 : vector<256x2xi1>, vector<256x2xf32>
    %91 = arith.maximumf %85, %90 : vector<256x2xf32>
    %92 = arith.maximumf %80, %91 : vector<256x2xf32>
    %93 = arith.maximumf %69, %92 : vector<256x2xf32>
    %c2_i32_26 = arith.constant 2 : i32
    %94 = tpu.dynamic_rotate %93 by %c2_i32_26 dim 0 : vector<256x2xf32>, i32 -> vector<256x2xf32>
    %cst_27 = arith.constant -1.000000e+30 : f32
    %95 = vector.shape_cast %31 : vector<256x1xi1> to vector<256x1xi1>
    %96 = vector.broadcast %95 : vector<256x1xi1> to vector<256x2xi1>
    %97 = vector.broadcast %cst_27 : f32 to vector<256x2xf32>
    %98 = arith.select %96, %94, %97 : vector<256x2xi1>, vector<256x2xf32>
    %c1_i32_28 = arith.constant 1 : i32
    %99 = tpu.dynamic_rotate %93 by %c1_i32_28 dim 0 : vector<256x2xf32>, i32 -> vector<256x2xf32>
    %cst_29 = arith.constant -1.000000e+30 : f32
    %100 = vector.shape_cast %33 : vector<256x1xi1> to vector<256x1xi1>
    %101 = vector.broadcast %100 : vector<256x1xi1> to vector<256x2xi1>
    %102 = vector.broadcast %cst_29 : f32 to vector<256x2xf32>
    %103 = arith.select %101, %99, %102 : vector<256x2xi1>, vector<256x2xf32>
    %104 = arith.maximumf %98, %103 : vector<256x2xf32>
    %c255_i32_30 = arith.constant 255 : i32
    %105 = tpu.dynamic_rotate %93 by %c255_i32_30 dim 0 : vector<256x2xf32>, i32 -> vector<256x2xf32>
    %cst_31 = arith.constant -1.000000e+30 : f32
    %106 = vector.shape_cast %35 : vector<256x1xi1> to vector<256x1xi1>
    %107 = vector.broadcast %106 : vector<256x1xi1> to vector<256x2xi1>
    %108 = vector.broadcast %cst_31 : f32 to vector<256x2xf32>
    %109 = arith.select %107, %105, %108 : vector<256x2xi1>, vector<256x2xf32>
    %c254_i32_32 = arith.constant 254 : i32
    %110 = tpu.dynamic_rotate %93 by %c254_i32_32 dim 0 : vector<256x2xf32>, i32 -> vector<256x2xf32>
    %cst_33 = arith.constant -1.000000e+30 : f32
    %111 = vector.shape_cast %37 : vector<256x1xi1> to vector<256x1xi1>
    %112 = vector.broadcast %111 : vector<256x1xi1> to vector<256x2xi1>
    %113 = vector.broadcast %cst_33 : f32 to vector<256x2xf32>
    %114 = arith.select %112, %110, %113 : vector<256x2xi1>, vector<256x2xf32>
    %115 = arith.maximumf %109, %114 : vector<256x2xf32>
    %116 = arith.maximumf %104, %115 : vector<256x2xf32>
    %117 = arith.maximumf %93, %116 : vector<256x2xf32>
    %c32_i32_34 = arith.constant 32 : i32
    %118 = tpu.dynamic_rotate %117 by %c32_i32_34 dim 0 : vector<256x2xf32>, i32 -> vector<256x2xf32>
    %cst_35 = arith.constant -1.000000e+30 : f32
    %119 = vector.shape_cast %39 : vector<256x1xi1> to vector<256x1xi1>
    %120 = vector.broadcast %119 : vector<256x1xi1> to vector<256x2xi1>
    %121 = vector.broadcast %cst_35 : f32 to vector<256x2xf32>
    %122 = arith.select %120, %118, %121 : vector<256x2xi1>, vector<256x2xf32>
    %c16_i32_36 = arith.constant 16 : i32
    %123 = tpu.dynamic_rotate %117 by %c16_i32_36 dim 0 : vector<256x2xf32>, i32 -> vector<256x2xf32>
    %cst_37 = arith.constant -1.000000e+30 : f32
    %124 = vector.shape_cast %41 : vector<256x1xi1> to vector<256x1xi1>
    %125 = vector.broadcast %124 : vector<256x1xi1> to vector<256x2xi1>
    %126 = vector.broadcast %cst_37 : f32 to vector<256x2xf32>
    %127 = arith.select %125, %123, %126 : vector<256x2xi1>, vector<256x2xf32>
    %128 = arith.maximumf %122, %127 : vector<256x2xf32>
    %c240_i32_38 = arith.constant 240 : i32
    %129 = tpu.dynamic_rotate %117 by %c240_i32_38 dim 0 : vector<256x2xf32>, i32 -> vector<256x2xf32>
    %cst_39 = arith.constant -1.000000e+30 : f32
    %130 = vector.shape_cast %43 : vector<256x1xi1> to vector<256x1xi1>
    %131 = vector.broadcast %130 : vector<256x1xi1> to vector<256x2xi1>
    %132 = vector.broadcast %cst_39 : f32 to vector<256x2xf32>
    %133 = arith.select %131, %129, %132 : vector<256x2xi1>, vector<256x2xf32>
    %c224_i32_40 = arith.constant 224 : i32
    %134 = tpu.dynamic_rotate %117 by %c224_i32_40 dim 0 : vector<256x2xf32>, i32 -> vector<256x2xf32>
    %cst_41 = arith.constant -1.000000e+30 : f32
    %135 = vector.shape_cast %45 : vector<256x1xi1> to vector<256x1xi1>
    %136 = vector.broadcast %135 : vector<256x1xi1> to vector<256x2xi1>
    %137 = vector.broadcast %cst_41 : f32 to vector<256x2xf32>
    %138 = arith.select %136, %134, %137 : vector<256x2xi1>, vector<256x2xf32>
    %139 = arith.maximumf %133, %138 : vector<256x2xf32>
    %140 = arith.maximumf %128, %139 : vector<256x2xf32>
    %141 = arith.maximumf %117, %140 : vector<256x2xf32>
    %c2_i32_42 = arith.constant 2 : i32
    %142 = tpu.dynamic_rotate %141 by %c2_i32_42 dim 0 : vector<256x2xf32>, i32 -> vector<256x2xf32>
    %cst_43 = arith.constant -1.000000e+30 : f32
    %143 = vector.shape_cast %31 : vector<256x1xi1> to vector<256x1xi1>
    %144 = vector.broadcast %143 : vector<256x1xi1> to vector<256x2xi1>
    %145 = vector.broadcast %cst_43 : f32 to vector<256x2xf32>
    %146 = arith.select %144, %142, %145 : vector<256x2xi1>, vector<256x2xf32>
    %c1_i32_44 = arith.constant 1 : i32
    %147 = tpu.dynamic_rotate %141 by %c1_i32_44 dim 0 : vector<256x2xf32>, i32 -> vector<256x2xf32>
    %cst_45 = arith.constant -1.000000e+30 : f32
    %148 = vector.shape_cast %33 : vector<256x1xi1> to vector<256x1xi1>
    %149 = vector.broadcast %148 : vector<256x1xi1> to vector<256x2xi1>
    %150 = vector.broadcast %cst_45 : f32 to vector<256x2xf32>
    %151 = arith.select %149, %147, %150 : vector<256x2xi1>, vector<256x2xf32>
    %152 = arith.maximumf %146, %151 : vector<256x2xf32>
    %c255_i32_46 = arith.constant 255 : i32
    %153 = tpu.dynamic_rotate %141 by %c255_i32_46 dim 0 : vector<256x2xf32>, i32 -> vector<256x2xf32>
    %cst_47 = arith.constant -1.000000e+30 : f32
    %154 = vector.shape_cast %35 : vector<256x1xi1> to vector<256x1xi1>
    %155 = vector.broadcast %154 : vector<256x1xi1> to vector<256x2xi1>
    %156 = vector.broadcast %cst_47 : f32 to vector<256x2xf32>
    %157 = arith.select %155, %153, %156 : vector<256x2xi1>, vector<256x2xf32>
    %c254_i32_48 = arith.constant 254 : i32
    %158 = tpu.dynamic_rotate %141 by %c254_i32_48 dim 0 : vector<256x2xf32>, i32 -> vector<256x2xf32>
    %cst_49 = arith.constant -1.000000e+30 : f32
    %159 = vector.shape_cast %37 : vector<256x1xi1> to vector<256x1xi1>
    %160 = vector.broadcast %159 : vector<256x1xi1> to vector<256x2xi1>
    %161 = vector.broadcast %cst_49 : f32 to vector<256x2xf32>
    %162 = arith.select %160, %158, %161 : vector<256x2xi1>, vector<256x2xf32>
    %163 = arith.maximumf %157, %162 : vector<256x2xf32>
    %164 = arith.maximumf %152, %163 : vector<256x2xf32>
    %165 = arith.maximumf %141, %164 : vector<256x2xf32>
    %c32_i32_50 = arith.constant 32 : i32
    %166 = tpu.dynamic_rotate %165 by %c32_i32_50 dim 0 : vector<256x2xf32>, i32 -> vector<256x2xf32>
    %cst_51 = arith.constant -1.000000e+30 : f32
    %167 = vector.shape_cast %39 : vector<256x1xi1> to vector<256x1xi1>
    %168 = vector.broadcast %167 : vector<256x1xi1> to vector<256x2xi1>
    %169 = vector.broadcast %cst_51 : f32 to vector<256x2xf32>
    %170 = arith.select %168, %166, %169 : vector<256x2xi1>, vector<256x2xf32>
    %c16_i32_52 = arith.constant 16 : i32
    %171 = tpu.dynamic_rotate %165 by %c16_i32_52 dim 0 : vector<256x2xf32>, i32 -> vector<256x2xf32>
    %cst_53 = arith.constant -1.000000e+30 : f32
    %172 = vector.shape_cast %41 : vector<256x1xi1> to vector<256x1xi1>
    %173 = vector.broadcast %172 : vector<256x1xi1> to vector<256x2xi1>
    %174 = vector.broadcast %cst_53 : f32 to vector<256x2xf32>
    %175 = arith.select %173, %171, %174 : vector<256x2xi1>, vector<256x2xf32>
    %176 = arith.maximumf %170, %175 : vector<256x2xf32>
    %c240_i32_54 = arith.constant 240 : i32
    %177 = tpu.dynamic_rotate %165 by %c240_i32_54 dim 0 : vector<256x2xf32>, i32 -> vector<256x2xf32>
    %cst_55 = arith.constant -1.000000e+30 : f32
    %178 = vector.shape_cast %43 : vector<256x1xi1> to vector<256x1xi1>
    %179 = vector.broadcast %178 : vector<256x1xi1> to vector<256x2xi1>
    %180 = vector.broadcast %cst_55 : f32 to vector<256x2xf32>
    %181 = arith.select %179, %177, %180 : vector<256x2xi1>, vector<256x2xf32>
    %c224_i32_56 = arith.constant 224 : i32
    %182 = tpu.dynamic_rotate %165 by %c224_i32_56 dim 0 : vector<256x2xf32>, i32 -> vector<256x2xf32>
    %cst_57 = arith.constant -1.000000e+30 : f32
    %183 = vector.shape_cast %45 : vector<256x1xi1> to vector<256x1xi1>
    %184 = vector.broadcast %183 : vector<256x1xi1> to vector<256x2xi1>
    %185 = vector.broadcast %cst_57 : f32 to vector<256x2xf32>
    %186 = arith.select %184, %182, %185 : vector<256x2xi1>, vector<256x2xf32>
    %187 = arith.maximumf %181, %186 : vector<256x2xf32>
    %188 = arith.maximumf %176, %187 : vector<256x2xf32>
    %189 = arith.maximumf %165, %188 : vector<256x2xf32>
    %c0_58 = arith.constant 0 : index
    %c0_59 = arith.constant 0 : index
    %c0_60 = arith.constant 0 : index
    %190 = vector.load %arg4[%c0_58, %c0_59, %c0_60] : memref<4x2x8xf32, #tpu.memory_space<vmem>>, vector<1x2x8xf32>
    %191 = vector.shape_cast %190 : vector<1x2x8xf32> to vector<2x8xf32>
    %cst_61 = arith.constant dense<0.000000e+00> : vector<256x8xf32>
    %192 = tpu.matmul %12, %191, %cst_61 {dimension_numbers = #tpu.dot_dimension_numbers<[1], [0], [0], [1], [0, 0, 1, 1], [], []>} : vector<256x2xf32>, vector<2x8xf32>, vector<256x8xf32> -> vector<256x8xf32>
    %c1 = arith.constant 1 : index
    %c0_62 = arith.constant 0 : index
    %c0_63 = arith.constant 0 : index
    %193 = vector.load %arg4[%c1, %c0_62, %c0_63] : memref<4x2x8xf32, #tpu.memory_space<vmem>>, vector<1x2x8xf32>
    %194 = vector.shape_cast %193 : vector<1x2x8xf32> to vector<2x8xf32>
    %cst_64 = arith.constant dense<0.000000e+00> : vector<256x8xf32>
    %195 = tpu.matmul %93, %194, %cst_64 {dimension_numbers = #tpu.dot_dimension_numbers<[1], [0], [0], [1], [0, 0, 1, 1], [], []>} : vector<256x2xf32>, vector<2x8xf32>, vector<256x8xf32> -> vector<256x8xf32>
    %196 = arith.addf %192, %195 : vector<256x8xf32>
    %c2 = arith.constant 2 : index
    %c0_65 = arith.constant 0 : index
    %c0_66 = arith.constant 0 : index
    %197 = vector.load %arg4[%c2, %c0_65, %c0_66] : memref<4x2x8xf32, #tpu.memory_space<vmem>>, vector<1x2x8xf32>
    %198 = vector.shape_cast %197 : vector<1x2x8xf32> to vector<2x8xf32>
    %cst_67 = arith.constant dense<0.000000e+00> : vector<256x8xf32>
    %199 = tpu.matmul %141, %198, %cst_67 {dimension_numbers = #tpu.dot_dimension_numbers<[1], [0], [0], [1], [0, 0, 1, 1], [], []>} : vector<256x2xf32>, vector<2x8xf32>, vector<256x8xf32> -> vector<256x8xf32>
    %200 = arith.addf %196, %199 : vector<256x8xf32>
    %c3 = arith.constant 3 : index
    %c0_68 = arith.constant 0 : index
    %c0_69 = arith.constant 0 : index
    %201 = vector.load %arg4[%c3, %c0_68, %c0_69] : memref<4x2x8xf32, #tpu.memory_space<vmem>>, vector<1x2x8xf32>
    %202 = vector.shape_cast %201 : vector<1x2x8xf32> to vector<2x8xf32>
    %cst_70 = arith.constant dense<0.000000e+00> : vector<256x8xf32>
    %203 = tpu.matmul %189, %202, %cst_70 {dimension_numbers = #tpu.dot_dimension_numbers<[1], [0], [0], [1], [0, 0, 1, 1], [], []>} : vector<256x2xf32>, vector<2x8xf32>, vector<256x8xf32> -> vector<256x8xf32>
    %204 = arith.addf %200, %203 : vector<256x8xf32>
    %c0_71 = arith.constant 0 : index
    %c0_72 = arith.constant 0 : index
    %205 = vector.load %arg5[%c0_71, %c0_72] : memref<1x8xf32, #tpu.memory_space<vmem>>, vector<1x8xf32>
    %206 = vector.broadcast %205 : vector<1x8xf32> to vector<256x8xf32>
    %207 = arith.addf %204, %206 : vector<256x8xf32>
    %208 = arith.negf %207 : vector<256x8xf32>
    %209 = math.exp %208 : vector<256x8xf32>
    %cst_73 = arith.constant 1.000000e+00 : f32
    %210 = vector.broadcast %cst_73 : f32 to vector<256x8xf32>
    %211 = arith.addf %210, %209 : vector<256x8xf32>
    %212 = arith.divf %210, %211 : vector<256x8xf32>
    %213 = arith.mulf %207, %212 : vector<256x8xf32>
    %c0_74 = arith.constant 0 : index
    %c0_75 = arith.constant 0 : index
    %c0_76 = arith.constant 0 : index
    %214 = vector.load %arg6[%c0_74, %c0_75, %c0_76] : memref<1x256x8xf32, #tpu.memory_space<vmem>>, vector<1x256x8xf32>
    %215 = vector.shape_cast %214 : vector<1x256x8xf32> to vector<256x8xf32>
    %216 = vector.shape_cast %213 : vector<256x8xf32> to vector<1x256x8xf32>
    tpu.vector_store %arg6[%c0_74, %c0_75, %c0_76], %216 {strides = array<i32>} : memref<1x256x8xf32, #tpu.memory_space<vmem>>, vector<1x256x8xf32>,
    return
  }
  func.func @transform_0(%arg0: i32) -> (i32, i32, i32) {
    %c0_i32 = arith.constant 0 : i32
    %c0_i32_0 = arith.constant 0 : i32
    %c0_i32_1 = arith.constant 0 : i32
    return %arg0, %c0_i32, %c0_i32_0 : i32, i32, i32
  }
  func.func @transform_1(%arg0: i32) -> (i32, i32) {
    %c0_i32 = arith.constant 0 : i32
    %c0_i32_0 = arith.constant 0 : i32
    %c0_i32_1 = arith.constant 0 : i32
    return %c0_i32, %c0_i32_0 : i32, i32
  }
  func.func @transform_2(%arg0: i32) -> (i32, i32) {
    %c0_i32 = arith.constant 0 : i32
    %c0_i32_0 = arith.constant 0 : i32
    %c0_i32_1 = arith.constant 0 : i32
    return %c0_i32, %c0_i32_0 : i32, i32
  }
  func.func @transform_3(%arg0: i32) -> (i32, i32, i32) {
    %c0_i32 = arith.constant 0 : i32
    %c0_i32_0 = arith.constant 0 : i32
    %c0_i32_1 = arith.constant 0 : i32
    %c0_i32_2 = arith.constant 0 : i32
    return %c0_i32, %c0_i32_0, %c0_i32_1 : i32, i32, i32
  }
  func.func @transform_4(%arg0: i32) -> (i32, i32) {
    %c0_i32 = arith.constant 0 : i32
    %c0_i32_0 = arith.constant 0 : i32
    %c0_i32_1 = arith.constant 0 : i32
    return %c0_i32, %c0_i32_0 : i32, i32
  }
  func.func @transform_5(%arg0: i32) -> (i32, i32, i32) {
    %c0_i32 = arith.constant 0 : i32
    %c0_i32_0 = arith.constant 0 : i32
    %c0_i32_1 = arith.constant 0 : i32
    return %arg0, %c0_i32, %c0_i32_0 : i32, i32, i32
  }
}

</mosaic_0001>

<bundles_post_ra>
// kernel: spp_bottleneck.1
= control target key start
LH: loop header
LB: loop body
LE: loop exit
PB: predicated region body
PF: predicated region fallthrough
CT: control target
= control target key end

     0   :  { %s7091_s18 = smov 0   ;;  %s11693_s0 = inlined_call_operand.vmem [shape: f32[2,256,4], index: 0, kind: input, shape index: {}]   ;;  %s11694_s1 = inlined_call_operand.vmem [shape: f32[4,2], index: 1, kind: input, shape index: {}]   ;;  %s11695_s2 = inlined_call_operand.vmem [shape: f32[1,2], index: 2, kind: input, shape index: {}]   ;;  %s11696_s3 = inlined_call_operand.vmem [shape: f32[4,2,8], index: 3, kind: input, shape index: {}]   ;;  %s11697_s4 = inlined_call_operand.vmem [shape: f32[1,8], index: 4, kind: input, shape index: {}]   ;;  %s11698_s5 = inlined_call_operand.vmem [shape: f32[2,256,8], index: 5, kind: output, shape index: {}]  }
   0x1 LB: > { %s6028_s19 = sadd.s32 4294967295, %s7059_s18   ;;  %p6032_p0 = scmp.ge.s32.totalorder %s7059_s18, 1  ;;  %s7059_s18 = sphi %s7091_s18, %s15_s18  }
   0x2   : > { %p187_p1 = scmp.lt.s32.totalorder %s7059_s18, 3 }
   0x4   : > { %p188_p2 = pnand %p6032_p0, %p187_p1 }
   0x6   : > { %191 = sbr.rel (%p188_p2) target bundleno = 1137 (0x471), region = 40 }
   0xd   : > { %v257_v0 = vld [vmem:[%s11694_s1] sm:$0xf]  ;;  %vm362_vm0 = vcmask 1043456   ;;  %p215_p3 = scmp.lt.s32.totalorder %s6028_s19, 1  ;;  %vm265_vm1 = vcmask 31744   ;;  %v815_v39 = vlaneseq }
   0xe   : > { %6440 = vmatprep.subr.msk.mxu0 %vm362_vm0, %v257_v0  ;;  %v7179_v33 = vld [vmem:[%s11695_s2] ss:$0 sm:$0xff] }
   0xf   : > { %6441 = vmatpush3.msk.msra.mxu0 %vm362_vm0, %v257_v0  ;;  %s13437_s19 = smov (!%p215_p3, %s6028_s19), 1  ;;  %v7195_v45 = vshrl.u32 %v815_v39, 7 }
  0x10   : > { %s6273_s22 = sshll.u32 %s13437_s19, 8 }
  0x11   : > { %s7110_s25 = scalar_lea.vmem %s11693_s0, %s6273_s22  ;;  %v7206_v52 = vadd.s32 8, %v7195_v45  ;;  %v7209_v53 = vadd.s32 16, %v7195_v45  ;;  %v7213_v55 = vadd.s32 24, %v7195_v45  ;;  %v7217_v57 = vadd.s32 32, %v7195_v45  ;;  %s11476_s17 = scalar_lea.vmem %s11698_s5, %s6273_s22 }
  0x12   : > { %v225_v1 = vld [vmem:[%s7110_s25] sm:$0xff]  ;;  %v226_v2 = vld [vmem:[%s7110_s25 + $0x8] sm:$0xff]  ;;  %v227_v3 = vld [vmem:[%s7110_s25 + $0x10] sm:$0xff]  ;;  %v7220_v59 = vadd.s32 40, %v7195_v45  ;;  %v7226_v62 = vadd.s32 48, %v7195_v45  ;;  %v7232_v0 = vadd.s32 56, %v7195_v45 }
  0x13   : > { %6442 = vmatprep.mubr.msk.f32.mxu0 %vm265_vm1, %v225_v1  ;;  %v228_v4 = vld [vmem:[%s7110_s25 + $0x18] sm:$0xff]  ;;  %v229_v5 = vld [vmem:[%s7110_s25 + $0x20] sm:$0xff]  ;;  %v230_v6 = vld [vmem:[%s7110_s25 + $0x28] sm:$0xff]  ;;  %vm11750_vm2 = vcmp.lt.s32.totalorder %v7195_v45, 2  ;;  %vm11747_vm3 = vcmp.lt.s32.totalorder %v7195_v45, 1  ;;  %vm11752_vm4 = vcmp.lt.s32.totalorder %v7195_v45, 7 }
  0x14   : > { %6443 = vmatmul.mubr.msk.f32.vlgmr.msra.gmra.mrb[0].mxu0 %vm265_vm1, %v226_v2  ;;  %v231_v7 = vld [vmem:[%s7110_s25 + $0x30] sm:$0xff]  ;;  %v232_v8 = vld [vmem:[%s7110_s25 + $0x38] sm:$0xff]  ;;  %v233_v9 = vld [vmem:[%s7110_s25 + $0x40] sm:$0xff]  ;;  %v11699_v2 = vand.u32 15, %v7206_v52  ;;  %vm11751_vm5 = vcmp.lt.s32.totalorder %v7195_v45, 6 }
  0x15   : > { %6445 = vmatprep.mubr.msk.f32.mxu0 %vm265_vm1, %v227_v3  ;;  %v234_v10 = vld [vmem:[%s7110_s25 + $0x48] sm:$0xff]  ;;  %v235_v11 = vld [vmem:[%s7110_s25 + $0x50] sm:$0xff]  ;;  %v236_v12 = vld [vmem:[%s7110_s25 + $0x58] sm:$0xff]  ;;  %v866_v3 = vand.u32 15, %v7209_v53 }
  0x16   : > { %v237_v13 = vld [vmem:[%s7110_s25 + $0x60] sm:$0xff]  ;;  %v238_v14 = vld [vmem:[%s7110_s25 + $0x68] sm:$0xff]  ;;  %v239_v15 = vld [vmem:[%s7110_s25 + $0x70] sm:$0xff]  ;;  %vm7390_vm8 = vcmp.lt.s32.totalorder %v11699_v2, 15  ;;  %v12119_v2 = vand.u32 15, %v7217_v57 }
  0x17   : > { %v240_v16 = vld [vmem:[%s7110_s25 + $0x78] sm:$0xff]  ;;  %v241_v17 = vld [vmem:[%s7110_s25 + $0x80] sm:$0xff]  ;;  %v242_v18 = vld [vmem:[%s7110_s25 + $0x88] sm:$0xff]  ;;  %vm7345_vm6 = vcmp.ge.s32.totalorder %v866_v3, 2  ;;  %vm7351_vm7 = vcmp.ge.s32.totalorder %v866_v3, 1 }
  0x18   : > { %6446 = vmatmul.mubr.msk.f32.gmra.mrb[2].mxu0 %vm265_vm1, %v228_v4  ;;  %v243_v19 = vld [vmem:[%s7110_s25 + $0x90] sm:$0xff]  ;;  %v244_v20 = vld [vmem:[%s7110_s25 + $0x98] sm:$0xff]  ;;  %v245_v21 = vld [vmem:[%s7110_s25 + $0xa0] sm:$0xff]  ;;  %vm7408_vm9 = vcmp.ge.s32.totalorder %v12119_v2, 2 }
  0x19   : > { %6448 = vmatprep.mubr.msk.f32.mxu0 %vm265_vm1, %v229_v5  ;;  %v246_v22 = vld [vmem:[%s7110_s25 + $0xa8] sm:$0xff]  ;;  %v247_v23 = vld [vmem:[%s7110_s25 + $0xb0] sm:$0xff]  ;;  %v248_v24 = vld [vmem:[%s7110_s25 + $0xb8] sm:$0xff] }
  0x1a   : > { %v249_v25 = vld [vmem:[%s7110_s25 + $0xc0] sm:$0xff]  ;;  %v250_v26 = vld [vmem:[%s7110_s25 + $0xc8] sm:$0xff]  ;;  %v251_v27 = vld [vmem:[%s7110_s25 + $0xd0] sm:$0xff] }
  0x1b   : > { %v252_v28 = vld [vmem:[%s7110_s25 + $0xd8] sm:$0xff]  ;;  %v253_v29 = vld [vmem:[%s7110_s25 + $0xe0] sm:$0xff]  ;;  %v254_v30 = vld [vmem:[%s7110_s25 + $0xe8] sm:$0xff] }
  0x1c   : > { %6449 = vmatmul.mubr.msk.f32.gmra.mrb[4].mxu0 %vm265_vm1, %v230_v6  ;;  %v255_v31 = vld [vmem:[%s7110_s25 + $0xf0] sm:$0xff]  ;;  %v256_v32 = vld [vmem:[%s7110_s25 + $0xf8] sm:$0xff] }
  0x1d   : > { %6451 = vmatprep.mubr.msk.f32.mxu0 %vm265_vm1, %v231_v7 }
  0x20   : > { %6452 = vmatmul.mubr.msk.f32.gmra.mrb[6].mxu0 %vm265_vm1, %v232_v8 }
  0x21   : > { %6454 = vmatprep.mubr.msk.f32.mxu0 %vm265_vm1, %v233_v9 }
  0x24   : > { %6455 = vmatmul.mubr.msk.f32.gmra.mrb[8].mxu0 %vm265_vm1, %v234_v10 }
  0x25   : > { %6457 = vmatprep.mubr.msk.f32.mxu0 %vm265_vm1, %v235_v11 }
  0x28   : > { %6458 = vmatmul.mubr.msk.f32.gmra.mrb[10].mxu0 %vm265_vm1, %v236_v12 }
  0x29   : > { %6460 = vmatprep.mubr.msk.f32.mxu0 %vm265_vm1, %v237_v13 }
  0x2c   : > { %6461 = vmatmul.mubr.msk.f32.gmra.mrb[12].mxu0 %vm265_vm1, %v238_v14 }
  0x2d   : > { %6463 = vmatprep.mubr.msk.f32.mxu0 %vm265_vm1, %v239_v15 }
  0x30   : > { %6464 = vmatmul.mubr.msk.f32.gmra.mrb[14].mxu0 %vm265_vm1, %v240_v16  ;;  %v7246_v16 = vadd.s32 64, %v7195_v45 }
  0x31   : > { %6466 = vmatprep.mubr.msk.f32.mxu0 %vm265_vm1, %v241_v17 }
  0x34   : > { %6467 = vmatmul.mubr.msk.f32.gmra.mrb[16].mxu0 %vm265_vm1, %v242_v18  ;;  %v7250_v18 = vadd.s32 72, %v7195_v45 }
  0x35   : > { %6469 = vmatprep.mubr.msk.f32.mxu0 %vm265_vm1, %v243_v19 }
  0x38   : > { %6470 = vmatmul.mubr.msk.f32.gmra.mrb[18].mxu0 %vm265_vm1, %v244_v20 }
  0x39   : > { %6472 = vmatprep.mubr.msk.f32.mxu0 %vm265_vm1, %v245_v21  ;;  %v7254_v21 = vadd.s32 80, %v7195_v45 }
  0x3c   : > { %6473 = vmatmul.mubr.msk.f32.gmra.mrb[20].mxu0 %vm265_vm1, %v246_v22  ;;  %v7257_v22 = vadd.s32 88, %v7195_v45 }
  0x3d   : > { %6475 = vmatprep.mubr.msk.f32.mxu0 %vm265_vm1, %v247_v23 }
  0x3e   : > { %12087 = vst [vmem:[#allocation2_spill] sm:$0xff] %v7257_v22 }
  0x40   : > { %6476 = vmatmul.mubr.msk.f32.gmra.mrb[22].mxu0 %vm265_vm1, %v248_v24 }
  0x41   : > { %6478 = vmatprep.mubr.msk.f32.mxu0 %vm265_vm1, %v249_v25 }
  0x44   : > { %6479 = vmatmul.mubr.msk.f32.gmra.mrb[24].mxu0 %vm265_vm1, %v250_v26  ;;  %v7260_v26 = vadd.s32 96, %v7195_v45 }
  0x45   : > { %6481 = vmatprep.mubr.msk.f32.mxu0 %vm265_vm1, %v251_v27  ;;  %v7263_v27 = vadd.s32 104, %v7195_v45 }
  0x47   : > { %12088 = vst [vmem:[#allocation3_spill] sm:$0xff] %v7263_v27 }
  0x48   : > { %6482 = vmatmul.mubr.msk.f32.gmra.mrb[26].mxu0 %vm265_vm1, %v252_v28 }
  0x49   : > { %6484 = vmatprep.mubr.msk.f32.mxu0 %vm265_vm1, %v253_v29 }
  0x4c   : > { %6485 = vmatmul.mubr.msk.f32.gmra.mrb[28].mxu0 %vm265_vm1, %v254_v30 }
  0x4d   : > { %6487 = vmatprep.mubr.msk.f32.mxu0 %vm265_vm1, %v255_v31  ;;  %v7269_v31 = vadd.s32 112, %v7195_v45 }
  0x4f   : > { %12089 = vst [vmem:[#allocation4_spill] sm:$0xff] %v7269_v31 }
  0x50   : > { %6488 = vmatmul.mubr.msk.f32.gmra.mrb[30].mxu0 %vm265_vm1, %v256_v32 }
  0xe7   : > { %v6444_v34 = vpop.f32.mrb[0].mxu0 }
  0xe8   : > { %v7182_v35 = vadd.f32 %v6444_v34, %v7179_v33  ;;  %v432_v36 = vpop.f32.mrb[1].mxu0 }
  0xe9   : > { %v7185_v37 = vadd.f32 %v7179_v33, %v432_v36  ;;  %v7274_v36 = vadd.s32 120, %v7195_v45 }
  0xea   : > { %v6072_v38 = vmul.f32 -1.442695, %v7182_v35 }
  0xeb   : > { %v6071_v40 = vmul.f32 -1.442695, %v7185_v37  ;;  %v6447_v41 = vpop.f32.mrb[2].mxu0  ;;  %12090 = vst [vmem:[#allocation5_spill] sm:$0xff] %v7274_v36 }
  0xec   : > { %6796 = vpow2.f32 %v6072_v38  ;;  %v7190_v42 = vadd.f32 %v6447_v41, %v7179_v33  ;;  %v442_v43 = vpop.f32.mrb[3].mxu0  ;;  %v7281_v41 = vadd.s32 128, %v7195_v45 }
  0xed   : > { %6798 = vpow2.f32 %v6071_v40  ;;  %v7193_v44 = vadd.f32 %v7179_v33, %v442_v43 }
  0xee   : > { %v6074_v46 = vmul.f32 -1.442695, %v7190_v42  ;;  %12091 = vst [vmem:[#allocation6_spill] sm:$0xff] %v7281_v41 }
  0xef   : > { %v6073_v47 = vmul.f32 -1.442695, %v7193_v44  ;;  %v6450_v48 = vpop.f32.mrb[4].mxu0 }
  0xf0   : > { %6800 = vpow2.f32 %v6074_v46  ;;  %v7200_v49 = vadd.f32 %v6450_v48, %v7179_v33  ;;  %v452_v50 = vpop.f32.mrb[5].mxu0 }
  0xf1   : > { %6802 = vpow2.f32 %v6073_v47  ;;  %v7203_v51 = vadd.f32 %v7179_v33, %v452_v50 }
  0xf2   : > { %v6076_v54 = vmul.f32 -1.442695, %v7200_v49 }
  0xf3   : > { %v6075_v56 = vmul.f32 -1.442695, %v7203_v51  ;;  %v6453_v58 = vpop.f32.mrb[6].mxu0 }
  0xf4   : > { %6804 = vpow2.f32 %v6076_v54  ;;  %v7223_v60 = vadd.f32 %v6453_v58, %v7179_v33  ;;  %v462_v61 = vpop.f32.mrb[7].mxu0 }
  0xf5   : > { %6806 = vpow2.f32 %v6075_v56  ;;  %v7229_v63 = vadd.f32 %v7179_v33, %v462_v61 }
  0xf6   : > { %v6797_v1 = vpop.eup %6796  ;;  %v6078_v5 = vmul.f32 -1.442695, %v7223_v60 }
  0xf7   : > { %v6799_v6 = vpop.eup %6798  ;;  %v688_v7 = vadd.f32 1.0, %v6797_v1  ;;  %v6077_v9 = vmul.f32 -1.442695, %v7229_v63  ;;  %v6456_v11 = vpop.f32.mrb[8].mxu0  ;;  %v7322_v1 = vadd.s32 192, %v7195_v45 }
  0xf8   : > { %v687_v12 = vadd.f32 1.0, %v6799_v6  ;;  %6808 = vpow2.f32 %v6078_v5  ;;  %v7243_v14 = vadd.f32 %v6456_v11, %v7179_v33  ;;  %v472_v15 = vpop.f32.mrb[9].mxu0 }
  0xf9   : > { %6810 = vrcp.f32 %v688_v7  ;;  %v7266_v29 = vadd.f32 %v7179_v33, %v472_v15  ;;  %v7319_v7 = vadd.s32 184, %v7195_v45  ;;  %12099 = vst [vmem:[#allocation14_spill] sm:$0xff] %v7322_v1  ;;  %v12124_v1 = vmov 0 }
  0xfa   : > { %v6801_v19 = vpop.eup %6800  ;;  %6812 = vrcp.f32 %v687_v12  ;;  %v6080_v20 = vmul.f32 -1.442695, %v7243_v14 }
  0xfb   : > { %v6803_v23 = vpop.eup %6802  ;;  %v690_v24 = vadd.f32 1.0, %v6801_v19  ;;  %6814 = vpow2.f32 %v6077_v9  ;;  %v6459_v25 = vpop.f32.mrb[10].mxu0  ;;  %v6079_v56 = vmul.f32 -1.442695, %v7266_v29  ;;  %v7296_v9 = vadd.s32 136, %v7195_v45  ;;  %12098 = vst [vmem:[#allocation13_spill] sm:$0xff] %v7319_v7 }
  0xfc   : > { %v689_v28 = vadd.f32 1.0, %v6803_v23  ;;  %6816 = vpow2.f32 %v6080_v20  ;;  %v482_v30 = vpop.f32.mrb[11].mxu0  ;;  %v7277_v39 = vadd.f32 %v6459_v25, %v7179_v33  ;;  %v7301_v19 = vadd.s32 144, %v7195_v45 }
  0xfd   : > { %6818 = vrcp.f32 %v690_v24  ;;  %v7284_v47 = vadd.f32 %v7179_v33, %v482_v30  ;;  %12092 = vst [vmem:[#allocation7_spill] sm:$0xff] %v7296_v9  ;;  %v7304_v20 = vadd.s32 152, %v7195_v45  ;;  %v7312_v30 = vadd.s32 168, %v7195_v45 }
  0xfe   : > { %v6805_v38 = vpop.eup %6804  ;;  %6820 = vrcp.f32 %v689_v28  ;;  %v6082_v12 = vmul.f32 -1.442695, %v7277_v39  ;;  %12093 = vst [vmem:[#allocation8_spill] sm:$0xff] %v7301_v19  ;;  %v7309_v28 = vadd.s32 160, %v7195_v45  ;;  %v12120_v7 = vmov 0 }
  0xff   : > { %v6807_v43 = vpop.eup %6806  ;;  %v692_v46 = vadd.f32 1.0, %v6805_v38  ;;  %v6462_v48 = vpop.f32.mrb[12].mxu0  ;;  %12094 = vst [vmem:[#allocation9_spill] sm:$0xff] %v7304_v20  ;;  %v6081_v24 = vmul.f32 -1.442695, %v7284_v47  ;;  %12096 = vst [vmem:[#allocation11_spill] sm:$0xff] %v7312_v30 }
 0x100   : > { %v7290_v58 = vadd.f32 %v6462_v48, %v7179_v33  ;;  %v492_v61 = vpop.f32.mrb[13].mxu0  ;;  %v691_v6 = vadd.f32 1.0, %v6807_v43  ;;  %12095 = vst [vmem:[#allocation10_spill] sm:$0xff] %v7309_v28  ;;  %v7315_v38 = vadd.s32 176, %v7195_v45  ;;  %v12121_v7 = vsel %vm7408_vm9, 4294967295, %v12120_v7 }
 0x101   : > { %6822 = vrcp.f32 %v692_v46  ;;  %v7325_v50 = vadd.f32 %v7179_v33, %v492_v61  ;;  %12122 = vst [vmem:[#allocation28_spill] sm:$0xff] %v12121_v7 }
 0x102   : > { %v6809_v11 = vpop.eup %6808  ;;  %12097 = vst [vmem:[#allocation12_spill] sm:$0xff] %v7315_v38  ;;  %6824 = vpow2.f32 %v6079_v56  ;;  %v6084_v46 = vmul.f32 -1.442695, %v7290_v58 }
 0x103   : > { %v6811_v23 = vpop.eup %6810  ;;  %v6465_v25 = vpop.f32.mrb[14].mxu0  ;;  %6826 = vrcp.f32 %v691_v6  ;;  %v694_v5 = vadd.f32 1.0, %v6809_v11  ;;  %12100 = vst [vmem:[#allocation15_spill] sm:$0xff] %v7325_v50  ;;  %v6083_v17 = vmul.f32 -1.442695, %v7325_v50 }
 0x104   : > { %v6813_v43 = vpop.eup %6812  ;;  %v502_v48 = vpop.f32.mrb[15].mxu0  ;;  %v7329_v56 = vmul.f32 %v6811_v23, %v7182_v35  ;;  %6828 = vpow2.f32 %v6082_v12  ;;  %v12106_v12 = vmov 0  ;;  %v7362_v32 = vadd.f32 %v6465_v25, %v7179_v33 }
 0x105   : > { %v6815_v15 = vpop.eup %6814  ;;  %v7332_v40 = vmul.f32 %v6813_v43, %v7185_v37  ;;  %6830 = vpow2.f32 %v6081_v24  ;;  %v12103_v43 = vmov 0  ;;  %v12107_v12 = vsel %vm7351_vm7, 4294967295, %v12106_v12 }
 0x106   : > { %v6817_v54 = vpop.eup %6816  ;;  %12101 = vst [vmem:[#allocation16_spill] sm:$0xff] %v7329_v56  ;;  %v12104_v43 = vsel %vm7345_vm6, 4294967295, %v12103_v43  ;;  %12108 = vst [vmem:[#allocation19_spill] sm:$0xff] %v12107_v12  ;;  %6832 = vpow2.f32 %v6084_v46  ;;  %v693_v6 = vadd.f32 1.0, %v6815_v15  ;;  %v1489_v53 = vrot.slane %v7329_v56, 6 }
 0x107   : > { %12102 = vst [vmem:[#allocation17_spill] sm:$0xff] %v7332_v40  ;;  %v6819_v61 = vpop.eup %6818  ;;  %v7338_v11 = vpop.f32.mrb[16].mxu0  ;;  %12105 = vst [vmem:[#allocation18_spill] sm:$0xff] %v12104_v43  ;;  %6834 = vrcp.f32 %v694_v5  ;;  %v11704_v3 = vrot.slane %v7332_v40, 6  ;;  %v7370_v34 = vadd.f32 %v7179_v33, %v502_v48  ;;  %v1650_v35 = vrot.slane %v7329_v56, 7 }
 0x108   : > { %v6821_v23 = vpop.eup %6820  ;;  %v7355_v24 = vpop.f32.mrb[17].mxu0  ;;  %12109 = vst [vmem:[#allocation20_spill] sm:$0xff] %v7362_v32  ;;  %v7367_v46 = vmul.f32 %v6819_v61, %v7190_v42  ;;  %v696_v15 = vadd.f32 1.0, %v6817_v54  ;;  %v7379_v25 = vadd.s32 200, %v7195_v45  ;;  %v1843_v13 = vrot.slane %v7329_v56, 1 }
 0x109   : > { %12111 = vst [vmem:[#allocation22_spill] sm:$0xff] %v7370_v34  ;;  %v7374_v5 = vmul.f32 %v6821_v23, %v7193_v44  ;;  %v12114_v44 = vmov 0  ;;  %6836 = vrcp.f32 %v693_v6  ;;  %v7400_v48 = vsel %vm11750_vm2, %v11704_v3, %v1489_v53 }
 0x10a   : > { %12110 = vst [vmem:[#allocation21_spill] sm:$0xff] %v7367_v46  ;;  %12113 = vst [vmem:[#allocation24_spill] sm:$0xff] %v7379_v25  ;;  %v12115_v44 = vsel %vm7390_vm8, 4294967295, %v12114_v44  ;;  %v1491_v8 = vrot.slane %v7367_v46, 6  ;;  %v12123_v6 = vmov %v12119_v2  ;;  %6838 = vpow2.f32 %v6083_v17 }
 0x10b   : > { %v6823_v37 = vpop.eup %6822  ;;  %12112 = vst [vmem:[#allocation23_spill] sm:$0xff] %v7374_v5  ;;  %v7376_v10 = vpop.f32.mrb[18].mxu0  ;;  %12116 = vst [vmem:[#allocation25_spill] sm:$0xff] %v12115_v44  ;;  %v1490_v54 = vrot.slane %v7374_v5, 6  ;;  %v1651_v23 = vrot.slane %v7374_v5, 7  ;;  %vm7414_vm10 = vcmp.ge.s32.totalorder %v12123_v6, 1  ;;  %6840 = vrcp.f32 %v696_v15 }
 0x10c   : > { %v7385_v4 = vpop.f32.mrb[19].mxu0  ;;  %v6825_v42 = vpop.eup %6824  ;;  %12117 = vst [vmem:[#allocation26_spill] sm:$0xff] %v7400_v48  ;;  %v7404_v61 = vmul.f32 %v6823_v37, %v7200_v49  ;;  %v12125_v1 = vsel %vm7414_vm10, 4294967295, %v12124_v1  ;;  %v1652_v48 = vrot.slane %v7367_v46, 7  ;;  %v12127_v37 = vand.u32 15, %v7206_v52 }
 0x10d   : > { %12126 = vst [vmem:[#allocation29_spill] sm:$0xff] %v12125_v1  ;;  %v6827_v3 = vpop.eup %6826  ;;  %v12128_v2 = vmov 0  ;;  %v1550_v17 = vsel %vm11750_vm2, %v1489_v53, %v1490_v54  ;;  %v1711_v38 = vsel %vm11747_vm3, %v1650_v35, %v1651_v23  ;;  %v1844_v30 = vrot.slane %v7374_v5, 1 }
 0x10e   : > { %12118 = vst [vmem:[#allocation27_spill] sm:$0xff] %v7404_v61  ;;  %vm7423_vm11 = vcmp.lt.s32.totalorder %v12127_v37, 14  ;;  %v6829_v6 = vpop.eup %6828  ;;  %v2005_v49 = vrot.slane %v7374_v5, 2  ;;  %v12132_v37 = vrot.slane %v7332_v40, 7  ;;  %v12134_v28 = vrot.slane %v7332_v40, 1 }
 0x10f   : > { %v12129_v2 = vsel %vm7423_vm11, 4294967295, %v12128_v2  ;;  %v7427_v57 = vpop.f32.mrb[20].mxu0  ;;  %v6831_v52 = vpop.eup %6830  ;;  %v12136_v9 = vrot.slane %v7329_v56, 2  ;;  %v12137_v36 = vrot.slane %v7332_v40, 2  ;;  %v695_v27 = vadd.f32 1.0, %v6825_v42 }
 0x110   : > { %12130 = vst [vmem:[#allocation30_spill] sm:$0xff] %v12129_v2  ;;  %v7435_v20 = vpop.f32.mrb[21].mxu0  ;;  %v7441_v15 = vsel %vm11747_vm3, %v12132_v37, %v1650_v35  ;;  %v7447_v53 = vsel %vm11752_vm4, %v12134_v28, %v1843_v13  ;;  %v6833_v41 = vpop.eup %6832  ;;  %v7460_v37 = vmul.f32 %v6827_v3, %v7203_v51  ;;  %v7463_v28 = vmul.f32 -1.442695, %v7362_v32 }
 0x111   : > { %12131 = vst [vmem:[#allocation31_spill] sm:$0xff] %v7435_v20  ;;  %12133 = vst [vmem:[#allocation32_spill] sm:$0xff] %v7441_v15  ;;  %v7455_v19 = vsel %vm11751_vm5, %v12137_v36, %v12136_v9  ;;  %v6835_v15 = vpop.eup %6834  ;;  %v7467_v40 = vsel %vm11750_vm2, %v1490_v54, %v1491_v8  ;;  %v1619_v36 = vsel %vm7345_vm6, %v1550_v17, -1e+30  ;;  %v7473_v9 = vsel %vm11747_vm3, %v1651_v23, %v1652_v48 }
 0x112   : > { %12135 = vst [vmem:[#allocation33_spill] sm:$0xff] %v7447_v53  ;;  %12138 = vst [vmem:[#allocation34_spill] sm:$0xff] %v7455_v19  ;;  %v1780_v42 = vsel %vm7351_vm7, %v1711_v38, -1e+30  ;;  %v12143_v3 = vrot.slane %v7367_v46, 1  ;;  %v12144_v54 = vrot.slane %v7367_v46, 2  ;;  %v7493_v38 = vsel %vm11752_vm4, %v1843_v13, %v1844_v30 }
 0x113   : > { %12139 = vst [vmem:[#allocation35_spill] sm:$0xff] %v7460_v37  ;;  %12140 = vst [vmem:[#allocation36_spill] sm:$0xff] %v7467_v40  ;;  %v7477_v51 = vpop.f32.mrb[22].mxu0  ;;  %v1492_v17 = vrot.slane %v7460_v37, 6  ;;  %v1653_v23 = vrot.slane %v7460_v37, 7  ;;  %v12147_v12 = vand.u32 15, %v7213_v55  ;;  %6842 = vrcp.f32 %v695_v27  ;;  %v6837_v27 = vpop.eup %6836 }
 0x114   : > { %12141 = vst [vmem:[#allocation37_spill] sm:$0xff] %v7473_v9  ;;  %12142 = vst [vmem:[#allocation38_spill] sm:$0xff] %v7477_v51  ;;  %v1903_v35 = vsel %vm11752_vm4, %v1844_v30, %v12143_v3  ;;  %v2064_v25 = vsel %vm11751_vm5, %v2005_v49, %v12144_v54  ;;  %v7489_v43 = vpop.f32.mrb[23].mxu0  ;;  %v12148_v53 = vmov 0  ;;  %v12152_v54 = vmov 0 }
 0x115   : > { %12145 = vst [vmem:[#allocation39_spill] sm:$0xff] %v7489_v43  ;;  %12146 = vst [vmem:[#allocation40_spill] sm:$0xff] %v7493_v38  ;;  %vm7497_vm12 = vcmp.lt.s32.totalorder %v12147_v12, 15  ;;  %v12151_v3 = vmov %v12147_v12  ;;  %v1846_v19 = vrot.slane %v7460_v37, 1  ;;  %v2007_v32 = vrot.slane %v7460_v37, 2 }
 0x116   : > { %v12149_v53 = vsel %vm7497_vm12, 4294967295, %v12148_v53  ;;  %vm7503_vm13 = vcmp.lt.s32.totalorder %v12151_v3, 14  ;;  %v1812_v31 = vmax.f32 %v1619_v36, %v1780_v42  ;;  %v1493_v13 = vrot.slane %v7404_v61, 6 }
 0x117   : > { %12150 = vst [vmem:[#allocation41_spill] sm:$0xff] %v12149_v53  ;;  %v12153_v54 = vsel %vm7503_vm13, 4294967295, %v12152_v54  ;;  %v1654_v30 = vrot.slane %v7404_v61, 7  ;;  %v1548_v12 = vsel %vm11750_vm2, %v1491_v8, %v1492_v17  ;;  %v12155_v43 = vand.u32 15, %v7226_v62  ;;  %v7536_v22 = vpop.f32.mrb[24].mxu0  ;;  %v6839_v62 = vpop.eup %6838 }
 0x118   : > { %12154 = vst [vmem:[#allocation42_spill] sm:$0xff] %v12153_v54  ;;  %v12156_v55 = vmov 0  ;;  %v12160_v51 = vmov 0  ;;  %v12163_v36 = vrot.slane %v7329_v56, 2  ;;  %v2166_v8 = vmax.f32 %v1903_v35, %v2064_v25  ;;  %v7546_v25 = vpop.f32.mrb[25].mxu0 }
 0x119   : > { %vm7515_vm14 = vcmp.ge.s32.totalorder %v12155_v43, 2  ;;  %v12159_v3 = vmov %v12155_v43  ;;  %v1709_v43 = vsel %vm11747_vm3, %v1652_v48, %v1653_v23  ;;  %v7534_v20 = vmul.f32 %v6835_v15, %v7223_v60  ;;  %v6841_v48 = vpop.eup %6840 }
 0x11a   : > { %v12157_v55 = vsel %vm7515_vm14, 4294967295, %v12156_v55  ;;  %vm7521_vm15 = vcmp.ge.s32.totalorder %v12159_v3, 1  ;;  %v7529_v42 = vsel %vm11751_vm5, %v12163_v36, %v2005_v49  ;;  %v698_v50 = vadd.f32 1.0, %v6829_v6 }
 0x11b   : > { %12158 = vst [vmem:[#allocation43_spill] sm:$0xff] %v12157_v55  ;;  %v12161_v51 = vsel %vm7521_vm15, 4294967295, %v12160_v51  ;;  %12164 = vst [vmem:[#allocation45_spill] sm:$0xff] %v7529_v42  ;;  %v7544_v49 = vmul.f32 -1.442695, %v7370_v34  ;;  %v12166_v35 = vrot.slane %v7404_v61, 1  ;;  %v7564_v7 = vmul.f32 %v6837_v27, %v7229_v63 }
 0x11c   : > { %12162 = vst [vmem:[#allocation44_spill] sm:$0xff] %v12161_v51  ;;  %12165 = vst [vmem:[#allocation46_spill] sm:$0xff] %v7534_v20  ;;  %v1621_v60 = vsel %vm7408_vm9, %v1548_v12, -1e+30  ;;  %v1782_v15 = vsel %vm7414_vm10, %v1709_v43, -1e+30  ;;  %v2198_v43 = vmax.f32 %v1812_v31, %v2166_v8  ;;  %v7568_v9 = vsel %vm11750_vm2, %v1492_v17, %v1493_v13 }
 0x11d   : > { %v1901_v36 = vsel %vm11752_vm4, %v1846_v19, %v12166_v35  ;;  %v12167_v3 = vrot.slane %v7404_v61, 2  ;;  %12168 = vst [vmem:[#allocation47_spill] sm:$0xff] %v7564_v7  ;;  %v697_v12 = vadd.f32 1.0, %v6831_v52  ;;  %v700_v1 = vadd.f32 1.0, %v6833_v41  ;;  %12169 = vst [vmem:[#allocation48_spill] sm:$0xff] %v7568_v9  ;;  %v7581_v63 = vpop.f32.mrb[26].mxu0 }
 0x11e   : > { %v7572_v35 = vsel %vm11747_vm3, %v1653_v23, %v1654_v30  ;;  %v12171_v40 = vand.u32 15, %v7220_v59  ;;  %v12172_v56 = vmov 0  ;;  %v1814_v41 = vmax.f32 %v1621_v60, %v1782_v15  ;;  %v7591_v8 = vpop.f32.mrb[27].mxu0 }
 0x11f   : > { %v2062_v6 = vsel %vm11751_vm5, %v2007_v32, %v12167_v3  ;;  %12170 = vst [vmem:[#allocation49_spill] sm:$0xff] %v7572_v35  ;;  %v1495_v3 = vrot.slane %v7534_v20, 6  ;;  %v12176_v17 = vmov 0  ;;  %v1494_v23 = vrot.slane %v7564_v7, 6  ;;  %v7630_v42 = vpop.f32.mrb[28].mxu0 }
 0x120   : > { %vm7577_vm0 = vcmp.lt.s32.totalorder %v12171_v40, 15  ;;  %v2168_v31 = vmax.f32 %v1901_v36, %v2062_v6  ;;  %v12175_v52 = vmov %v12171_v40  ;;  %v1655_v27 = vrot.slane %v7564_v7, 7  ;;  %v7636_v34 = vpop.f32.mrb[29].mxu0 }
 0x121   : > { %v12173_v56 = vsel %vm7577_vm0, 4294967295, %v12172_v56  ;;  %vm7585_vm1 = vcmp.lt.s32.totalorder %v12175_v52, 14  ;;  %v12179_v40 = vrot.slane %v7367_v46, 1  ;;  %v12180_v60 = vrot.slane %v7367_v46, 2 }
 0x122   : > { %12174 = vst [vmem:[#allocation50_spill] sm:$0xff] %v12173_v56  ;;  %v12177_v17 = vsel %vm7585_vm1, 4294967295, %v12176_v17  ;;  %v1656_v15 = vrot.slane %v7534_v20, 7  ;;  %v7603_v36 = vmul.f32 %v6841_v48, %v7243_v14  ;;  %v12182_v6 = vand.u32 15, %v7246_v16 }
 0x123   : > { %12178 = vst [vmem:[#allocation51_spill] sm:$0xff] %v12177_v17  ;;  %v1902_v38 = vsel %vm11752_vm4, %v12179_v40, %v1846_v19  ;;  %v2063_v59 = vsel %vm11751_vm5, %v12180_v60, %v2007_v32  ;;  %v12183_v52 = vmov 0  ;;  %v12187_v19 = vmov 0  ;;  %v6843_v60 = vpop.eup %6842 }
 0x124   : > { %12181 = vst [vmem:[#allocation52_spill] sm:$0xff] %v7603_v36  ;;  %vm7607_vm3 = vcmp.ge.s32.totalorder %v12182_v6, 2  ;;  %v12186_v44 = vmov %v12182_v6  ;;  %v1849_v40 = vrot.slane %v7534_v20, 1  ;;  %vm12190_vm5 = vcmp.lt.s32.totalorder %v7195_v45, 2 }
 0x125   : > { %v12184_v52 = vsel %vm7607_vm3, 4294967295, %v12183_v52  ;;  %vm7613_vm2 = vcmp.ge.s32.totalorder %v12186_v44, 1  ;;  %v1546_v32 = vsel %vm12190_vm5, %v1493_v13, %v1494_v23  ;;  %vm12191_vm4 = vcmp.lt.s32.totalorder %v7195_v45, 1 }
 0x126   : > { %12185 = vst [vmem:[#allocation53_spill] sm:$0xff] %v12184_v52  ;;  %v12188_v19 = vsel %vm7613_vm2, 4294967295, %v12187_v19  ;;  %v1707_v14 = vsel %vm12191_vm4, %v1654_v30, %v1655_v27  ;;  %v1848_v48 = vrot.slane %v7564_v7, 1  ;;  %v7624_v6 = vmax.f32 %v7374_v5, %v2198_v43 }
 0x127   : > { %12189 = vst [vmem:[#allocation54_spill] sm:$0xff] %v12188_v19  ;;  %v2010_v44 = vrot.slane %v7534_v20, 2  ;;  %v2009_v46 = vrot.slane %v7564_v7, 2  ;;  %v1974_v13 = vsel %vm7497_vm12, %v1902_v38, -1e+30  ;;  %v2200_v2 = vmax.f32 %v1814_v41, %v2168_v31 }
 0x128   : > { %v2135_v30 = vsel %vm7503_vm13, %v2063_v59, -1e+30  ;;  %6844 = vrcp.f32 %v698_v50  ;;  %v1623_v43 = vsel %vm7515_vm14, %v1546_v32, -1e+30  ;;  %v1784_v16 = vsel %vm7521_vm15, %v1707_v14, -1e+30 }
 0x129   : > { %v699_v20 = vadd.f32 1.0, %v6839_v62  ;;  %vm12192_vm4 = vcmp.lt.s32.totalorder %v7195_v45, 7  ;;  %v12193_v38 = vrot.slane %v7404_v61, 1  ;;  %v7650_v50 = vmul.f32 %v6843_v60, %v7266_v29 }
 0x12a   : > { %v1899_v53 = vsel %vm12192_vm4, %v1848_v48, %v1849_v40  ;;  %vm12194_vm5 = vmmov %vm12192_vm4  ;;  %v12196_v31 = vand.u32 15, %v7232_v0  ;;  %v12197_v59 = vmov 0  ;;  %6846 = vrcp.f32 %v697_v12 }
 0x12b   : > { %v1900_v41 = vsel %vm12194_vm5, %v12193_v38, %v1848_v48  ;;  %12195 = vst [vmem:[#allocation55_spill] sm:$0xff] %v7650_v50  ;;  %vm12200_vm15 = vcmp.lt.s32.totalorder %v7195_v45, 6  ;;  %v12201_v32 = vrot.slane %v7404_v61, 2  ;;  %v12204_v60 = vmov 0  ;;  %v7671_v38 = vpop.f32.mrb[30].mxu0 }
 0x12c   : > { %vm7654_vm14 = vcmp.lt.s32.totalorder %v12196_v31, 15  ;;  %v2060_v62 = vsel %vm12200_vm15, %v2009_v46, %v2010_v44  ;;  %vm12202_vm4 = vmmov %vm12200_vm15  ;;  %v12203_v29 = vmov %v12196_v31  ;;  %6848 = vrcp.f32 %v700_v1 }
 0x12d   : > { %v12198_v59 = vsel %vm7654_vm14, 4294967295, %v12197_v59  ;;  %v2061_v14 = vsel %vm12202_vm4, %v12201_v32, %v2009_v46  ;;  %vm7667_vm5 = vcmp.lt.s32.totalorder %v12203_v29, 14  ;;  %v1496_v12 = vrot.slane %v7650_v50, 6  ;;  %v7677_v46 = vpop.f32.mrb[31].mxu0 }
 0x12e   : > { %12199 = vst [vmem:[#allocation56_spill] sm:$0xff] %v12198_v59  ;;  %v12205_v60 = vsel %vm7667_vm5, 4294967295, %v12204_v60  ;;  %v1657_v31 = vrot.slane %v7650_v50, 7  ;;  %v1850_v5 = vrot.slane %v7650_v50, 1  ;;  %v2011_v51 = vrot.slane %v7650_v50, 2 }
 0x12f   : > { %12206 = vst [vmem:[#allocation57_spill] sm:$0xff] %v12205_v60  ;;  %vm12207_vm15 = vcmp.lt.s32.totalorder %v7195_v45, 2  ;;  %vm12209_vm4 = vcmp.lt.s32.totalorder %v7195_v45, 1  ;;  %v1497_v1 = vrot.slane %v7603_v36, 6  ;;  %v7690_v29 = vadd.f32 %v7338_v11, %v7179_v33  ;;  %v12261_v60 = vld [vmem:[#allocation31_spill] sm:$0xff] }
 0x130   : > { %v7681_v0 = vsel %vm12207_vm15, %v1494_v23, %v1495_v3  ;;  %v7685_v32 = vsel %vm12209_vm4, %v1655_v27, %v1656_v15  ;;  %v1816_v48 = vmax.f32 %v1623_v43, %v1784_v16  ;;  %v1976_v55 = vsel %vm7577_vm0, %v1900_v41, -1e+30  ;;  %vm12211_vm13 = vmmov %vm12207_vm15 }
 0x131   : > { %12208 = vst [vmem:[#allocation58_spill] sm:$0xff] %v7681_v0  ;;  %12210 = vst [vmem:[#allocation59_spill] sm:$0xff] %v7685_v32  ;;  %v1544_v54 = vsel %vm12211_vm13, %v1495_v3, %v1496_v12  ;;  %v2137_v27 = vsel %vm7585_vm1, %v2061_v14, -1e+30  ;;  %v2170_v61 = vmax.f32 %v1899_v53, %v2060_v62  ;;  %6850 = vrcp.f32 %v699_v20 }
 0x132   : > { %vm12212_vm15 = vmmov %vm12209_vm4  ;;  %v7702_v35 = vadd.f32 %v7179_v33, %v7355_v24  ;;  %v1625_v11 = vsel %vm7607_vm3, %v1544_v54, -1e+30  ;;  %v12213_v3 = vrot.slane %v7603_v36, 1  ;;  %vm12214_vm13 = vcmp.lt.s32.totalorder %v7195_v45, 7  ;;  %v6845_v62 = vpop.eup %6844 }
 0x133   : > { %v1705_v23 = vsel %vm12212_vm15, %v1656_v15, %v1657_v31  ;;  %v12215_v43 = vrot.slane %v7603_v36, 2  ;;  %vm12216_vm4 = vcmp.lt.s32.totalorder %v7195_v45, 6  ;;  %v7716_v53 = vmax.f32 %v1974_v13, %v2135_v30  ;;  %vm12217_vm15 = vmmov %vm12214_vm13 }
 0x134   : > { %v1786_v16 = vsel %vm7613_vm2, %v1705_v23, -1e+30  ;;  %v1897_v15 = vsel %vm12214_vm13, %v1850_v5, %v12213_v3  ;;  %v7719_v24 = vmax.f32 %v7460_v37, %v2200_v2  ;;  %v1658_v41 = vrot.slane %v7603_v36, 7  ;;  %v12254_v37 = vld [vmem:[#allocation15_spill] sm:$0xff] }
 0x135   : > { %v2058_v20 = vsel %vm12216_vm4, %v2011_v51, %v12215_v43  ;;  %v7724_v14 = vmax.f32 %v1976_v55, %v2137_v27  ;;  %v1898_v23 = vsel %vm12217_vm15, %v1849_v40, %v1850_v5  ;;  %v12218_v3 = vand.u32 15, %v7254_v21  ;;  %v6847_v40 = vpop.eup %6846 }
 0x136   : > { %v12219_v43 = vmov 0  ;;  %6852 = vpow2.f32 %v7463_v28  ;;  %v6088_v2 = vmul.f32 -1.442695, %v7690_v29  ;;  %v1818_v13 = vmax.f32 %v1625_v11, %v1786_v16 }
 0x137   : > { %vm7730_vm13 = vcmp.ge.s32.totalorder %v12218_v3, 2  ;;  %v2059_v30 = vsel %vm12216_vm4, %v2010_v44, %v2011_v51  ;;  %v2172_v54 = vmax.f32 %v1897_v15, %v2058_v20  ;;  %v12222_v55 = vmov %v12218_v3  ;;  %v6849_v44 = vpop.eup %6848 }
 0x138   : > { %v12220_v43 = vsel %vm7730_vm13, 4294967295, %v12219_v43  ;;  %vm7740_vm2 = vcmp.ge.s32.totalorder %v12222_v55, 1  ;;  %v12223_v27 = vmov 0  ;;  %v6087_v5 = vmul.f32 -1.442695, %v7702_v35 }
 0x139   : > { %12221 = vst [vmem:[#allocation60_spill] sm:$0xff] %v12220_v43  ;;  %v12224_v27 = vsel %vm7740_vm2, 4294967295, %v12223_v27  ;;  %v2202_v3 = vmax.f32 %v1816_v48, %v2170_v61  ;;  %vm12226_vm15 = vcmp.lt.s32.totalorder %v7195_v45, 2  ;;  %6854 = vpow2.f32 %v7544_v49 }
 0x13a   : > { %12225 = vst [vmem:[#allocation61_spill] sm:$0xff] %v12224_v27  ;;  %v7747_v28 = vsel %vm12226_vm15, %v1496_v12, %v1497_v1  ;;  %v7752_v51 = vadd.f32 %v7376_v10, %v7179_v33  ;;  %vm12228_vm4 = vcmp.lt.s32.totalorder %v7195_v45, 1  ;;  %v1978_v11 = vsel %vm7654_vm14, %v1898_v23, -1e+30 }
 0x13b   : > { %12227 = vst [vmem:[#allocation62_spill] sm:$0xff] %v7747_v28  ;;  %v7756_v21 = vsel %vm12228_vm4, %v1657_v31, %v1658_v41  ;;  %v7761_v61 = vmul.f32 %v6845_v62, %v7277_v39  ;;  %v7764_v48 = vmul.f32 %v6847_v40, %v7284_v47  ;;  %v2139_v49 = vsel %vm7667_vm5, %v2059_v30, -1e+30 }
 0x13c   : > { %12229 = vst [vmem:[#allocation63_spill] sm:$0xff] %v7756_v21  ;;  %v12232_v10 = vand.u32 15, %v7260_v26  ;;  %v12233_v12 = vmov 0  ;;  %6856 = vpow2.f32 %v6088_v2  ;;  %v7776_v31 = vadd.f32 %v7179_v33, %v7385_v4  ;;  %v6851_v2 = vpop.eup %6850 }
 0x13d   : > { %12230 = vst [vmem:[#allocation64_spill] sm:$0xff] %v7761_v61  ;;  %12231 = vst [vmem:[#allocation65_spill] sm:$0xff] %v7764_v48  ;;  %v7780_v39 = vadd.f32 %v7427_v57, %v7179_v33  ;;  %v2204_v47 = vmax.f32 %v1818_v13, %v2172_v54  ;;  %v1498_v16 = vrot.slane %v7764_v48, 6  ;;  %v1659_v15 = vrot.slane %v7764_v48, 7 }
 0x13e   : > { %vm7770_vm15 = vcmp.ge.s32.totalorder %v12232_v10, 2  ;;  %v12236_v20 = vmov %v12232_v10  ;;  %v12237_v62 = vmov 0  ;;  %6858 = vpow2.f32 %v6087_v5 }
 0x13f   : > { %v12234_v12 = vsel %vm7770_vm15, 4294967295, %v12233_v12  ;;  %vm7786_vm4 = vcmp.ge.s32.totalorder %v12236_v20, 1  ;;  %v7791_v23 = vmax.f32 %v7564_v7, %v2202_v3  ;;  %v7796_v57 = vmul.f32 %v6849_v44, %v7290_v58 }
 0x140   : > { %12235 = vst [vmem:[#allocation66_spill] sm:$0xff] %v12234_v12  ;;  %v12238_v62 = vsel %vm7786_vm4, 4294967295, %v12237_v62  ;;  %v6090_v54 = vmul.f32 -1.442695, %v7752_v51  ;;  %v7799_v13 = vmax.f32 %v1978_v11, %v2139_v49  ;;  %v1499_v26 = vrot.slane %v7761_v61, 6 }
 0x141   : > { %12239 = vst [vmem:[#allocation67_spill] sm:$0xff] %v12238_v62  ;;  %12240 = vst [vmem:[#allocation68_spill] sm:$0xff] %v7791_v23  ;;  %v1660_v30 = vrot.slane %v7761_v61, 7  ;;  %v1853_v55 = vrot.slane %v7761_v61, 1  ;;  %v2014_v5 = vrot.slane %v7761_v61, 2  ;;  %vm12243_vm3 = vcmp.lt.s32.totalorder %v7195_v45, 2 }
 0x142   : > { %12241 = vst [vmem:[#allocation69_spill] sm:$0xff] %v7796_v57  ;;  %12242 = vst [vmem:[#allocation70_spill] sm:$0xff] %v7799_v13  ;;  %v1542_v40 = vsel %vm12243_vm3, %v1497_v1, %v1498_v16  ;;  %v6089_v3 = vmul.f32 -1.442695, %v7776_v31  ;;  %v7809_v58 = vmul.f32 -1.442695, %v7780_v39  ;;  %v7812_v44 = vmax.f32 %v7650_v50, %v2204_v47  ;;  %v6853_v50 = vpop.eup %6852 }
 0x143   : > { %v12245_v11 = vand.u32 15, %v7250_v18  ;;  %v12246_v49 = vmov 0  ;;  %v12250_v20 = vmov 0  ;;  %vm12253_vm3 = vcmp.lt.s32.totalorder %v7195_v45, 1  ;;  %v12256_v18 = vld [vmem:[#allocation2_spill] sm:$0xff]  ;;  %v12358_v13 = vld [vmem:[#allocation5_spill] sm:$0xff] }
 0x144   : > { %12244 = vst [vmem:[#allocation71_spill] sm:$0xff] %v7812_v44  ;;  %v1703_v1 = vsel %vm12253_vm3, %v1658_v41, %v1659_v15  ;;  %v1852_v4 = vrot.slane %v7764_v48, 1  ;;  %v2013_v47 = vrot.slane %v7764_v48, 2  ;;  %v7833_v19 = vmul.f32 %v6851_v2, %v12254_v37  ;;  %v12282_v62 = vld [vmem:[#allocation38_spill] sm:$0xff] }
 0x145   : > { %vm7816_vm5 = vcmp.lt.s32.totalorder %v12245_v11, 15  ;;  %v12249_v10 = vmov %v12245_v11  ;;  %v12258_v52 = vmov 0  ;;  %v7843_v41 = vadd.f32 %v7179_v33, %v12261_v60 }
 0x146   : > { %v12247_v49 = vsel %vm7816_vm5, 4294967295, %v12246_v49  ;;  %vm7822_vm14 = vcmp.lt.s32.totalorder %v12249_v10, 14  ;;  %12255 = vst [vmem:[#allocation15_spill] sm:$0xff] %v7833_v19  ;;  %v12257_v10 = vand.u32 15, %v12256_v18  ;;  %v1627_v59 = vsel %vm7730_vm13, %v1542_v40, -1e+30 }
 0x147   : > { %12248 = vst [vmem:[#allocation72_spill] sm:$0xff] %v12247_v49  ;;  %v12251_v20 = vsel %vm7822_vm14, 4294967295, %v12250_v20  ;;  %v12263_v37 = vmov 0  ;;  %v702_v2 = vadd.f32 1.0, %v6853_v50  ;;  %6860 = vpow2.f32 %v6090_v54 }
 0x148   : > { %12252 = vst [vmem:[#allocation73_spill] sm:$0xff] %v12251_v20  ;;  %vm7837_vm1 = vcmp.lt.s32.totalorder %v12257_v10, 15  ;;  %v12262_v11 = vmov %v12257_v10  ;;  %v6855_v10 = vpop.eup %6854  ;;  %v1788_v17 = vsel %vm7740_vm2, %v1703_v1, -1e+30  ;;  %v1500_v60 = vrot.slane %v7833_v19, 6 }
 0x149   : > { %v12259_v52 = vsel %vm7837_vm1, 4294967295, %v12258_v52  ;;  %vm7850_vm3 = vcmp.lt.s32.totalorder %v12262_v11, 14  ;;  %v1661_v56 = vrot.slane %v7833_v19, 7  ;;  %v1854_v40 = vrot.slane %v7833_v19, 1  ;;  %v6857_v50 = vpop.eup %6856 }
 0x14a   : > { %12260 = vst [vmem:[#allocation2_spill] sm:$0xff] %v12259_v52  ;;  %v12264_v37 = vsel %vm7850_vm3, 4294967295, %v12263_v37  ;;  %vm12266_vm13 = vcmp.lt.s32.totalorder %v7195_v45, 7  ;;  %vm12267_vm12 = vcmp.lt.s32.totalorder %v7195_v45, 6  ;;  %v2015_v18 = vrot.slane %v7833_v19, 2  ;;  %v6859_v61 = vpop.eup %6858 }
 0x14b   : > { %12265 = vst [vmem:[#allocation31_spill] sm:$0xff] %v12264_v37  ;;  %v1895_v7 = vsel %vm12266_vm13, %v1852_v4, %v1853_v55  ;;  %v2056_v11 = vsel %vm12267_vm12, %v2013_v47, %v2014_v5  ;;  %6862 = vrcp.f32 %v702_v2  ;;  %vm12268_vm0 = vcmp.lt.s32.totalorder %v7195_v45, 2 }
 0x14c   : > { %v7866_v54 = vsel %vm12268_vm0, %v1498_v16, %v1499_v26  ;;  %vm12270_vm2 = vmmov %vm12268_vm0  ;;  %v701_v43 = vadd.f32 1.0, %v6855_v10  ;;  %vm12271_vm13 = vcmp.lt.s32.totalorder %v7195_v45, 1  ;;  %v12274_v16 = vrot.slane %v7796_v57, 1 }
 0x14d   : > { %12269 = vst [vmem:[#allocation74_spill] sm:$0xff] %v7866_v54  ;;  %v1540_v27 = vsel %vm12270_vm2, %v1499_v26, %v1500_v60  ;;  %v7873_v21 = vsel %vm12271_vm13, %v1659_v15, %v1660_v30  ;;  %vm12273_vm12 = vmmov %vm12271_vm13  ;;  %vm12275_vm0 = vcmp.lt.s32.totalorder %v7195_v45, 7  ;;  %v1820_v44 = vmax.f32 %v1627_v59, %v1788_v17 }
 0x14e   : > { %12272 = vst [vmem:[#allocation75_spill] sm:$0xff] %v7873_v21  ;;  %v1629_v28 = vsel %vm7770_vm15, %v1540_v27, -1e+30  ;;  %v1701_v2 = vsel %vm12273_vm12, %v1660_v30, %v1661_v56  ;;  %v1893_v1 = vsel %vm12275_vm0, %v1854_v40, %v12274_v16  ;;  %v2174_v32 = vmax.f32 %v1895_v7, %v2056_v11  ;;  %vm12279_vm13 = vmmov %vm12275_vm0 }
 0x14f   : > { %v1790_v26 = vsel %vm7786_vm4, %v1701_v2, -1e+30  ;;  %v12276_v10 = vrot.slane %v7796_v57, 2  ;;  %vm12277_vm2 = vcmp.lt.s32.totalorder %v7195_v45, 6  ;;  %v12278_v27 = vrot.slane %v7603_v36, 1 }
 0x150   : > { %v12280_v12 = vrot.slane %v7603_v36, 2  ;;  %vm12281_vm12 = vmmov %vm12277_vm2  ;;  %v1822_v17 = vmax.f32 %v1629_v28, %v1790_v26  ;;  %v1894_v7 = vsel %vm12275_vm0, %v1853_v55, %v1854_v40  ;;  %6864 = vrcp.f32 %v701_v43 }
 0x151   : > { %v2054_v15 = vsel %vm12277_vm2, %v2015_v18, %v12276_v10  ;;  %v1896_v30 = vsel %vm12279_vm13, %v12278_v27, %v1852_v4  ;;  %v704_v11 = vadd.f32 1.0, %v6857_v50  ;;  %v703_v2 = vadd.f32 1.0, %v6859_v61  ;;  %v12283_v27 = vld [vmem:[#allocation39_spill] sm:$0xff]  ;;  %v6861_v55 = vpop.eup %6860  ;;  %v12290_v50 = vld [vmem:[#allocation4_spill] sm:$0xff] }
 0x152   : > { %v2057_v16 = vsel %vm12281_vm12, %v12280_v12, %v2013_v47  ;;  %v2176_v59 = vmax.f32 %v1893_v1, %v2054_v15  ;;  %v2055_v10 = vsel %vm12277_vm2, %v2014_v5, %v2015_v18  ;;  %6866 = vpow2.f32 %v6089_v3 }
 0x153   : > { %v7903_v4 = vadd.f32 %v12282_v62, %v7179_v33  ;;  %v7907_v36 = vadd.f32 %v7179_v33, %v12283_v27  ;;  %v1980_v43 = vsel %vm7816_vm5, %v1896_v30, -1e+30  ;;  %v2141_v61 = vsel %vm7822_vm14, %v2057_v16, -1e+30  ;;  %v12303_v27 = vld [vmem:[#allocation20_spill] sm:$0xff] }
 0x154   : > { %v2206_v12 = vmax.f32 %v1820_v44, %v2174_v32  ;;  %v12284_v5 = vrot.slane %v7796_v57, 6  ;;  %vm12285_vm13 = vcmp.lt.s32.totalorder %v7195_v45, 2  ;;  %v12287_v3 = vrot.slane %v7796_v57, 7 }
 0x155   : > { %vm12288_vm12 = vcmp.lt.s32.totalorder %v7195_v45, 1  ;;  %v1982_v40 = vsel %vm7837_vm1, %v1894_v7, -1e+30  ;;  %6868 = vrcp.f32 %v703_v2  ;;  %v2143_v32 = vsel %vm7850_vm3, %v2055_v10, -1e+30 }
 0x156   : > { %v7919_v62 = vsel %vm12285_vm13, %v1500_v60, %v12284_v5  ;;  %v7925_v47 = vsel %vm12288_vm12, %v1661_v56, %v12287_v3  ;;  %v2208_v44 = vmax.f32 %v1822_v17, %v2176_v59  ;;  %6870 = vrcp.f32 %v704_v11  ;;  %v6863_v60 = vpop.eup %6862 }
 0x157   : > { %12286 = vst [vmem:[#allocation38_spill] sm:$0xff] %v7919_v62  ;;  %12289 = vst [vmem:[#allocation39_spill] sm:$0xff] %v7925_v47  ;;  %v7933_v18 = vadd.f32 %v7536_v22, %v7179_v33  ;;  %v12291_v1 = vand.u32 15, %v12290_v50  ;;  %v12292_v26 = vmov 0  ;;  %v12296_v15 = vmov 0 }
 0x158   : > { %v6091_v30 = vmul.f32 -1.442695, %v7843_v41  ;;  %v7950_v16 = vadd.f32 %v7179_v33, %v7546_v25  ;;  %v7954_v22 = vadd.f32 %v7581_v63, %v7179_v33  ;;  %v7958_v17 = vadd.f32 %v7179_v33, %v7591_v8 }
 0x159   : > { %vm7937_vm0 = vcmp.ge.s32.totalorder %v12291_v1, 2  ;;  %v12295_v56 = vmov %v12291_v1  ;;  %v7960_v7 = vmax.f32 %v1980_v43, %v2141_v61  ;;  %v7963_v59 = vmax.f32 %v7764_v48, %v2206_v12  ;;  %v12311_v48 = vld [vmem:[#allocation6_spill] sm:$0xff] }
 0x15a   : > { %v12293_v26 = vsel %vm7937_vm0, 4294967295, %v12292_v26  ;;  %vm7943_vm2 = vcmp.ge.s32.totalorder %v12295_v56, 1  ;;  %12299 = vst [vmem:[#allocation77_spill] sm:$0xff] %v7958_v17  ;;  %v706_v11 = vadd.f32 1.0, %v6861_v55  ;;  %v6094_v2 = vmul.f32 -1.442695, %v7903_v4 }
 0x15b   : > { %12294 = vst [vmem:[#allocation4_spill] sm:$0xff] %v12293_v26  ;;  %v12297_v15 = vsel %vm7943_vm2, 4294967295, %v12296_v15  ;;  %12300 = vst [vmem:[#allocation78_spill] sm:$0xff] %v7960_v7  ;;  %v7968_v10 = vmax.f32 %v1982_v40, %v2143_v32  ;;  %v7971_v63 = vmul.f32 %v6863_v60, %v12303_v27  ;;  %v7974_v5 = vadd.s32 208, %v7195_v45  ;;  %v6865_v40 = vpop.eup %6864  ;;  %v12309_v56 = vld [vmem:[#allocation22_spill] sm:$0xff] }
 0x15c   : > { %12298 = vst [vmem:[#allocation76_spill] sm:$0xff] %v12297_v15  ;;  %12301 = vst [vmem:[#allocation79_spill] sm:$0xff] %v7963_v59  ;;  %v7977_v8 = vmax.f32 %v7833_v19, %v2208_v44  ;;  %6872 = vpow2.f32 %v7809_v58  ;;  %v6093_v43 = vmul.f32 -1.442695, %v7907_v36  ;;  %v6096_v61 = vmul.f32 -1.442695, %v7933_v18  ;;  %v6867_v50 = vpop.eup %6866 }
 0x15d   : > { %12302 = vst [vmem:[#allocation80_spill] sm:$0xff] %v7968_v10  ;;  %12304 = vst [vmem:[#allocation20_spill] sm:$0xff] %v7971_v63  ;;  %6874 = vpow2.f32 %v6091_v30  ;;  %v6095_v12 = vmul.f32 -1.442695, %v7950_v16  ;;  %v6098_v55 = vmul.f32 -1.442695, %v7954_v22  ;;  %v7990_v44 = vadd.f32 %v7630_v42, %v7179_v33 }
 0x15e   : > { %12305 = vst [vmem:[#allocation81_spill] sm:$0xff] %v7977_v8  ;;  %v7985_v3 = vmul.f32 -1.442695, %v7958_v17  ;;  %6876 = vrcp.f32 %v706_v11  ;;  %v7994_v58 = vadd.f32 %v7179_v33, %v7636_v34  ;;  %v1503_v1 = vrot.slane %v7971_v63, 6 }
 0x15f   : > { %12307 = vst [vmem:[#allocation82_spill] sm:$0xff] %v7990_v44  ;;  %v7998_v30 = vmul.f32 %v6865_v40, %v12309_v56  ;;  %6878 = vpow2.f32 %v6094_v2  ;;  %v1664_v11 = vrot.slane %v7971_v63, 7  ;;  %v705_v28 = vadd.f32 1.0, %v6867_v50  ;;  %v6869_v42 = vpop.eup %6868  ;;  %v12320_v50 = vld [vmem:[#allocation3_spill] sm:$0xff] }
 0x160   : > { %12308 = vst [vmem:[#allocation83_spill] sm:$0xff] %v7994_v58  ;;  %6880 = vpow2.f32 %v6093_v43  ;;  %v12312_v37 = vand.u32 15, %v12311_v48  ;;  %v12313_v40 = vmov 0  ;;  %v12317_v56 = vmov 0  ;;  %v6871_v43 = vpop.eup %6870 }
 0x161   : > { %12310 = vst [vmem:[#allocation22_spill] sm:$0xff] %v7998_v30  ;;  %v1502_v34 = vrot.slane %v7998_v30, 6  ;;  %v1663_v19 = vrot.slane %v7998_v30, 7  ;;  %6882 = vpow2.f32 %v6096_v61  ;;  %v12321_v27 = vand.u32 15, %v12320_v50 }
 0x162   : > { %vm8008_vm13 = vcmp.ge.s32.totalorder %v12312_v37, 2  ;;  %v12316_v2 = vmov %v12312_v37  ;;  %v12322_v60 = vmov 0  ;;  %v12326_v37 = vmov 0 }
 0x163   : > { %v12314_v40 = vsel %vm8008_vm13, 4294967295, %v12313_v40  ;;  %vm8014_vm12 = vcmp.ge.s32.totalorder %v12316_v2, 1  ;;  %vm8020_vm4 = vcmp.lt.s32.totalorder %v12321_v27, 15  ;;  %v12325_v25 = vmov %v12321_v27 }
 0x164   : > { %12315 = vst [vmem:[#allocation6_spill] sm:$0xff] %v12314_v40  ;;  %v12318_v56 = vsel %vm8014_vm12, 4294967295, %v12317_v56  ;;  %v12323_v60 = vsel %vm8020_vm4, 4294967295, %v12322_v60  ;;  %vm8026_vm15 = vcmp.lt.s32.totalorder %v12325_v25, 14  ;;  %6884 = vrcp.f32 %v705_v28 }
 0x165   : > { %12319 = vst [vmem:[#allocation84_spill] sm:$0xff] %v12318_v56  ;;  %12324 = vst [vmem:[#allocation3_spill] sm:$0xff] %v12323_v60  ;;  %v12327_v37 = vsel %vm8026_vm15, 4294967295, %v12326_v37  ;;  %v8031_v48 = vmul.f32 -1.442695, %v7990_v44  ;;  %v8037_v61 = vadd.s32 216, %v7195_v45  ;;  %v8054_v44 = vmul.f32 %v6869_v42, %v7702_v35 }
 0x166   : > { %12328 = vst [vmem:[#allocation85_spill] sm:$0xff] %v12327_v37  ;;  %v8034_v2 = vmul.f32 -1.442695, %v7994_v58  ;;  %v12330_v27 = vrot.slane %v7796_v57, 6  ;;  %vm12331_vm3 = vcmp.lt.s32.totalorder %v7195_v45, 2  ;;  %v12332_v25 = vrot.slane %v7796_v57, 7 }
 0x167   : > { %12329 = vst [vmem:[#allocation86_spill] sm:$0xff] %v8037_v61  ;;  %vm12333_vm1 = vcmp.lt.s32.totalorder %v7195_v45, 1  ;;  %v1856_v28 = vrot.slane %v7998_v30, 1  ;;  %v2017_v20 = vrot.slane %v7998_v30, 2  ;;  %v8060_v17 = vmul.f32 %v6871_v43, %v7690_v29 }
 0x168   : > { %v1538_v52 = vsel %vm12331_vm3, %v12330_v27, %v1502_v34  ;;  %v1699_v50 = vsel %vm12333_vm1, %v12332_v25, %v1663_v19  ;;  %v8057_v27 = vadd.s32 224, %v7195_v45  ;;  %6886 = vpow2.f32 %v6095_v12  ;;  %vm12336_vm1 = vmmov %vm12331_vm3 }
 0x169   : > { %v1631_v49 = vsel %vm7937_vm0, %v1538_v52, -1e+30  ;;  %v1792_v58 = vsel %vm7943_vm2, %v1699_v50, -1e+30  ;;  %12335 = vst [vmem:[#allocation88_spill] sm:$0xff] %v8060_v17  ;;  %v8064_v25 = vadd.f32 %v7671_v38, %v7179_v33  ;;  %v8067_v26 = vadd.s32 248, %v7195_v45  ;;  %v6873_v52 = vpop.eup %6872 }
 0x16a   : > { %12334 = vst [vmem:[#allocation87_spill] sm:$0xff] %v8057_v27  ;;  %v8071_v50 = vsel %vm12336_vm1, %v1502_v34, %v1503_v1  ;;  %6888 = vpow2.f32 %v6098_v55  ;;  %v6875_v29 = vpop.eup %6874  ;;  %vm12338_vm3 = vcmp.lt.s32.totalorder %v7195_v45, 1  ;;  %v1824_v33 = vmax.f32 %v1631_v49, %v1792_v58 }
 0x16b   : > { %12337 = vst [vmem:[#allocation89_spill] sm:$0xff] %v8071_v50  ;;  %v8077_v12 = vsel %vm12338_vm3, %v1663_v19, %v1664_v11  ;;  %v12340_v38 = vrot.slane %v7971_v63, 1  ;;  %vm12341_vm2 = vcmp.lt.s32.totalorder %v7195_v45, 7  ;;  %v12342_v15 = vrot.slane %v7971_v63, 2  ;;  %v6877_v34 = vpop.eup %6876 }
 0x16c   : > { %12339 = vst [vmem:[#allocation90_spill] sm:$0xff] %v8077_v12  ;;  %vm12343_vm1 = vcmp.lt.s32.totalorder %v7195_v45, 6  ;;  %v12344_v35 = vrot.slane %v7796_v57, 1  ;;  %vm12345_vm0 = vmmov %vm12341_vm2  ;;  %v12346_v19 = vrot.slane %v7796_v57, 2  ;;  %v1504_v58 = vrot.slane %v8054_v44, 6  ;;  %v6879_v61 = vpop.eup %6878 }
 0x16d   : > { %v1891_v43 = vsel %vm12341_vm2, %v1856_v28, %v12340_v38  ;;  %v2052_v55 = vsel %vm12343_vm1, %v2017_v20, %v12342_v15  ;;  %vm12347_vm3 = vmmov %vm12343_vm1  ;;  %v1665_v38 = vrot.slane %v8054_v44, 7  ;;  %v1859_v15 = vrot.slane %v8060_v17, 1  ;;  %v6881_v21 = vpop.eup %6880 }
 0x16e   : > { %v8091_v42 = vsel %vm12345_vm0, %v12344_v35, %v1856_v28  ;;  %v8097_v49 = vsel %vm12347_vm3, %v12346_v19, %v2017_v20  ;;  %v2020_v47 = vrot.slane %v8060_v17, 2  ;;  %v1858_v62 = vrot.slane %v8054_v44, 1  ;;  %v12348_v35 = vld [vmem:[#allocation8_spill] sm:$0xff]  ;;  %v6883_v0 = vpop.eup %6882 }
 0x16f   : > { %v2019_v28 = vrot.slane %v8054_v44, 2  ;;  %v12349_v8 = vand.u32 15, %v12348_v35  ;;  %v12350_v57 = vmov 0  ;;  %v12354_v19 = vmov 0  ;;  %v6885_v32 = vpop.eup %6884 }
 0x170   : > { %v2178_v54 = vmax.f32 %v1891_v43, %v2052_v55  ;;  %v1505_v10 = vrot.slane %v8060_v17, 6  ;;  %v1666_v59 = vrot.slane %v8060_v17, 7  ;;  %vm12357_vm1 = vcmp.lt.s32.totalorder %v7195_v45, 2 }
 0x171   : > { %vm8107_vm0 = vcmp.ge.s32.totalorder %v12349_v8, 2  ;;  %v12353_v20 = vmov %v12349_v8  ;;  %v1536_v7 = vsel %vm12357_vm1, %v1503_v1, %v1504_v58  ;;  %v12359_v23 = vand.u32 15, %v12358_v13 }
 0x172   : > { %v12351_v57 = vsel %vm8107_vm0, 4294967295, %v12350_v57  ;;  %vm8113_vm2 = vcmp.ge.s32.totalorder %v12353_v20, 1  ;;  %v12360_v35 = vmov 0  ;;  %vm12363_vm14 = vcmp.lt.s32.totalorder %v7195_v45, 1  ;;  %v12371_v20 = vld [vmem:[#allocation7_spill] sm:$0xff]  ;;  %v6887_v37 = vpop.eup %6886 }
 0x173   : > { %12352 = vst [vmem:[#allocation8_spill] sm:$0xff] %v12351_v57  ;;  %v12355_v19 = vsel %vm8113_vm2, 4294967295, %v12354_v19  ;;  %vm8125_vm3 = vcmp.lt.s32.totalorder %v12359_v23, 15  ;;  %v1697_v43 = vsel %vm12363_vm14, %v1664_v11, %v1665_v38  ;;  %v708_v55 = vadd.f32 1.0, %v6873_v52 }
 0x174   : > { %12356 = vst [vmem:[#allocation91_spill] sm:$0xff] %v12355_v19  ;;  %v12361_v35 = vsel %vm8125_vm3, 4294967295, %v12360_v35  ;;  %v12364_v9 = vmov %v12359_v23  ;;  %v12365_v1 = vmov 0  ;;  %v1633_v8 = vsel %vm8008_vm13, %v1536_v7, -1e+30 }
 0x175   : > { %12362 = vst [vmem:[#allocation5_spill] sm:$0xff] %v12361_v35  ;;  %vm8134_vm1 = vcmp.lt.s32.totalorder %v12364_v9, 14  ;;  %v1794_v23 = vsel %vm8014_vm12, %v1697_v43, -1e+30  ;;  %v8143_v12 = vmul.f32 %v6877_v34, %v7752_v51  ;;  %v707_v11 = vadd.f32 1.0, %v6875_v29 }
 0x176   : > { %v12366_v1 = vsel %vm8134_vm1, 4294967295, %v12365_v1  ;;  %v1984_v52 = vsel %vm8020_vm4, %v8091_v42, -1e+30  ;;  %v2145_v9 = vsel %vm8026_vm15, %v8097_v49, -1e+30  ;;  %vm12369_vm14 = vcmp.lt.s32.totalorder %v7195_v45, 7 }
 0x177   : > { %12367 = vst [vmem:[#allocation92_spill] sm:$0xff] %v12366_v1  ;;  %12368 = vst [vmem:[#allocation93_spill] sm:$0xff] %v8143_v12  ;;  %v1889_v13 = vsel %vm12369_vm14, %v1858_v62, %v1859_v15  ;;  %vm12370_vm13 = vcmp.lt.s32.totalorder %v7195_v45, 6  ;;  %v12372_v43 = vand.u32 15, %v12371_v20  ;;  %v12373_v51 = vmov 0 }
 0x178   : > { %v2050_v7 = vsel %vm12370_vm13, %v2019_v28, %v2020_v47  ;;  %v12377_v42 = vmov 0  ;;  %v2210_v34 = vmax.f32 %v1824_v33, %v2178_v54  ;;  %vm12380_vm15 = vcmp.lt.s32.totalorder %v7195_v45, 2 }
 0x179   : > { %vm8157_vm12 = vcmp.lt.s32.totalorder %v12372_v43, 15  ;;  %v12376_v29 = vmov %v12372_v43  ;;  %v8169_v49 = vsel %vm12380_vm15, %v1504_v58, %v1505_v10  ;;  %vm12382_vm14 = vcmp.lt.s32.totalorder %v7195_v45, 1  ;;  %v6889_v58 = vpop.eup %6888 }
 0x17a   : > { %v12374_v51 = vsel %vm8157_vm12, 4294967295, %v12373_v51  ;;  %vm8163_vm5 = vcmp.lt.s32.totalorder %v12376_v29, 14  ;;  %12381 = vst [vmem:[#allocation95_spill] sm:$0xff] %v8169_v49  ;;  %v8173_v56 = vsel %vm12382_vm14, %v1665_v38, %v1666_v59  ;;  %v12384_v43 = vrot.slane %v7971_v63, 1 }
 0x17b   : > { %12375 = vst [vmem:[#allocation7_spill] sm:$0xff] %v12374_v51  ;;  %v12378_v42 = vsel %vm8163_vm5, 4294967295, %v12377_v42  ;;  %12383 = vst [vmem:[#allocation96_spill] sm:$0xff] %v8173_v56  ;;  %vm12385_vm13 = vcmp.lt.s32.totalorder %v7195_v45, 7  ;;  %v1826_v20 = vmax.f32 %v1633_v8, %v1794_v23  ;;  %v12386_v29 = vrot.slane %v7971_v63, 2  ;;  %v12570_v56 = vld [vmem:[#allocation83_spill] sm:$0xff] }
 0x17c   : > { %12379 = vst [vmem:[#allocation94_spill] sm:$0xff] %v12378_v42  ;;  %v1890_v40 = vsel %vm12385_vm13, %v12384_v43, %v1858_v62  ;;  %vm12387_vm4 = vcmp.lt.s32.totalorder %v7195_v45, 6  ;;  %v8184_v33 = vmul.f32 %v6885_v32, %v7776_v31  ;;  %6890 = vrcp.f32 %v708_v55  ;;  %v12462_v42 = vld [vmem:[#allocation13_spill] sm:$0xff] }
 0x17d   : > { %v2051_v54 = vsel %vm12387_vm4, %v12386_v29, %v2019_v28  ;;  %v2180_v60 = vmax.f32 %v1889_v13, %v2050_v7  ;;  %v11896_v38 = vrot.slane %v8143_v12, 1  ;;  %6892 = vrcp.f32 %v707_v11  ;;  %vm12388_vm4 = vmmov %vm12382_vm14 }
 0x17e   : > { %v710_v50 = vadd.f32 1.0, %v6879_v61  ;;  %v11897_v27 = vrot.slane %v8143_v12, 2  ;;  %v1506_v62 = vrot.slane %v8184_v33, 6  ;;  %v1667_v8 = vrot.slane %v8184_v33, 7  ;;  %vm12389_vm14 = vmmov %vm12385_vm13 }
 0x17f   : > { %v1860_v23 = vrot.slane %v8184_v33, 1  ;;  %v2021_v31 = vrot.slane %v8184_v33, 2  ;;  %v709_v32 = vadd.f32 1.0, %v6881_v21  ;;  %v1668_v55 = vrot.slane %v8143_v12, 7 }
 0x180   : > { %6894 = vrcp.f32 %v710_v50  ;;  %v1534_v11 = vsel %vm12380_vm15, %v1505_v10, %v1506_v62  ;;  %v1695_v61 = vsel %vm12388_vm4, %v1666_v59, %v1667_v8  ;;  %v712_v13 = vadd.f32 1.0, %v6883_v0  ;;  %v12392_v10 = vld [vmem:[#allocation10_spill] sm:$0xff] }
 0x181   : > { %v1635_v7 = vsel %vm8107_vm0, %v1534_v11, -1e+30  ;;  %v1796_v43 = vsel %vm8113_vm2, %v1695_v61, -1e+30  ;;  %v1887_v21 = vsel %vm12389_vm14, %v1860_v23, %v11896_v38  ;;  %v711_v50 = vadd.f32 1.0, %v6887_v37 }
 0x182   : > { %v1888_v29 = vsel %vm12385_vm13, %v1859_v15, %v1860_v23  ;;  %vm12390_vm15 = vcmp.lt.s32.totalorder %v7195_v45, 6  ;;  %v12393_v11 = vand.u32 15, %v12392_v10  ;;  %v12394_v61 = vmov 0 }
 0x183   : > { %v2048_v0 = vsel %vm12390_vm15, %v2021_v31, %v11897_v27  ;;  %vm12391_vm4 = vmmov %vm12390_vm15  ;;  %v12398_v37 = vmov 0  ;;  %v714_v15 = vadd.f32 1.0, %v6889_v58  ;;  %v1986_v23 = vsel %vm8125_vm3, %v1890_v40, -1e+30 }
 0x184   : > { %v2049_v59 = vsel %vm12391_vm4, %v2020_v47, %v2021_v31  ;;  %vm8216_vm2 = vcmp.ge.s32.totalorder %v12393_v11, 2  ;;  %v12397_v38 = vmov %v12393_v11  ;;  %v1828_v27 = vmax.f32 %v1635_v7, %v1796_v43 }
 0x185   : > { %v12395_v61 = vsel %vm8216_vm2, 4294967295, %v12394_v61  ;;  %vm8222_vm14 = vcmp.ge.s32.totalorder %v12397_v38, 1  ;;  %v2182_v28 = vmax.f32 %v1887_v21, %v2048_v0  ;;  %6896 = vrcp.f32 %v709_v32  ;;  %v12404_v38 = vld [vmem:[#allocation9_spill] sm:$0xff] }
 0x186   : > { %12396 = vst [vmem:[#allocation10_spill] sm:$0xff] %v12395_v61  ;;  %v12399_v37 = vsel %vm8222_vm14, 4294967295, %v12398_v37  ;;  %v2147_v47 = vsel %vm8134_vm1, %v2051_v54, -1e+30  ;;  %v2212_v31 = vmax.f32 %v1826_v20, %v2180_v60  ;;  %v12401_v11 = vrot.slane %v8143_v12, 6  ;;  %v6891_v54 = vpop.eup %6890 }
 0x187   : > { %12400 = vst [vmem:[#allocation97_spill] sm:$0xff] %v12399_v37  ;;  %vm12402_vm13 = vcmp.lt.s32.totalorder %v7195_v45, 2  ;;  %v12405_v19 = vand.u32 15, %v12404_v38  ;;  %v12406_v58 = vmov 0  ;;  %v12410_v32 = vmov 0  ;;  %v6893_v43 = vpop.eup %6892 }
 0x188   : > { %v8234_v10 = vsel %vm12402_vm13, %v1506_v62, %v12401_v11  ;;  %6898 = vrcp.f32 %v712_v13  ;;  %vm12413_vm0 = vcmp.lt.s32.totalorder %v7195_v45, 1  ;;  %v1988_v20 = vsel %vm8157_vm12, %v1888_v29, -1e+30 }
 0x189   : > { %12403 = vst [vmem:[#allocation98_spill] sm:$0xff] %v8234_v10  ;;  %vm8238_vm15 = vcmp.lt.s32.totalorder %v12405_v19, 15  ;;  %v12409_v40 = vmov %v12405_v19  ;;  %v8250_v60 = vsel %vm12413_vm0, %v1667_v8, %v1668_v55  ;;  %v2149_v19 = vsel %vm8163_vm5, %v2049_v59, -1e+30 }
 0x18a   : > { %v12407_v58 = vsel %vm8238_vm15, 4294967295, %v12406_v58  ;;  %vm8244_vm4 = vcmp.lt.s32.totalorder %v12409_v40, 14  ;;  %12414 = vst [vmem:[#allocation100_spill] sm:$0xff] %v8250_v60  ;;  %6900 = vrcp.f32 %v711_v50  ;;  %v8256_v62 = vmax.f32 %v1984_v52, %v2145_v9  ;;  %v6895_v0 = vpop.eup %6894 }
 0x18b   : > { %12408 = vst [vmem:[#allocation9_spill] sm:$0xff] %v12407_v58  ;;  %v12411_v32 = vsel %vm8244_vm4, 4294967295, %v12410_v32  ;;  %v8259_v7 = vmax.f32 %v7998_v30, %v2210_v34  ;;  %6902 = vrcp.f32 %v714_v15  ;;  %v8263_v8 = vmax.f32 %v1986_v23, %v2147_v47 }
 0x18c   : > { %12412 = vst [vmem:[#allocation99_spill] sm:$0xff] %v12411_v32  ;;  %v2214_v21 = vmax.f32 %v1828_v27, %v2182_v28  ;;  %v8266_v29 = vmul.f32 %v6891_v54, %v7780_v39  ;;  %6904 = vpow2.f32 %v7985_v3  ;;  %v8270_v50 = vmax.f32 %v8054_v44, %v2212_v31  ;;  %v12420_v31 = vld [vmem:[#allocation12_spill] sm:$0xff] }
 0x18d   : > { %12415 = vst [vmem:[#allocation101_spill] sm:$0xff] %v8263_v8  ;;  %v8274_v9 = vmax.f32 %v1988_v20, %v2149_v19  ;;  %v8277_v34 = vmul.f32 %v6893_v43, %v7843_v41  ;;  %v12421_v11 = vand.u32 15, %v12420_v31  ;;  %v12422_v38 = vmov 0  ;;  %v7052_v43 = vld [vmem:[%s11695_s2] ss:$0 sm:$0xff] }
 0x18e   : > { %12416 = vst [vmem:[#allocation102_spill] sm:$0xff] %v8266_v29  ;;  %12417 = vst [vmem:[#allocation103_spill] sm:$0xff] %v8270_v50  ;;  %v1509_v59 = vrot.slane %v8266_v29, 6  ;;  %v1670_v27 = vrot.slane %v8266_v29, 7  ;;  %v11913_v39 = vrot.slane %v8266_v29, 1  ;;  %v8288_v41 = vmax.f32 %v8184_v33, %v2214_v21 }
 0x18f   : > { %12418 = vst [vmem:[#allocation104_spill] sm:$0xff] %v8274_v9  ;;  %v1508_v28 = vrot.slane %v8277_v34, 6  ;;  %v1669_v15 = vrot.slane %v8277_v34, 7  ;;  %v1862_v23 = vrot.slane %v8277_v34, 1  ;;  %v2023_v47 = vrot.slane %v8277_v34, 2  ;;  %v6897_v54 = vpop.eup %6896  ;;  %v12571_v9 = vld [vmem:[#allocation86_spill] sm:$0xff] }
 0x190   : > { %12419 = vst [vmem:[#allocation105_spill] sm:$0xff] %v8288_v41  ;;  %vm8292_vm0 = vcmp.ge.s32.totalorder %v12421_v11, 2  ;;  %v12425_v40 = vmov %v12421_v11  ;;  %v12426_v20 = vmov 0  ;;  %v6102_v19 = vmul.f32 -1.442695, %v8064_v25 }
 0x191   : > { %v12423_v38 = vsel %vm8292_vm0, 4294967295, %v12422_v38  ;;  %vm8298_vm13 = vcmp.ge.s32.totalorder %v12425_v40, 1  ;;  %v8308_v21 = vadd.f32 %v7052_v43, %v7677_v46  ;;  %vm12429_vm5 = vcmp.lt.s32.totalorder %v7195_v45, 2 }
 0x192   : > { %12424 = vst [vmem:[#allocation12_spill] sm:$0xff] %v12423_v38  ;;  %v12427_v20 = vsel %vm8298_vm13, 4294967295, %v12426_v20  ;;  %v8312_v11 = vsel %vm12429_vm5, %v1508_v28, %v1509_v59  ;;  %v12431_v31 = vrot.slane %v8143_v12, 6  ;;  %vm12432_vm12 = vmmov %vm12429_vm5  ;;  %vm12433_vm1 = vcmp.lt.s32.totalorder %v7195_v45, 1 }
 0x193   : > { %12428 = vst [vmem:[#allocation106_spill] sm:$0xff] %v12427_v20  ;;  %12430 = vst [vmem:[#allocation107_spill] sm:$0xff] %v8312_v11  ;;  %v1693_v52 = vsel %vm12433_vm1, %v1668_v55, %v1669_v15  ;;  %v8321_v13 = vmul.f32 %v6895_v0, %v7903_v4  ;;  %vm12436_vm5 = vcmp.lt.s32.totalorder %v7195_v45, 7  ;;  %v12437_v55 = vld [vmem:[#allocation11_spill] sm:$0xff]  ;;  %v12439_v4 = vmov 0 }
 0x194   : > { %v1532_v40 = vsel %vm12432_vm12, %v12431_v31, %v1508_v28  ;;  %vm12434_vm3 = vmmov %vm12433_vm1  ;;  %v1798_v3 = vsel %vm8222_vm14, %v1693_v52, -1e+30  ;;  %v1885_v28 = vsel %vm12436_vm5, %v1862_v23, %v11913_v39  ;;  %v12438_v31 = vand.u32 15, %v12437_v55 }
 0x195   : > { %v1637_v46 = vsel %vm8216_vm2, %v1532_v40, -1e+30  ;;  %v8327_v43 = vsel %vm12434_vm3, %v1669_v15, %v1670_v27  ;;  %v12443_v40 = vmov 0  ;;  %v6899_v15 = vpop.eup %6898  ;;  %v12446_v52 = vrot.slane %v8143_v12, 1  ;;  %vm12447_vm3 = vmmov %vm12436_vm5 }
 0x196   : > { %12435 = vst [vmem:[#allocation108_spill] sm:$0xff] %v8327_v43  ;;  %vm8337_vm12 = vcmp.lt.s32.totalorder %v12438_v31, 15  ;;  %v12442_v0 = vmov %v12438_v31  ;;  %v1830_v30 = vmax.f32 %v1637_v46, %v1798_v3  ;;  %v12448_v39 = vrot.slane %v8266_v29, 2 }
 0x197   : > { %v12440_v4 = vsel %vm8337_vm12, 4294967295, %v12439_v4  ;;  %vm8343_vm1 = vcmp.lt.s32.totalorder %v12442_v0, 14  ;;  %v1886_v37 = vsel %vm12447_vm3, %v12446_v52, %v1862_v23  ;;  %vm12449_vm5 = vcmp.lt.s32.totalorder %v7195_v45, 6  ;;  %v6901_v0 = vpop.eup %6900 }
 0x198   : > { %12441 = vst [vmem:[#allocation11_spill] sm:$0xff] %v12440_v4  ;;  %v12444_v40 = vsel %vm8343_vm1, 4294967295, %v12443_v40  ;;  %v2046_v31 = vsel %vm12449_vm5, %v2023_v47, %v12448_v39  ;;  %v12450_v61 = vrot.slane %v8143_v12, 2  ;;  %vm12451_vm14 = vmmov %vm12449_vm5  ;;  %v1990_v57 = vsel %vm8238_vm15, %v1886_v37, -1e+30  ;;  %v6903_v23 = vpop.eup %6902 }
 0x199   : > { %12445 = vst [vmem:[#allocation109_spill] sm:$0xff] %v12444_v40  ;;  %v2184_v46 = vmax.f32 %v1885_v28, %v2046_v31  ;;  %6906 = vpow2.f32 %v8031_v48  ;;  %v8368_v39 = vmul.f32 -1.442695, %v8308_v21  ;;  %v8377_v28 = vmul.f32 %v6897_v54, %v7907_v36  ;;  %v12453_v31 = vld [vmem:[#allocation14_spill] sm:$0xff] }
 0x19a   : > { %v2047_v55 = vsel %vm12451_vm14, %v12450_v61, %v2023_v47  ;;  %6908 = vpow2.f32 %v8034_v2  ;;  %v8371_v61 = vadd.s32 232, %v7195_v45  ;;  %v6905_v47 = vpop.eup %6904  ;;  %v8380_v48 = vmul.f32 %v6899_v15, %v7933_v18 }
 0x19b   : > { %v2151_v3 = vsel %vm8244_vm4, %v2047_v55, -1e+30  ;;  %v1511_v55 = vrot.slane %v8321_v13, 6  ;;  %v12454_v52 = vand.u32 15, %v12453_v31  ;;  %v12455_v2 = vmov 0 }
 0x19c   : > { %v8373_v37 = vmax.f32 %v1990_v57, %v2151_v3  ;;  %v12459_v58 = vmov 0  ;;  %v2216_v57 = vmax.f32 %v1830_v30, %v2184_v46  ;;  %v1672_v3 = vrot.slane %v8321_v13, 7 }
 0x19d   : > { %vm8384_vm14 = vcmp.ge.s32.totalorder %v12454_v52, 2  ;;  %v12458_v32 = vmov %v12454_v52  ;;  %v1865_v36 = vrot.slane %v8321_v13, 1  ;;  %v2026_v18 = vrot.slane %v8321_v13, 2 }
 0x19e   : > { %12452 = vst [vmem:[#allocation110_spill] sm:$0xff] %v8373_v37  ;;  %v12456_v2 = vsel %vm8384_vm14, 4294967295, %v12455_v2  ;;  %vm8390_vm3 = vcmp.ge.s32.totalorder %v12458_v32, 1  ;;  %v1510_v54 = vrot.slane %v8377_v28, 6  ;;  %v1671_v15 = vrot.slane %v8377_v28, 7 }
 0x19f   : > { %12457 = vst [vmem:[#allocation14_spill] sm:$0xff] %v12456_v2  ;;  %v12460_v58 = vsel %vm8390_vm3, 4294967295, %v12459_v58  ;;  %v1864_v52 = vrot.slane %v8377_v28, 1  ;;  %6910 = vpow2.f32 %v6102_v19  ;;  %v2025_v31 = vrot.slane %v8377_v28, 2 }
 0x1a0   : > { %12461 = vst [vmem:[#allocation111_spill] sm:$0xff] %v12460_v58  ;;  %v8402_v32 = vmul.f32 %v6901_v0, %v7950_v16  ;;  %v12463_v30 = vand.u32 15, %v12462_v42  ;;  %v12464_v46 = vmov 0  ;;  %v8411_v51 = vmul.f32 %v6903_v23, %v7954_v22  ;;  %v12520_v58 = vld [vmem:[#allocation49_spill] sm:$0xff] }
 0x1a1   : > { %v713_v1 = vadd.f32 1.0, %v6905_v47  ;;  %vm12467_vm2 = vcmp.lt.s32.totalorder %v7195_v45, 2  ;;  %vm12468_vm4 = vcmp.lt.s32.totalorder %v7195_v45, 1  ;;  %v12470_v0 = vmov 0 }
 0x1a2   : > { %vm8406_vm5 = vcmp.lt.s32.totalorder %v12463_v30, 15  ;;  %v1530_v35 = vsel %vm12467_vm2, %v1509_v59, %v1510_v54  ;;  %v1691_v19 = vsel %vm12468_vm4, %v1670_v27, %v1671_v15  ;;  %v12469_v16 = vmov %v12463_v30  ;;  %vm12473_vm10 = vmmov %vm12467_vm2 }
 0x1a3   : > { %v12465_v46 = vsel %vm8406_vm5, 4294967295, %v12464_v46  ;;  %vm8420_vm15 = vcmp.lt.s32.totalorder %v12469_v16, 14  ;;  %v8425_v30 = vadd.s32 240, %v7195_v45  ;;  %v8429_v22 = vsel %vm12473_vm10, %v1510_v54, %v1511_v55  ;;  %v6907_v11 = vpop.eup %6906 }
 0x1a4   : > { %12466 = vst [vmem:[#allocation13_spill] sm:$0xff] %v12465_v46  ;;  %v12471_v0 = vsel %vm8420_vm15, 4294967295, %v12470_v0  ;;  %12474 = vst [vmem:[#allocation113_spill] sm:$0xff] %v8429_v22  ;;  %v1639_v59 = vsel %vm8292_vm0, %v1530_v35, -1e+30  ;;  %vm12475_vm2 = vcmp.lt.s32.totalorder %v7195_v45, 7  ;;  %v8439_v23 = vsel %vm12468_vm4, %v1671_v15, %v1672_v3  ;;  %v6909_v37 = vpop.eup %6908 }
 0x1a5   : > { %12472 = vst [vmem:[#allocation112_spill] sm:$0xff] %v12471_v0  ;;  %v1800_v27 = vsel %vm8298_vm13, %v1691_v19, -1e+30  ;;  %v1883_v42 = vsel %vm12475_vm2, %v1864_v52, %v1865_v36  ;;  %12476 = vst [vmem:[#allocation114_spill] sm:$0xff] %v8439_v23  ;;  %v12477_v47 = vrot.slane %v8266_v29, 1  ;;  %vm12479_vm10 = vcmp.lt.s32.totalorder %v7195_v45, 6 }
 0x1a6   : > { %vm12478_vm7 = vmmov %vm12475_vm2  ;;  %v2044_v54 = vsel %vm12479_vm10, %v2025_v31, %v2026_v18  ;;  %v12480_v35 = vrot.slane %v8266_v29, 2  ;;  %v1832_v43 = vmax.f32 %v1639_v59, %v1800_v27  ;;  %v1866_v10 = vrot.slane %v8402_v32, 1  ;;  %v12553_v22 = vld [vmem:[#allocation52_spill] sm:$0xff] }
 0x1a7   : > { %v1884_v16 = vsel %vm12478_vm7, %v12477_v47, %v1864_v52  ;;  %vm12481_vm0 = vmmov %vm12479_vm10  ;;  %v2186_v38 = vmax.f32 %v1883_v42, %v2044_v54  ;;  %v1512_v52 = vrot.slane %v8402_v32, 6  ;;  %v1673_v47 = vrot.slane %v8402_v32, 7  ;;  %v12511_v42 = vld [vmem:[#allocation45_spill] sm:$0xff] }
 0x1a8   : > { %v2045_v19 = vsel %vm12481_vm0, %v12480_v35, %v2025_v31  ;;  %v1992_v20 = vsel %vm8337_vm12, %v1884_v16, -1e+30  ;;  %v8460_v31 = vmax.f32 %v8277_v34, %v2216_v57  ;;  %v2027_v16 = vrot.slane %v8402_v32, 2  ;;  %vm12485_vm0 = vmmov %vm12468_vm4 }
 0x1a9   : > { %v2153_v15 = vsel %vm8343_vm1, %v2045_v19, -1e+30  ;;  %vm12484_vm7 = vcmp.lt.s32.totalorder %v7195_v45, 2  ;;  %v1689_v19 = vsel %vm12485_vm0, %v1672_v3, %v1673_v47  ;;  %v2218_v60 = vmax.f32 %v1832_v43, %v2186_v38  ;;  %v6911_v40 = vpop.eup %6910  ;;  %vm12487_vm4 = vmmov %vm12475_vm2 }
 0x1aa   : > { %12482 = vst [vmem:[#allocation115_spill] sm:$0xff] %v8460_v31  ;;  %v8467_v54 = vmax.f32 %v1992_v20, %v2153_v15  ;;  %v1528_v35 = vsel %vm12484_vm7, %v1511_v55, %v1512_v52  ;;  %v1802_v27 = vsel %vm8390_vm3, %v1689_v19, -1e+30  ;;  %v12486_v20 = vrot.slane %v8380_v48, 1 }
 0x1ab   : > { %v1641_v57 = vsel %vm8384_vm14, %v1528_v35, -1e+30  ;;  %v1882_v55 = vsel %vm12487_vm4, %v1865_v36, %v1866_v10  ;;  %v12488_v38 = vrot.slane %v8380_v48, 2  ;;  %v12489_v3 = vrot.slane %v8380_v48, 6 }
 0x1ac   : > { %12483 = vst [vmem:[#allocation116_spill] sm:$0xff] %v8467_v54  ;;  %v1834_v4 = vmax.f32 %v1641_v57, %v1802_v27  ;;  %v1881_v15 = vsel %vm12475_vm2, %v1866_v10, %v12486_v20  ;;  %v12491_v27 = vrot.slane %v8380_v48, 7  ;;  %vm12493_vm2 = vmmov %vm12479_vm10  ;;  %v8505_v57 = vld [vmem:[%s11696_s3] sm:$0x3]  ;;  %v1994_v20 = vsel %vm8406_vm5, %v1882_v55, -1e+30 }
 0x1ad   : > { %v2042_v43 = vsel %vm12479_vm10, %v2027_v16, %v12488_v38  ;;  %v8492_v35 = vsel %vm12484_vm7, %v1512_v52, %v12489_v3  ;;  %v2043_v10 = vsel %vm12493_vm2, %v2026_v18, %v2027_v16  ;;  %6912 = vrcp.f32 %v713_v1  ;;  %v6170_v1 = vld [vmem:[%s11696_s3 + $0x4] sm:$0x3] }
 0x1ae   : > { %12490 = vst [vmem:[#allocation117_spill] sm:$0xff] %v8492_v35  ;;  %v8498_v19 = vsel %vm12485_vm0, %v1673_v47, %v12491_v27  ;;  %v2188_v36 = vmax.f32 %v1881_v15, %v2042_v43  ;;  %v716_v38 = vadd.f32 1.0, %v6907_v11  ;;  %v6103_v47 = vld [vmem:[%s11696_s3 + $0x2] sm:$0x3]  ;;  %v2155_v18 = vsel %vm8420_vm15, %v2043_v10, -1e+30 }
 0x1af   : > { %12492 = vst [vmem:[#allocation118_spill] sm:$0xff] %v8498_v19  ;;  %v715_v15 = vadd.f32 1.0, %v6909_v37  ;;  %v718_v43 = vadd.f32 1.0, %v6911_v40  ;;  %v8516_v3 = vmax.f32 %v8377_v28, %v2218_v60  ;;  %vm11971_vm4 = vcmask 1041408   ;;  %v12508_v55 = vld [vmem:[#allocation26_spill] sm:$0xff]  ;;  %v12514_v37 = vld [vmem:[#allocation40_spill] sm:$0xff] }
 0x1b0   : > { %v2220_v16 = vmax.f32 %v1834_v4, %v2188_v36  ;;  %6914 = vrcp.f32 %v716_v38  ;;  %6690 = vmatprep.subr.msk.mxu1 %vm11971_vm4, %v8505_v57  ;;  %vm11964_vm10 = vcmask 15360   ;;  %6490 = vmatprep.subr.msk.mxu0 %vm11971_vm4, %v6103_v47  ;;  %v8528_v60 = vmax.f32 %v1994_v20, %v2155_v18  ;;  %v12505_v18 = vld [vmem:[#allocation34_spill] sm:$0xff]  ;;  %v12516_v27 = vld [vmem:[#allocation36_spill] sm:$0xff]  ;;  %v12517_v11 = vld [vmem:[#allocation37_spill] sm:$0xff] }
 0x1b1   : > { %12494 = vst [vmem:[#allocation119_spill] sm:$0xff] %v8516_v3  ;;  %6916 = vrcp.f32 %v715_v15  ;;  %6691 = vmatpush3.msk.msra.mxu1 %vm11971_vm4, %v8505_v57  ;;  %6566 = vmatprep.mubr.msk.f32.mxu1 %vm11964_vm10, %v8054_v44  ;;  %v12497_v10 = vand.u32 15, %v7974_v5  ;;  %v12498_v36 = vmov 0  ;;  %v12502_v38 = vmov 0  ;;  %v12506_v44 = vld [vmem:[#allocation33_spill] sm:$0xff]  ;;  %v12539_v19 = vld [vmem:[#allocation78_spill] sm:$0xff] }
 0x1b2   : > { %12495 = vst [vmem:[#allocation120_spill] sm:$0xff] %v8528_v60  ;;  %v8531_v4 = vmax.f32 %v8402_v32, %v2220_v16  ;;  %6918 = vrcp.f32 %v718_v43  ;;  %6567 = vmatmul.mubr.msk.f32.vlgmr.msra.gmra.mrb[0].mxu1 %vm11964_vm10, %v8060_v17  ;;  %6590 = vmatprep.subr.msk.mxu1 %vm11971_vm4, %v6170_v1  ;;  %v8558_v15 = vmax.f32 %v7624_v6, %v7719_v24  ;;  %v12512_v40 = vsel %vm7423_vm11, %v12511_v42, -1e+30  ;;  %v12540_v35 = vld [vmem:[#allocation62_spill] sm:$0xff]  ;;  %v12557_v3 = vld [vmem:[#allocation77_spill] sm:$0xff] }
 0x1b3   : > { %vm8541_vm7 = vcmp.ge.s32.totalorder %v12497_v10, 2  ;;  %v12501_v20 = vmov %v12497_v10  ;;  %v12507_v10 = vld [vmem:[#allocation32_spill] sm:$0xff]  ;;  %6920 = vpow2.f32 %v8368_v39  ;;  %6569 = vmatprep.mubr.msk.f32.mxu1 %vm11964_vm10, %v8184_v33  ;;  %6491 = vmatpush3.msk.msra.mxu0 %vm11971_vm4, %v6103_v47  ;;  %v12518_v52 = vmax.f32 %v12516_v27, %v12517_v11  ;;  %v12533_v11 = vld [vmem:[#allocation58_spill] sm:$0xff] }
 0x1b4   : > { %12496 = vst [vmem:[#allocation121_spill] sm:$0xff] %v8531_v4  ;;  %v12499_v36 = vsel %vm8541_vm7, 4294967295, %v12498_v36  ;;  %vm8547_vm0 = vcmp.ge.s32.totalorder %v12501_v20, 1  ;;  %v1811_v5 = vmax.f32 %v12508_v55, %v12507_v10  ;;  %v8565_v20 = vld [vmem:[%s11696_s3 + $0x6] sm:$0x3]  ;;  %v12519_v39 = vld [vmem:[#allocation48_spill] sm:$0xff]  ;;  %6591 = vmatpush3.msk.msra.mxu1 %vm11971_vm4, %v6170_v1  ;;  %6540 = vmatprep.subr.msk.mxu0 %vm11971_vm4, %v8505_v57 }
 0x1b5   : > { %12500 = vst [vmem:[#allocation122_spill] sm:$0xff] %v12499_v36  ;;  %v12503_v38 = vsel %vm8547_vm0, 4294967295, %v12502_v38  ;;  %12509 = vst [vmem:[#allocation34_spill] sm:$0xff] %v8565_v20  ;;  %v12515_v55 = vsel %vm7390_vm8, %v12514_v37, -1e+30  ;;  %v2199_v59 = vmax.f32 %v12518_v52, %v7716_v53  ;;  %v12521_v33 = vmax.f32 %v12519_v39, %v12520_v58  ;;  %v12522_v47 = vld [vmem:[#allocation24_spill] sm:$0xff]  ;;  %6640 = vmatprep.subr.msk.mxu1 %vm11971_vm4, %v8565_v20 }
 0x1b6   : > { %12504 = vst [vmem:[#allocation123_spill] sm:$0xff] %v12503_v38  ;;  %v2165_v10 = vmax.f32 %v12515_v55, %v12512_v40  ;;  %v12523_v0 = vand.u32 15, %v12522_v47  ;;  %v12524_v46 = vmov 0  ;;  %v12528_v40 = vmov 0  ;;  %v12531_v52 = vld [vmem:[#allocation68_spill] sm:$0xff]  ;;  %v12536_v55 = vld [vmem:[#allocation71_spill] sm:$0xff] }
 0x1b7   : > { %v2201_v2 = vmax.f32 %v12521_v33, %v7724_v14  ;;  %v8603_v58 = vmax.f32 %v7719_v24, %v12531_v52  ;;  %v12532_v14 = vld [vmem:[#allocation70_spill] sm:$0xff]  ;;  %v8611_v39 = vmax.f32 %v12531_v52, %v12536_v55  ;;  %v12537_v1 = vld [vmem:[#allocation21_spill] sm:$0xff]  ;;  %v12541_v4 = vld [vmem:[#allocation63_spill] sm:$0xff]  ;;  %vm12543_vm3 = vcmask 15360  }
 0x1b8   : > { %vm8589_vm2 = vcmp.lt.s32.totalorder %v12523_v0, 15  ;;  %v12527_v42 = vmov %v12523_v0  ;;  %v12534_v0 = vld [vmem:[#allocation59_spill] sm:$0xff]  ;;  %v2197_v33 = vmax.f32 %v1811_v5, %v2165_v10  ;;  %v8616_v47 = vmax.f32 %v12537_v1, %v2199_v59  ;;  %6570 = vmatmul.mubr.msk.f32.gmra.mrb[2].mxu1 %vm12543_vm3, %v8143_v12  ;;  %v12547_v10 = vld [vmem:[#allocation74_spill] sm:$0xff]  ;;  %vm12551_vm4 = vmmov %vm12543_vm3 }
 0x1b9   : > { %v12525_v46 = vsel %vm8589_vm2, 4294967295, %v12524_v46  ;;  %vm8595_vm10 = vcmp.lt.s32.totalorder %v12527_v42, 14  ;;  %v12535_v27 = vmax.f32 %v12533_v11, %v12534_v0  ;;  %v12538_v42 = vld [vmem:[#allocation27_spill] sm:$0xff]  ;;  %v12542_v23 = vmax.f32 %v12540_v35, %v12541_v4  ;;  %v12550_v35 = vld [vmem:[#allocation81_spill] sm:$0xff]  ;;  %6572 = vmatprep.mubr.msk.f32.mxu1 %vm12551_vm4, %v8277_v34  ;;  %v12552_v4 = vld [vmem:[#allocation16_spill] sm:$0xff] }
 0x1ba   : > { %12526 = vst [vmem:[#allocation33_spill] sm:$0xff] %v12525_v46  ;;  %v12529_v40 = vsel %vm8595_vm10, 4294967295, %v12528_v40  ;;  %v8619_v53 = vmax.f32 %v12538_v42, %v2201_v2  ;;  %v12545_v5 = vld [vmem:[#allocation79_spill] sm:$0xff]  ;;  %v12546_v2 = vld [vmem:[#allocation80_spill] sm:$0xff]  ;;  %v12565_v41 = vmov 0  ;;  %vm12568_vm14 = vcmask 15360  }
 0x1bb   : > { %12530 = vst [vmem:[#allocation32_spill] sm:$0xff] %v12529_v40  ;;  %v2203_v37 = vmax.f32 %v12535_v27, %v12532_v14  ;;  %v2205_v11 = vmax.f32 %v12542_v23, %v12539_v19  ;;  %v12544_v14 = vld [vmem:[#allocation46_spill] sm:$0xff]  ;;  %v8634_v59 = vmax.f32 %v12536_v55, %v12545_v5  ;;  %v12548_v27 = vld [vmem:[#allocation75_spill] sm:$0xff]  ;;  %v8642_v23 = vmax.f32 %v12545_v5, %v12550_v35  ;;  %v6913_v19 = vpop.eup %6912 }
 0x1bc   : > { %v12549_v42 = vmax.f32 %v12547_v10, %v12548_v27  ;;  %v8663_v54 = vmul.f32 %v6913_v19, %v12557_v3  ;;  %6573 = vmatmul.mubr.msk.f32.gmra.mrb[4].mxu1 %vm12568_vm14, %v8266_v29  ;;  %v12569_v19 = vld [vmem:[#allocation82_spill] sm:$0xff]  ;;  %v12572_v43 = vand.u32 15, %v12571_v9  ;;  %v12573_v50 = vmov 0 }
 0x1bd   : > { %v8630_v0 = vmax.f32 %v12544_v14, %v2203_v37  ;;  %v8647_v37 = vmax.f32 %v12552_v4, %v2197_v33  ;;  %v8651_v14 = vmax.f32 %v8616_v47, %v8619_v53  ;;  %v8654_v60 = vmax.f32 %v12553_v22, %v2205_v11  ;;  %v12558_v4 = vld [vmem:[#allocation64_spill] sm:$0xff]  ;;  %v6915_v11 = vpop.eup %6914  ;;  %v12559_v22 = vld [vmem:[#allocation87_spill] sm:$0xff]  ;;  %6575 = vmatprep.mubr.msk.f32.mxu1 %vm12568_vm14, %v8377_v28 }
 0x1be   : > { %v2207_v1 = vmax.f32 %v12549_v42, %v12546_v2  ;;  %v12554_v42 = vld [vmem:[#allocation38_spill] sm:$0xff]  ;;  %v12555_v2 = vld [vmem:[#allocation39_spill] sm:$0xff]  ;;  %v12560_v12 = vand.u32 15, %v12559_v22  ;;  %v1675_v33 = vrot.slane %v8663_v54, 7  ;;  %v12564_v20 = vand.u32 15, %v12559_v22 }
 0x1bf   : > { %v12556_v10 = vmax.f32 %v12554_v42, %v12555_v2  ;;  %v8667_v34 = vmax.f32 %v8619_v53, %v8630_v0  ;;  %v12561_v42 = vmov 0  ;;  %v2455_v3 = vmax.f32 %v8647_v37, -1e+30 }
 0x1c0   : > { %v8672_v31 = vmax.f32 %v12558_v4, %v2207_v1  ;;  %vm8676_vm3 = vcmp.ge.s32.totalorder %v12560_v12, 2  ;;  %v8686_v2 = vmax.f32 %v8630_v0, %v8654_v60  ;;  %v6917_v1 = vpop.eup %6916  ;;  %v1868_v12 = vrot.slane %v8663_v54, 1 }
 0x1c1   : > { %v8660_v27 = vmax.f32 %v12556_v10, %v8256_v62  ;;  %v12562_v42 = vsel %vm8676_vm3, 4294967295, %v12561_v42  ;;  %v2709_v62 = vmax.f32 %v8651_v14, -1e+30  ;;  %v1514_v10 = vrot.slane %v8663_v54, 6 }
 0x1c2   : > { %12563 = vst [vmem:[#allocation26_spill] sm:$0xff] %v12562_v42  ;;  %v2029_v4 = vrot.slane %v8663_v54, 2  ;;  %vm8694_vm4 = vcmp.ge.s32.totalorder %v12564_v20, 1  ;;  %v8701_v17 = vmul.f32 %v6915_v11, %v12569_v19  ;;  %v8704_v49 = vmul.f32 %v6917_v1, %v12570_v56  ;;  %v6919_v19 = vpop.eup %6918 }
 0x1c3   : > { %v12566_v41 = vsel %vm8694_vm4, 4294967295, %v12565_v41  ;;  %vm8708_vm15 = vcmp.lt.s32.totalorder %v12572_v43, 15  ;;  %v12576_v22 = vmov %v12572_v43  ;;  %v12577_v20 = vmov 0  ;;  %v6921_v16 = vpop.eup %6920 }
 0x1c4   : > { %12567 = vst [vmem:[#allocation45_spill] sm:$0xff] %v12566_v41  ;;  %v12574_v50 = vsel %vm8708_vm15, 4294967295, %v12573_v50  ;;  %vm8714_vm5 = vcmp.lt.s32.totalorder %v12576_v22, 14  ;;  %v8721_v11 = vmax.f32 %v8647_v37, %v2709_v62  ;;  %v8724_v56 = vmax.f32 %v2455_v3, %v8667_v34 }
 0x1c5   : > { %12575 = vst [vmem:[#allocation40_spill] sm:$0xff] %v12574_v50  ;;  %v12578_v20 = vsel %vm8714_vm5, 4294967295, %v12577_v20  ;;  %v12580_v43 = vrot.slane %v8411_v51, 6  ;;  %vm12581_vm13 = vcmp.lt.s32.totalorder %v7195_v45, 2  ;;  %v12582_v9 = vrot.slane %v8380_v48, 6  ;;  %v12723_v50 = vld [vmem:[#allocation20_spill] sm:$0xff] }
 0x1c6   : > { %12579 = vst [vmem:[#allocation36_spill] sm:$0xff] %v12578_v20  ;;  %vm12583_vm1 = vmmov %vm12581_vm13  ;;  %v12584_v28 = vrot.slane %v8411_v51, 7  ;;  %vm12585_vm14 = vcmp.lt.s32.totalorder %v7195_v45, 1  ;;  %v12586_v3 = vrot.slane %v8380_v48, 7  ;;  %v12590_v5 = vrot.slane %v8380_v48, 1 }
 0x1c7   : > { %v8730_v1 = vsel %vm12581_vm13, %v1514_v10, %v12580_v43  ;;  %v1526_v22 = vsel %vm12583_vm1, %v12582_v9, %v1514_v10  ;;  %vm12587_vm12 = vmmov %vm12585_vm14  ;;  %v12588_v10 = vrot.slane %v8411_v51, 1  ;;  %vm12589_vm13 = vcmp.lt.s32.totalorder %v7195_v45, 7 }
 0x1c8   : > { %v1686_v62 = vsel %vm12585_vm14, %v1675_v33, %v12584_v28  ;;  %v1687_v29 = vsel %vm12587_vm12, %v12586_v3, %v1675_v33  ;;  %v1643_v43 = vsel %vm8541_vm7, %v1526_v22, -1e+30  ;;  %vm12591_vm1 = vmmov %vm12589_vm13  ;;  %v12592_v3 = vrot.slane %v8411_v51, 2 }
 0x1c9   : > { %v1804_v63 = vsel %vm8547_vm0, %v1687_v29, -1e+30  ;;  %v1837_v8 = vmax.f32 %v8730_v1, %v1686_v62  ;;  %v1879_v9 = vsel %vm12589_vm13, %v1868_v12, %v12588_v10  ;;  %v1880_v33 = vsel %vm12591_vm1, %v12590_v5, %v1868_v12 }
 0x1ca   : > { %v1836_v28 = vmax.f32 %v1643_v43, %v1804_v63  ;;  %vm12593_vm12 = vcmp.lt.s32.totalorder %v7195_v45, 6  ;;  %v12594_v29 = vrot.slane %v8380_v48, 2  ;;  %vm12596_vm0 = vcmask 15360  }
 0x1cb   : > { %v2040_v22 = vsel %vm12593_vm12, %v2029_v4, %v12592_v3  ;;  %vm12595_vm14 = vmmov %vm12593_vm12  ;;  %6576 = vmatmul.mubr.msk.f32.gmra.mrb[6].mxu1 %vm12596_vm0, %v8321_v13  ;;  %v1996_v63 = vsel %vm8589_vm2, %v1880_v33, -1e+30  ;;  %v12597_v43 = vand.u32 15, %v7195_v45  ;;  %v12598_v10 = vmov 0 }
 0x1cc   : > { %v2041_v1 = vsel %vm12595_vm14, %v12594_v29, %v2029_v4  ;;  %v2190_v5 = vmax.f32 %v1879_v9, %v2040_v22  ;;  %v12602_v3 = vmov 0  ;;  %v12605_v33 = vand.u32 15, %v8067_v26 }
 0x1cd   : > { %v2157_v62 = vsel %vm8595_vm10, %v2041_v1, -1e+30  ;;  %vm8774_vm13 = vcmp.ge.s32.totalorder %v12597_v43, 2  ;;  %v12601_v4 = vmov %v12597_v43  ;;  %v12606_v29 = vmov 0 }
 0x1ce   : > { %v12599_v10 = vsel %vm8774_vm13, 4294967295, %v12598_v10  ;;  %vm8780_vm1 = vcmp.ge.s32.totalorder %v12601_v4, 1  ;;  %vm8786_vm0 = vcmp.lt.s32.totalorder %v12605_v33, 15  ;;  %vm12609_vm12 = vcmask 15360  }
 0x1cf   : > { %12600 = vst [vmem:[#allocation37_spill] sm:$0xff] %v12599_v10  ;;  %v12603_v3 = vsel %vm8780_vm1, 4294967295, %v12602_v3  ;;  %v12607_v29 = vsel %vm8786_vm0, 4294967295, %v12606_v29  ;;  %6578 = vmatprep.mubr.msk.f32.mxu1 %vm12609_vm12, %v8402_v32  ;;  %v8792_v9 = vmax.f32 %v1996_v63, %v2157_v62  ;;  %v12012_v22 = vrot.slane %v8701_v17, 7  ;;  %v12823_v10 = vld [vmem:[#allocation73_spill] sm:$0xff] }
 0x1d0   : > { %12604 = vst [vmem:[#allocation48_spill] sm:$0xff] %v12603_v3  ;;  %12608 = vst [vmem:[#allocation49_spill] sm:$0xff] %v12607_v29  ;;  %v12015_v1 = vrot.slane %v8701_v17, 1  ;;  %v2222_v4 = vmax.f32 %v1836_v28, %v2190_v5  ;;  %v1516_v12 = vrot.slane %v8704_v49, 6  ;;  %v1677_v38 = vrot.slane %v8704_v49, 7  ;;  %6579 = vmatmul.mubr.msk.f32.gmra.mrb[8].mxu1 %vm12609_vm12, %v8380_v48 }
 0x1d1   : > { %v1870_v33 = vrot.slane %v8704_v49, 1  ;;  %v12610_v36 = vand.u32 15, %v8067_v26  ;;  %v12611_v40 = vmov 0  ;;  %v2031_v32 = vrot.slane %v8704_v49, 2 }
 0x1d2   : > { %v8808_v63 = vmul.f32 %v6919_v19, %v8064_v25  ;;  %v717_v62 = vadd.f32 1.0, %v6921_v16  ;;  %v8814_v5 = vmax.f32 %v8663_v54, %v2222_v4  ;;  %v12614_v26 = vrot.slane %v8701_v17, 6 }
 0x1d3   : > { %vm8802_vm14 = vcmp.lt.s32.totalorder %v12610_v36, 14  ;;  %vm12615_vm7 = vcmp.lt.s32.totalorder %v7195_v45, 2  ;;  %v12616_v43 = vrot.slane %v8411_v51, 6  ;;  %vm12618_vm12 = vcmp.lt.s32.totalorder %v7195_v45, 1 }
 0x1d4   : > { %v12612_v40 = vsel %vm8802_vm14, 4294967295, %v12611_v40  ;;  %v8820_v36 = vsel %vm12615_vm7, %v1516_v12, %v12614_v26  ;;  %vm12617_vm10 = vmmov %vm12615_vm7  ;;  %v8830_v16 = vsel %vm12618_vm12, %v1677_v38, %v12012_v22  ;;  %vm12619_vm2 = vcmask 15360  }
 0x1d5   : > { %12613 = vst [vmem:[#allocation24_spill] sm:$0xff] %v12612_v40  ;;  %v1524_v25 = vsel %vm12617_vm10, %v12616_v43, %v1516_v12  ;;  %6581 = vmatprep.mubr.msk.f32.mxu1 %vm12619_vm2, %v8663_v54  ;;  %v12620_v4 = vrot.slane %v8411_v51, 7  ;;  %vm12621_vm7 = vmmov %vm12618_vm12  ;;  %vm12622_vm10 = vcmp.lt.s32.totalorder %v7195_v45, 7  ;;  %v12623_v54 = vrot.slane %v8411_v51, 1  ;;  %v12716_v40 = vld [vmem:[#allocation90_spill] sm:$0xff] }
 0x1d6   : > { %v1645_v19 = vsel %vm8676_vm3, %v1524_v25, -1e+30  ;;  %v1877_v43 = vsel %vm12622_vm10, %v1870_v33, %v12015_v1  ;;  %vm12624_vm2 = vmmov %vm12622_vm10  ;;  %v12625_v22 = vrot.slane %v8701_v17, 2  ;;  %vm12626_vm12 = vcmp.lt.s32.totalorder %v7195_v45, 6 }
 0x1d7   : > { %v1685_v26 = vsel %vm12621_vm7, %v12620_v4, %v1677_v38  ;;  %v1878_v25 = vsel %vm12624_vm2, %v12623_v54, %v1870_v33  ;;  %v12627_v4 = vrot.slane %v8411_v51, 2  ;;  %vm12628_vm7 = vmmov %vm12626_vm12  ;;  %vm12629_vm10 = vcmask 15360  }
 0x1d8   : > { %v1806_v28 = vsel %vm8694_vm4, %v1685_v26, -1e+30  ;;  %v2038_v38 = vsel %vm12626_vm12, %v2031_v32, %v12625_v22  ;;  %v1998_v1 = vsel %vm8708_vm15, %v1878_v25, -1e+30  ;;  %6582 = vmatmul.mubr.msk.f32.gmra.mrb[10].mxu1 %vm12629_vm10, %v8411_v51  ;;  %v1519_v54 = vrot.slane %v8808_v63, 6  ;;  %vm12630_vm2 = vmmov %vm12629_vm10 }
 0x1d9   : > { %v2039_v12 = vsel %vm12628_vm7, %v12627_v4, %v2031_v32  ;;  %v1838_v42 = vmax.f32 %v1645_v19, %v1806_v28  ;;  %v2192_v41 = vmax.f32 %v1877_v43, %v2038_v38  ;;  %v12026_v22 = vrot.slane %v8808_v63, 7  ;;  %6584 = vmatprep.mubr.msk.f32.mxu1 %vm12630_vm2, %v8704_v49  ;;  %v12631_v43 = vld [vmem:[#allocation17_spill] sm:$0xff] }
 0x1da   : > { %v2159_v26 = vsel %vm8714_vm5, %v2039_v12, -1e+30  ;;  %v12025_v46 = vrot.slane %v8808_v63, 1  ;;  %v12020_v28 = vrot.slane %v8808_v63, 2  ;;  %6922 = vrcp.f32 %v717_v62 }
 0x1db   : > { %v2191_v33 = vmax.f32 %v1998_v1, %v2159_v26  ;;  %v2224_v32 = vmax.f32 %v1838_v42, %v2192_v41  ;;  %v12632_v25 = vrot.slane %v12631_v43, 6  ;;  %vm12633_vm12 = vcmp.lt.s32.totalorder %v7195_v45, 2 }
 0x1dc   : > { %v12634_v38 = vrot.slane %v12631_v43, 7  ;;  %vm12635_vm7 = vcmp.lt.s32.totalorder %v7195_v45, 1  ;;  %v12636_v42 = vrot.slane %v12631_v43, 1  ;;  %vm12637_vm10 = vcmp.lt.s32.totalorder %v7195_v45, 7  ;;  %6585 = vmatmul.mubr.msk.f32.gmra.mrb[12].mxu1 %vm12630_vm2, %v8701_v17 }
 0x1dd   : > { %v2223_v12 = vmax.f32 %v1837_v8, %v2191_v33  ;;  %v1552_v1 = vsel %vm12633_vm12, %v1519_v54, %v12632_v25  ;;  %v8892_v62 = vmax.f32 %v8704_v49, %v2224_v32  ;;  %vm12639_vm12 = vcmp.lt.s32.totalorder %v7195_v45, 6 }
 0x1de   : > { %v1713_v41 = vsel %vm12635_vm7, %v12026_v22, %v12634_v38  ;;  %v1906_v8 = vsel %vm12637_vm10, %v12025_v46, %v12636_v42  ;;  %v1617_v4 = vsel %vm8774_vm13, %v1552_v1, -1e+30  ;;  %v12638_v38 = vrot.slane %v12631_v43, 2 }
 0x1df   : > { %v1778_v26 = vsel %vm8780_vm1, %v1713_v41, -1e+30  ;;  %v2002_v33 = vsel %vm8786_vm0, %v1906_v8, -1e+30  ;;  %v8903_v25 = vmax.f32 %v8411_v51, %v2223_v12  ;;  %v8913_v1 = vmax.f32 %v8616_v47, %v8724_v56 }
 0x1e0   : > { %v2067_v49 = vsel %vm12639_vm12, %v12020_v28, %v12638_v38  ;;  %v1810_v32 = vmax.f32 %v1617_v4, %v1778_v26  ;;  %v12640_v51 = vmax.f32 %v8647_v37, %v8616_v47  ;;  %v12641_v42 = vmax.f32 %v8558_v15, %v8634_v59 }
 0x1e1   : > { %v2163_v41 = vsel %vm8802_vm14, %v2067_v49, -1e+30  ;;  %v8929_v4 = vmax.f32 %v8654_v60, %v8672_v31  ;;  %v12642_v26 = vand.u32 15, %v8425_v30  ;;  %v12643_v38 = vmov 0 }
 0x1e2   : > { %v2713_v12 = vmax.f32 %v12640_v51, %v8686_v2  ;;  %v8925_v8 = vmax.f32 %v12531_v52, %v12641_v42  ;;  %v8931_v56 = vmax.f32 %v2002_v33, %v2163_v41  ;;  %v12647_v37 = vmov 0 }
 0x1e3   : > { %vm8935_vm7 = vcmp.ge.s32.totalorder %v12642_v26, 2  ;;  %v12646_v47 = vmov %v12642_v26  ;;  %v12650_v52 = vmax.f32 %v12506_v44, %v12505_v18  ;;  %v12652_v19 = vmov 0 }
 0x1e4   : > { %v12644_v38 = vsel %vm8935_vm7, 4294967295, %v12643_v38  ;;  %vm8941_vm10 = vcmp.ge.s32.totalorder %v12646_v47, 1  ;;  %v8951_v41 = vmax.f32 %v8619_v53, %v2713_v12  ;;  %v12651_v47 = vand.u32 15, %v8371_v61 }
 0x1e5   : > { %12645 = vst [vmem:[#allocation68_spill] sm:$0xff] %v12644_v38  ;;  %v12648_v37 = vsel %vm8941_vm10, 4294967295, %v12647_v37  ;;  %v2196_v49 = vmax.f32 %v1810_v32, %v12650_v52  ;;  %v12656_v44 = vmov 0  ;;  %v2715_v12 = vmax.f32 %v8651_v14, %v8929_v4 }
 0x1e6   : > { %12649 = vst [vmem:[#allocation70_spill] sm:$0xff] %v12648_v37  ;;  %vm8958_vm2 = vcmp.lt.s32.totalorder %v12651_v47, 15  ;;  %v12655_v18 = vmov %v12651_v47  ;;  %v2716_v52 = vmax.f32 %v8603_v58, %v8642_v23  ;;  %v12659_v47 = vld [vmem:[#allocation69_spill] sm:$0xff]  ;;  %v8980_v61 = vmax.f32 %v12550_v35, %v8259_v7 }
 0x1e7   : > { %v12653_v19 = vsel %vm8958_vm2, 4294967295, %v12652_v19  ;;  %vm8964_vm12 = vcmp.lt.s32.totalorder %v12655_v18, 14  ;;  %v2228_v53 = vmax.f32 %v12631_v43, %v2196_v49  ;;  %v8976_v26 = vmax.f32 %v12659_v47, %v8660_v27  ;;  %v6923_v27 = vpop.eup %6922  ;;  %v12715_v47 = vld [vmem:[#allocation89_spill] sm:$0xff] }
 0x1e8   : > { %12654 = vst [vmem:[#allocation58_spill] sm:$0xff] %v12653_v19  ;;  %v12657_v44 = vsel %vm8964_vm12, 4294967295, %v12656_v44  ;;  %v12660_v42 = vmax.f32 %v8558_v15, -1e+30  ;;  %v8990_v33 = vmax.f32 %v8630_v0, %v2715_v12  ;;  %v8993_v51 = vmax.f32 %v12536_v55, %v2716_v52 }
 0x1e9   : > { %12658 = vst [vmem:[#allocation59_spill] sm:$0xff] %v12657_v44  ;;  %v2454_v14 = vmax.f32 %v2228_v53, -1e+30  ;;  %v2456_v30 = vmax.f32 %v2228_v53, %v7624_v6  ;;  %v8997_v28 = vmax.f32 %v8672_v31, %v8976_v26  ;;  %v2718_v18 = vmax.f32 %v8611_v39, %v8980_v61 }
 0x1ea   : > { %v8986_v32 = vmax.f32 %v2228_v53, %v12660_v42  ;;  %v813_v42 = vmul.f32 %v6923_v27, %v8308_v21  ;;  %vm12661_vm14 = vcmask 15360   ;;  %vm12664_vm4 = vcmask 1041408  }
 0x1eb   : > { %v2710_v0 = vmax.f32 %v2454_v14, %v8603_v58  ;;  %v2712_v53 = vmax.f32 %v2456_v30, %v8611_v39  ;;  %vm12662_vm0 = vmmov %vm12661_vm14  ;;  %v2717_v30 = vmax.f32 %v8667_v34, %v8997_v28  ;;  %v12666_v14 = vld [vmem:[#allocation79_spill] sm:$0xff]  ;;  %v12668_v12 = vrot.slane %v8701_v17, 6 }
 0x1ec   : > { %6492 = vmatprep.mubr.msk.f32.mxu0 %vm12661_vm14, %v8986_v32  ;;  %v1518_v27 = vrot.slane %v813_v42, 6  ;;  %v1679_v49 = vrot.slane %v813_v42, 7  ;;  %v1872_v46 = vrot.slane %v813_v42, 1  ;;  %v2033_v22 = vrot.slane %v813_v42, 2  ;;  %vm12663_vm14 = vmmov %vm12662_vm0 }
 0x1ed   : > { %6493 = vmatmul.mubr.msk.f32.vlgmr.msra.gmra.mrb[32].mxu0 %vm12662_vm0, %v8721_v11  ;;  %6587 = vmatprep.mubr.msk.f32.mxu1 %vm12663_vm14, %v813_v42  ;;  %vm12665_vm3 = vmmov %vm12662_vm0  ;;  %v9020_v58 = vmax.f32 %v7624_v6, %v2710_v0  ;;  %v9023_v39 = vmax.f32 %v7719_v24, %v2712_v53  ;;  %v9028_v52 = vmax.f32 %v12666_v14, %v2718_v18  ;;  %vm12667_vm0 = vcmp.lt.s32.totalorder %v7195_v45, 2 }
 0x1ee   : > { %6541 = vmatpush3.msk.msra.mxu0 %vm12664_vm4, %v8505_v57  ;;  %6588 = vmatmul.mubr.msk.f32.gmra.mrb[14].mxu1 %vm12665_vm3, %v8808_v63  ;;  %v1521_v57 = vsel %vm12667_vm0, %v1518_v27, %v1519_v54  ;;  %vm12669_vm3 = vmmov %vm12667_vm0  ;;  %v12670_v0 = vrot.slane %v8808_v63, 7  ;;  %vm12671_vm4 = vcmp.lt.s32.totalorder %v7195_v45, 1  ;;  %v12672_v34 = vrot.slane %v8701_v17, 7 }
 0x1ef   : > { %v1522_v6 = vsel %vm12669_vm3, %v12668_v12, %v1518_v27  ;;  %vm12673_vm14 = vmmov %vm12671_vm4  ;;  %v12674_v21 = vrot.slane %v8808_v63, 1  ;;  %vm12675_vm0 = vcmp.lt.s32.totalorder %v7195_v45, 7  ;;  %vm12676_vm3 = vcmask 15360  }
 0x1f0   : > { %v1682_v24 = vsel %vm12671_vm4, %v1679_v49, %v12670_v0  ;;  %v1683_v18 = vsel %vm12673_vm14, %v12672_v34, %v1679_v49  ;;  %v1647_v53 = vsel %vm8935_vm7, %v1522_v6, -1e+30  ;;  %6495 = vmatprep.mubr.msk.f32.mxu0 %vm12676_vm3, %v9020_v58  ;;  %v12677_v0 = vrot.slane %v8701_v17, 1  ;;  %vm12678_vm4 = vmmov %vm12675_vm0 }
 0x1f1   : > { %v1808_v54 = vsel %vm8941_vm10, %v1683_v18, -1e+30  ;;  %v1841_v14 = vmax.f32 %v1521_v57, %v1682_v24  ;;  %v1875_v12 = vsel %vm12675_vm0, %v1872_v46, %v12674_v21  ;;  %v12679_v6 = vrot.slane %v8808_v63, 2  ;;  %vm12683_vm0 = vmmov %vm12676_vm3 }
 0x1f2   : > { %v1840_v27 = vmax.f32 %v1647_v53, %v1808_v54  ;;  %v1876_v49 = vsel %vm12678_vm4, %v12677_v0, %v1872_v46  ;;  %vm12680_vm14 = vcmp.lt.s32.totalorder %v7195_v45, 6  ;;  %v12681_v57 = vrot.slane %v8701_v17, 2  ;;  %6496 = vmatmul.mubr.msk.f32.gmra.mrb[34].mxu0 %vm12683_vm0, %v8913_v1  ;;  %vm12684_vm3 = vmmov %vm12683_vm0 }
 0x1f3   : > { %v2036_v34 = vsel %vm12680_vm14, %v2033_v22, %v12679_v6  ;;  %vm12682_vm10 = vmmov %vm12680_vm14  ;;  %v2000_v21 = vsel %vm8958_vm2, %v1876_v49, -1e+30  ;;  %v2227_v53 = vmax.f32 %v1841_v14, %v8931_v56  ;;  %6498 = vmatprep.mubr.msk.f32.mxu0 %vm12684_vm3, %v9023_v39  ;;  %v2774_v0 = vrot.slane %v9020_v58, 6 }
 0x1f4   : > { %v2037_v24 = vsel %vm12682_vm10, %v12681_v57, %v2033_v22  ;;  %v2194_v46 = vmax.f32 %v1875_v12, %v2036_v34  ;;  %v12033_v22 = vrot.slane %v9020_v58, 7  ;;  %v2776_v6 = vrot.slane %v9023_v39, 6  ;;  %vm12687_vm10 = vmmov %vm12683_vm0  ;;  %v12702_v34 = vld [vmem:[#allocation29_spill] sm:$0xff] }
 0x1f5   : > { %v2161_v18 = vsel %vm8964_vm12, %v2037_v24, -1e+30  ;;  %v9081_v15 = vmax.f32 %v8808_v63, %v2227_v53  ;;  %v12034_v49 = vrot.slane %v9023_v39, 7  ;;  %v9085_v12 = vmax.f32 %v8654_v60, %v2717_v30  ;;  %vm12688_vm4 = vmmov %vm12683_vm0  ;;  %v12700_v24 = vld [vmem:[#allocation19_spill] sm:$0xff] }
 0x1f6   : > { %v2193_v54 = vmax.f32 %v2000_v21, %v2161_v18  ;;  %v2226_v57 = vmax.f32 %v1840_v27, %v2194_v46  ;;  %v12686_v56 = vmax.f32 %v8820_v36, %v8830_v16  ;;  %6499 = vmatmul.mubr.msk.f32.gmra.mrb[36].mxu0 %vm12687_vm10, %v8951_v41  ;;  %v12689_v30 = vrot.slane %v8913_v1, 6 }
 0x1f7   : > { %12685 = vst [vmem:[#allocation71_spill] sm:$0xff] %v9081_v15  ;;  %6501 = vmatprep.mubr.msk.f32.mxu0 %vm12688_vm4, %v8925_v8  ;;  %vm12690_vm14 = vcmp.lt.s32.totalorder %v7195_v45, 2  ;;  %v12691_v16 = vrot.slane %v8721_v11, 6  ;;  %vm12697_vm3 = vcmp.lt.s32.totalorder %v7195_v45, 1  ;;  %v3000_v27 = vrot.slane %v9023_v39, 1 }
 0x1f8   : > { %v2225_v14 = vmax.f32 %v12686_v56, %v2193_v54  ;;  %v9095_v63 = vmax.f32 %v813_v42, %v2226_v57  ;;  %v2831_v36 = vsel %vm12690_vm14, %v12689_v30, %v2776_v6  ;;  %vm12692_vm0 = vmmov %vm12690_vm14  ;;  %v2868_v57 = vrot.slane %v8986_v32, 7 }
 0x1f9   : > { %v2833_v21 = vsel %vm12692_vm0, %v12691_v16, %v2774_v0  ;;  %v2840_v54 = vsel %vm7408_vm9, %v2831_v36, -1e+30  ;;  %v12696_v56 = vrot.slane %v8913_v1, 7  ;;  %vm12699_vm10 = vmmov %vm12697_vm3  ;;  %v2998_v36 = vrot.slane %v9020_v58, 1 }
 0x1fa   : > { %v9109_v18 = vmax.f32 %v8701_v17, %v2225_v14  ;;  %v2838_v46 = vsel %vm7345_vm6, %v2833_v21, -1e+30  ;;  %v12698_v17 = vrot.slane %v8721_v11, 7  ;;  %6502 = vmatmul.mubr.msk.f32.gmra.mrb[38].mxu0 %vm12688_vm4, %v8990_v33  ;;  %vm12701_vm14 = vnez %v12700_v24 }
 0x1fb   : > { %v2927_v30 = vsel %vm12697_vm3, %v12696_v56, %v12034_v49  ;;  %vm12703_vm0 = vnez %v12702_v34  ;;  %vm12704_vm3 = vmmov %vm12688_vm4  ;;  %v12705_v49 = vrot.slane %v8913_v1, 1  ;;  %v12707_v16 = vrot.slane %v8721_v11, 1 }
 0x1fc   : > { %12693 = vst [vmem:[#allocation78_spill] sm:$0xff] %v9109_v18  ;;  %v2929_v14 = vsel %vm12699_vm10, %v12698_v17, %v12033_v22  ;;  %v9132_v21 = vmax.f32 %v8903_v25, %v9109_v18  ;;  %v2936_v60 = vsel %vm12703_vm0, %v2927_v30, -1e+30  ;;  %6504 = vmatprep.mubr.msk.f32.mxu0 %vm12704_vm3, %v8993_v51  ;;  %vm12706_vm10 = vcmp.lt.s32.totalorder %v7195_v45, 7 }
 0x1fd   : > { %v2934_v56 = vsel %vm12701_vm14, %v2929_v14, -1e+30  ;;  %v2968_v22 = vmax.f32 %v2840_v54, %v2936_v60  ;;  %v3056_v55 = vsel %vm12706_vm10, %v2998_v36, %v12705_v49  ;;  %v12708_v24 = vrot.slane %v8986_v32, 1  ;;  %vm12709_vm4 = vmmov %vm12706_vm10 }
 0x1fe   : > { %v2966_v17 = vmax.f32 %v2838_v46, %v2934_v56  ;;  %v2739_v30 = vmax.f32 %v9132_v21, -1e+30  ;;  %v12710_v34 = vrot.slane %v8951_v41, 1  ;;  %vm12711_vm3 = vmmov %vm12709_vm4  ;;  %v12049_v60 = vrot.slane %v8986_v32, 2 }
 0x1ff   : > { %v3058_v14 = vsel %vm12709_vm4, %v12708_v24, %v12707_v16  ;;  %v3093_v54 = vrot.slane %v8721_v11, 2  ;;  %v3094_v49 = vrot.slane %v9020_v58, 2  ;;  %v3095_v56 = vrot.slane %v8913_v1, 2  ;;  %v12714_v16 = vld [vmem:[#allocation101_spill] sm:$0xff] }
 0x200   : > { %v3054_v46 = vsel %vm12711_vm3, %v3000_v27, %v12710_v34  ;;  %v3096_v53 = vrot.slane %v9023_v39, 2  ;;  %v3097_v42 = vrot.slane %v8951_v41, 2  ;;  %v9165_v24 = vmax.f32 %v9081_v15, %v2739_v30 }
 0x201   : > { %vm12712_vm10 = vcmask 15360   ;;  %vm12713_vm4 = vcmp.lt.s32.totalorder %v7195_v45, 6  ;;  %v12717_v29 = vmax.f32 %v12715_v47, %v12716_v40  ;;  %v2777_v38 = vrot.slane %v8951_v41, 6 }
 0x202   : > { %6505 = vmatmul.mubr.msk.f32.gmra.mrb[40].mxu0 %vm12712_vm10, %v9085_v12  ;;  %v3154_v34 = vsel %vm12713_vm4, %v12049_v60, %v3093_v54  ;;  %vm12718_vm3 = vmmov %vm12712_vm10  ;;  %v12721_v20 = vrot.slane %v8913_v1, 6  ;;  %v12057_v40 = vrot.slane %v9165_v24, 6  ;;  %v12725_v15 = vrot.slane %v8721_v11, 6 }
 0x203   : > { %v2211_v37 = vmax.f32 %v12717_v29, %v12714_v16  ;;  %6507 = vmatprep.mubr.msk.f32.mxu0 %vm12718_vm3, %v9028_v52  ;;  %vm12719_vm0 = vmmov %vm12713_vm4  ;;  %v3188_v19 = vmax.f32 %v3058_v14, %v3154_v34  ;;  %vm12722_vm4 = vcmp.lt.s32.totalorder %v7195_v45, 2  ;;  %v12058_v29 = vrot.slane %v9165_v24, 7 }
 0x204   : > { %v3150_v30 = vsel %vm12719_vm0, %v3096_v53, %v3097_v42  ;;  %vm12720_vm10 = vmmov %vm12719_vm0  ;;  %v2832_v60 = vsel %vm12722_vm4, %v2774_v0, %v12721_v20  ;;  %v12726_v14 = vrot.slane %v8986_v32, 6  ;;  %v2873_v20 = vrot.slane %v8951_v41, 7 }
 0x205   : > { %v3152_v44 = vsel %vm12720_vm10, %v3094_v49, %v3095_v56  ;;  %v3192_v16 = vmax.f32 %v3054_v46, %v3150_v30  ;;  %v9191_v43 = vmax.f32 %v12723_v50, %v2211_v37  ;;  %vm12724_vm0 = vmmov %vm12722_vm4  ;;  %vm12730_vm4 = vcmp.lt.s32.totalorder %v7195_v45, 1  ;;  %v12825_v50 = vld [vmem:[#allocation115_spill] sm:$0xff] }
 0x206   : > { %v3190_v47 = vmax.f32 %v3056_v55, %v3152_v44  ;;  %v2830_v18 = vsel %vm12724_vm0, %v2776_v6, %v2777_v38  ;;  %vm12727_vm3 = vmmov %vm12724_vm0  ;;  %v12728_v0 = vmov %v12726_v14  ;;  %v2931_v44 = vsel %vm12730_vm4, %v12058_v29, %v2868_v57 }
 0x207   : > { %v2834_v34 = vsel %vm12727_vm3, %v12726_v14, %v12725_v15  ;;  %vm12729_vm10 = vmmov %vm12724_vm0  ;;  %v3224_v6 = vmax.f32 %v2968_v22, %v3192_v16  ;;  %v2932_v15 = vsel %vm8780_vm1, %v2931_v44, -1e+30  ;;  %v9218_v30 = vmax.f32 %v8976_v26, %v9191_v43 }
 0x208   : > { %v2835_v37 = vsel %vm12729_vm10, %v12057_v40, %v12728_v0  ;;  %v3222_v55 = vmax.f32 %v2966_v17, %v3190_v47  ;;  %v12731_v14 = vrot.slane %v9023_v39, 7  ;;  %vm12732_vm0 = vmmov %vm12730_vm4  ;;  %v12733_v17 = vrot.slane %v8913_v1, 7 }
 0x209   : > { %v2836_v46 = vsel %vm8774_vm13, %v2835_v37, -1e+30  ;;  %v9228_v22 = vmax.f32 %v9023_v39, %v3224_v6  ;;  %v12734_v47 = vrot.slane %v9020_v58, 7  ;;  %vm12735_vm3 = vmmov %vm12732_vm0  ;;  %v2719_v37 = vmax.f32 %v8686_v2, %v9218_v30 }
 0x20a   : > { %v2926_v0 = vsel %vm12732_vm0, %v12731_v14, %v2873_v20  ;;  %v2964_v40 = vmax.f32 %v2836_v46, %v2932_v15  ;;  %v9225_v29 = vmax.f32 %v9020_v58, %v3222_v55  ;;  %v12736_v44 = vrot.slane %v8721_v11, 7  ;;  %vm12737_vm10 = vmmov %vm12732_vm0 }
 0x20b   : > { %v2928_v16 = vsel %vm12735_vm3, %v12734_v47, %v12733_v17  ;;  %v2969_v15 = vmax.f32 %v2830_v18, %v2926_v0  ;;  %v12738_v58 = vrot.slane %v8925_v8, 1  ;;  %v12739_v17 = vrot.slane %v8951_v41, 1 }
 0x20c   : > { %v2930_v46 = vsel %vm12737_vm10, %v2868_v57, %v12736_v44  ;;  %v2967_v55 = vmax.f32 %v2832_v60, %v2928_v16  ;;  %v3220_v14 = vmax.f32 %v2964_v40, %v3188_v19  ;;  %v9244_v39 = vmax.f32 %v9225_v29, %v9228_v22  ;;  %v12745_v40 = vld [vmem:[#allocation50_spill] sm:$0xff]  ;;  %v12748_v44 = vld [vmem:[#allocation41_spill] sm:$0xff] }
 0x20d   : > { %v2965_v6 = vmax.f32 %v2834_v34, %v2930_v46  ;;  %vm12740_vm4 = vcmp.lt.s32.totalorder %v7195_v45, 7  ;;  %v9253_v47 = vmax.f32 %v8672_v31, %v2719_v37  ;;  %v12741_v57 = vrot.slane %v8913_v1, 1 }
 0x20e   : > { %v3053_v2 = vsel %vm12740_vm4, %v12739_v17, %v12738_v58  ;;  %vm12742_vm0 = vmmov %vm12740_vm4  ;;  %v12743_v18 = vrot.slane %v8721_v11, 1  ;;  %vm12746_vm10 = vnez %v12745_v40  ;;  %v9266_v0 = vmax.f32 %v8986_v32, %v3220_v14  ;;  %v12755_v17 = vld [vmem:[#allocation103_spill] sm:$0xff] }
 0x20f   : > { %v3055_v19 = vsel %vm12742_vm0, %v12741_v57, %v3000_v27  ;;  %vm12744_vm3 = vmmov %vm12742_vm0  ;;  %v3065_v34 = vsel %vm12746_vm10, %v3053_v2, -1e+30  ;;  %v3476_v16 = vmax.f32 %v9244_v39, -1e+30  ;;  %vm12749_vm4 = vnez %v12748_v44 }
 0x210   : > { %v3057_v60 = vsel %vm12744_vm3, %v12743_v18, %v2998_v36  ;;  %v3063_v46 = vsel %vm12749_vm4, %v3055_v19, -1e+30  ;;  %vm12750_vm0 = vcmask 15360   ;;  %v12751_v27 = vrot.slane %v8925_v8, 2 }
 0x211   : > { %v3061_v37 = vsel %vm7390_vm8, %v3057_v60, -1e+30  ;;  %6508 = vmatmul.mubr.msk.f32.gmra.mrb[42].mxu0 %vm12750_vm0, %v9253_v47  ;;  %vm12752_vm3 = vcmp.lt.s32.totalorder %v7195_v45, 6  ;;  %v9285_v2 = vmax.f32 %v8259_v7, %v12755_v17  ;;  %v9288_v57 = vmax.f32 %v9266_v0, %v3476_v16  ;;  %v12758_v60 = vld [vmem:[#allocation42_spill] sm:$0xff] }
 0x212   : > { %v3149_v36 = vsel %vm12752_vm3, %v3097_v42, %v12751_v27  ;;  %vm12753_vm10 = vmmov %vm12752_vm3  ;;  %vm12759_vm0 = vnez %v12758_v60  ;;  %v12760_v42 = vld [vmem:[#allocation51_spill] sm:$0xff]  ;;  %v3005_v60 = vrot.slane %v9085_v12, 1  ;;  %v12817_v31 = vrot.slane %v9028_v52, 1 }
 0x213   : > { %v3151_v14 = vsel %vm12753_vm10, %v3095_v56, %v3096_v53  ;;  %vm12754_vm14 = vmmov %vm12752_vm3  ;;  %12756 = vst [vmem:[#allocation62_spill] sm:$0xff] %v9288_v57  ;;  %vm12761_vm3 = vnez %v12760_v42  ;;  %vm12764_vm10 = vcmp.lt.s32.totalorder %v7195_v45, 2  ;;  %v12769_v42 = vld [vmem:[#allocation44_spill] sm:$0xff] }
 0x214   : > { %v3153_v58 = vsel %vm12754_vm14, %v3093_v54, %v3094_v49  ;;  %v3159_v40 = vsel %vm12759_vm0, %v3151_v14, -1e+30  ;;  %v3161_v27 = vsel %vm12761_vm3, %v3149_v36, -1e+30  ;;  %v2720_v54 = vmax.f32 %v8634_v59, %v9285_v2 }
 0x215   : > { %v3157_v18 = vsel %vm7423_vm11, %v3153_v58, -1e+30  ;;  %v3191_v56 = vmax.f32 %v3063_v46, %v3159_v40  ;;  %v3193_v44 = vmax.f32 %v3065_v34, %v3161_v27  ;;  %vm12762_vm14 = vcmask 15360  }
 0x216   : > { %v3189_v53 = vmax.f32 %v3061_v37, %v3157_v18  ;;  %6592 = vmatprep.mubr.msk.f32.mxu1 %vm12762_vm14, %v9288_v57  ;;  %v12763_v49 = vrot.slane %v8925_v8, 6  ;;  %v12765_v58 = vrot.slane %v8925_v8, 7  ;;  %vm12766_vm0 = vcmp.lt.s32.totalorder %v7195_v45, 1  ;;  %v12767_v18 = vld [vmem:[#allocation43_spill] sm:$0xff] }
 0x217   : > { %v3003_v37 = vrot.slane %v8990_v33, 1  ;;  %v3099_v40 = vrot.slane %v8990_v33, 2  ;;  %v3223_v46 = vmax.f32 %v2967_v55, %v3191_v56  ;;  %v3225_v59 = vmax.f32 %v2969_v15, %v3193_v44  ;;  %v12784_v56 = vld [vmem:[#allocation88_spill] sm:$0xff] }
 0x218   : > { %v2829_v16 = vsel %vm12764_vm10, %v2777_v38, %v12763_v49  ;;  %v2925_v14 = vsel %vm12766_vm0, %v2873_v20, %v12765_v58  ;;  %v3221_v34 = vmax.f32 %v2965_v6, %v3189_v53  ;;  %v9311_v36 = vmax.f32 %v12550_v35, %v2720_v54 }
 0x219   : > { %vm12768_vm14 = vnez %v12767_v18  ;;  %vm12770_vm10 = vnez %v12769_v42  ;;  %v12771_v49 = vrot.slane %v8925_v8, 1  ;;  %vm12772_vm0 = vcmp.lt.s32.totalorder %v7195_v45, 7 }
 0x21a   : > { %v2842_v27 = vsel %vm12768_vm14, %v2829_v16, -1e+30  ;;  %v2938_v38 = vsel %vm12770_vm10, %v2925_v14, -1e+30  ;;  %v12773_v58 = vrot.slane %v8925_v8, 2  ;;  %vm12774_vm3 = vcmp.lt.s32.totalorder %v7195_v45, 6 }
 0x21b   : > { %v3052_v20 = vsel %vm12772_vm0, %v12771_v49, %v3003_v37  ;;  %v9326_v15 = vmax.f32 %v8721_v11, %v3221_v34  ;;  %v9329_v35 = vmax.f32 %v8913_v1, %v3223_v46  ;;  %v9332_v6 = vmax.f32 %v8951_v41, %v3225_v59  ;;  %v12776_v14 = vld [vmem:[#allocation104_spill] sm:$0xff]  ;;  %v12777_v34 = vld [vmem:[#allocation95_spill] sm:$0xff] }
 0x21c   : > { %v3148_v55 = vsel %vm12774_vm3, %v12773_v58, %v3099_v40  ;;  %vm12775_vm10 = vcmask 15360   ;;  %v2970_v16 = vmax.f32 %v2842_v27, %v2938_v38  ;;  %v3350_v41 = vmax.f32 %v9266_v0, -1e+30  ;;  %v12778_v46 = vld [vmem:[#allocation96_spill] sm:$0xff]  ;;  %vm12781_vm3 = vmmov %vm12772_vm0 }
 0x21d   : > { %6510 = vmatprep.mubr.msk.f32.mxu0 %vm12775_vm10, %v9311_v36  ;;  %v9342_v11 = vmax.f32 %v9329_v35, %v9332_v6  ;;  %v3194_v1 = vmax.f32 %v3052_v20, %v3148_v55  ;;  %v12779_v59 = vmax.f32 %v12777_v34, %v12778_v46  ;;  %v2779_v58 = vrot.slane %v8990_v33, 6 }
 0x21e   : > { %v2875_v53 = vrot.slane %v8990_v33, 7  ;;  %v12780_v44 = vrot.slane %v8993_v51, 1  ;;  %v12782_v38 = vrot.slane %v8993_v51, 2  ;;  %vm12783_vm10 = vcmp.lt.s32.totalorder %v7195_v45, 6 }
 0x21f   : > { %v2213_v49 = vmax.f32 %v12779_v59, %v12776_v14  ;;  %v3477_v55 = vmax.f32 %v9342_v11, -1e+30  ;;  %v3226_v54 = vmax.f32 %v2970_v16, %v3194_v1  ;;  %v12785_v14 = vld [vmem:[#allocation56_spill] sm:$0xff]  ;;  %v12787_v59 = vrot.slane %v8925_v8, 6 }
 0x220   : > { %v3051_v27 = vsel %vm12781_vm3, %v3003_v37, %v12780_v44  ;;  %v3147_v20 = vsel %vm12783_vm10, %v3099_v40, %v12782_v38  ;;  %vm12786_vm0 = vnez %v12785_v14  ;;  %vm12788_vm14 = vcmp.lt.s32.totalorder %v7195_v45, 2  ;;  %v12791_v40 = vld [vmem:[#allocation57_spill] sm:$0xff] }
 0x221   : > { %v9361_v34 = vmax.f32 %v12784_v56, %v2213_v49  ;;  %v3067_v46 = vsel %vm12786_vm0, %v3051_v27, -1e+30  ;;  %v2828_v42 = vsel %vm12788_vm14, %v12787_v59, %v2779_v58  ;;  %v12789_v37 = vrot.slane %v8925_v8, 7  ;;  %v12793_v14 = vld [vmem:[#allocation105_spill] sm:$0xff] }
 0x222   : > { %vm12790_vm3 = vcmp.lt.s32.totalorder %v7195_v45, 1  ;;  %vm12792_vm10 = vnez %v12791_v40  ;;  %v3351_v16 = vmax.f32 %v9326_v15, -1e+30  ;;  %v9377_v56 = vmax.f32 %v9326_v15, %v3477_v55 }
 0x223   : > { %v2924_v44 = vsel %vm12790_vm3, %v12789_v37, %v2875_v53  ;;  %v3163_v38 = vsel %vm12792_vm10, %v3147_v20, -1e+30  ;;  %v9380_v1 = vmax.f32 %v8925_v8, %v3226_v54  ;;  %v9384_v49 = vmax.f32 %v9191_v43, %v9361_v34 }
 0x224   : > { %v2971_v27 = vmax.f32 %v2828_v42, %v2924_v44  ;;  %v3195_v59 = vmax.f32 %v3067_v46, %v3163_v38  ;;  %v9388_v37 = vmax.f32 %v12755_v17, %v12793_v14  ;;  %v12794_v20 = vrot.slane %v8993_v51, 6  ;;  %v12797_v46 = vld [vmem:[#allocation53_spill] sm:$0xff]  ;;  %v12799_v38 = vld [vmem:[#allocation54_spill] sm:$0xff] }
 0x225   : > { %v12795_v55 = vrot.slane %v8993_v51, 7  ;;  %vm12796_vm10 = vcmask 15360   ;;  %v9402_v42 = vmax.f32 %v9228_v22, %v9380_v1  ;;  %v2721_v54 = vmax.f32 %v8929_v4, %v9384_v49 }
 0x226   : > { %v2827_v40 = vsel %vm12788_vm14, %v2779_v58, %v12794_v20  ;;  %6593 = vmatmul.mubr.msk.f32.vlgmr.msra.gmra.mrb[16].mxu1 %vm12796_vm10, %v9377_v56  ;;  %vm12798_vm0 = vnez %v12797_v46  ;;  %vm12800_vm14 = vnez %v12799_v38  ;;  %v12801_v20 = vld [vmem:[#allocation34_spill] sm:$0xff]  ;;  %vm12802_vm11 = vcmask 1041408  }
 0x227   : > { %v2923_v8 = vsel %vm12790_vm3, %v2875_v53, %v12795_v55  ;;  %v2844_v44 = vsel %vm12798_vm0, %v2827_v40, -1e+30  ;;  %6641 = vmatpush3.msk.msra.mxu1 %vm12802_vm11, %v12801_v20  ;;  %v3227_v53 = vmax.f32 %v2971_v27, %v3195_v59  ;;  %v2722_v55 = vmax.f32 %v8642_v23, %v9388_v37 }
 0x228   : > { %v2940_v58 = vsel %vm12800_vm14, %v2923_v8, -1e+30  ;;  %v3478_v19 = vmax.f32 %v3350_v41, %v9402_v42  ;;  %v9417_v4 = vmax.f32 %v8976_v26, %v2721_v54  ;;  %v3101_v40 = vrot.slane %v9085_v12, 2  ;;  %v12805_v41 = vld [vmem:[#allocation110_spill] sm:$0xff]  ;;  %v12807_v26 = vld [vmem:[#allocation100_spill] sm:$0xff] }
 0x229   : > { %v2972_v18 = vmax.f32 %v2844_v44, %v2940_v58  ;;  %v3352_v8 = vmax.f32 %v9266_v0, %v9225_v29  ;;  %v9423_v38 = vmax.f32 %v8990_v33, %v3227_v53  ;;  %v9426_v27 = vmax.f32 %v8259_v7, %v2722_v55  ;;  %v12806_v44 = vld [vmem:[#allocation98_spill] sm:$0xff] }
 0x22a   : > { %v12803_v23 = vrot.slane %v8993_v51, 1  ;;  %vm12804_vm11 = vcmp.lt.s32.totalorder %v7195_v45, 7  ;;  %v12808_v54 = vmax.f32 %v12806_v44, %v12807_v26  ;;  %v9437_v20 = vmax.f32 %v9225_v29, %v3478_v19  ;;  %6511 = vmatmul.mubr.msk.f32.gmra.mrb[44].mxu0 %vm12796_vm10, %v9417_v4  ;;  %v12812_v26 = vld [vmem:[#allocation93_spill] sm:$0xff] }
 0x22b   : > { %v12809_v33 = vrot.slane %v8993_v51, 2  ;;  %vm12810_vm3 = vcmp.lt.s32.totalorder %v7195_v45, 6  ;;  %v2781_v0 = vrot.slane %v9085_v12, 6  ;;  %v2877_v53 = vrot.slane %v9085_v12, 7 }
 0x22c   : > { %v3050_v59 = vsel %vm12804_vm11, %v12803_v23, %v3005_v60  ;;  %v2215_v58 = vmax.f32 %v12808_v54, %v12805_v41  ;;  %v9449_v55 = vmax.f32 %v9332_v6, %v9423_v38  ;;  %vm12811_vm11 = vmmov %vm12796_vm10  ;;  %6595 = vmatprep.mubr.msk.f32.mxu1 %vm12796_vm10, %v9437_v20  ;;  %v12815_v19 = vrot.slane %v8993_v51, 7  ;;  %v12821_v41 = vld [vmem:[#allocation72_spill] sm:$0xff] }
 0x22d   : > { %v3146_v7 = vsel %vm12810_vm3, %v12809_v33, %v3101_v40  ;;  %6513 = vmatprep.mubr.msk.f32.mxu0 %vm12811_vm11, %v9426_v27  ;;  %v12813_v33 = vrot.slane %v8993_v51, 6  ;;  %vm12814_vm3 = vcmp.lt.s32.totalorder %v7195_v45, 2  ;;  %vm12816_vm11 = vcmp.lt.s32.totalorder %v7195_v45, 1 }
 0x22e   : > { %v3196_v44 = vmax.f32 %v3050_v59, %v3146_v7  ;;  %v9460_v54 = vmax.f32 %v12812_v26, %v2215_v58  ;;  %v3479_v29 = vmax.f32 %v3351_v16, %v9449_v55  ;;  %v2922_v46 = vsel %vm12816_vm11, %v12815_v19, %v2877_v53 }
 0x22f   : > { %v2826_v23 = vsel %vm12814_vm3, %v12813_v33, %v2781_v0  ;;  %vm12818_vm10 = vcmp.lt.s32.totalorder %v7195_v45, 7  ;;  %v12819_v58 = vrot.slane %v9028_v52, 2  ;;  %vm12820_vm14 = vcmp.lt.s32.totalorder %v7195_v45, 6 }
 0x230   : > { %v3049_v59 = vsel %vm12818_vm10, %v3005_v60, %v12817_v31  ;;  %v3228_v26 = vmax.f32 %v2972_v18, %v3196_v44  ;;  %v9481_v33 = vmax.f32 %v9361_v34, %v9460_v54  ;;  %v2973_v16 = vmax.f32 %v2826_v23, %v2922_v46 }
 0x231   : > { %v3145_v7 = vsel %vm12820_vm14, %v3101_v40, %v12819_v58  ;;  %vm12822_vm3 = vnez %v12821_v41  ;;  %v9486_v19 = vmax.f32 %v9329_v35, %v3479_v29  ;;  %vm12824_vm11 = vnez %v12823_v10  ;;  %v12857_v10 = vld [vmem:[#allocation31_spill] sm:$0xff] }
 0x232   : > { %v3069_v3 = vsel %vm12822_vm3, %v3049_v59, -1e+30  ;;  %v3165_v31 = vsel %vm12824_vm11, %v3145_v7, -1e+30  ;;  %v3353_v60 = vmax.f32 %v9326_v15, %v9329_v35  ;;  %v9494_v18 = vmax.f32 %v12793_v14, %v12825_v50  ;;  %v12829_v35 = vld [vmem:[#allocation60_spill] sm:$0xff]  ;;  %v12859_v41 = vld [vmem:[#allocation119_spill] sm:$0xff] }
 0x233   : > { %v9497_v40 = vmax.f32 %v8993_v51, %v3228_v26  ;;  %v2723_v46 = vmax.f32 %v8997_v28, %v9481_v33  ;;  %v3197_v23 = vmax.f32 %v3069_v3, %v3165_v31  ;;  %v12826_v29 = vrot.slane %v9028_v52, 6  ;;  %v12833_v26 = vld [vmem:[#allocation61_spill] sm:$0xff] }
 0x234   : > { %vm12827_vm14 = vcmp.lt.s32.totalorder %v7195_v45, 2  ;;  %vm12828_vm10 = vcmask 15360   ;;  %v2724_v15 = vmax.f32 %v8980_v61, %v9494_v18  ;;  %vm12830_vm11 = vnez %v12829_v35 }
 0x235   : > { %v2825_v44 = vsel %vm12827_vm14, %v2781_v0, %v12826_v29  ;;  %6596 = vmatmul.mubr.msk.f32.gmra.mrb[18].mxu1 %vm12828_vm10, %v9486_v19  ;;  %v12831_v51 = vrot.slane %v9028_v52, 7  ;;  %vm12832_vm3 = vcmp.lt.s32.totalorder %v7195_v45, 1  ;;  %v3007_v3 = vrot.slane %v9253_v47, 1 }
 0x236   : > { %v2846_v59 = vsel %vm12830_vm11, %v2825_v44, -1e+30  ;;  %v9518_v58 = vmax.f32 %v9380_v1, %v9497_v40  ;;  %v9521_v0 = vmax.f32 %v9191_v43, %v2723_v46  ;;  %v3229_v7 = vmax.f32 %v2973_v16, %v3197_v23  ;;  %v12837_v16 = vld [vmem:[#allocation116_spill] sm:$0xff]  ;;  %v12838_v46 = vld [vmem:[#allocation107_spill] sm:$0xff] }
 0x237   : > { %v2921_v28 = vsel %vm12832_vm3, %v2877_v53, %v12831_v51  ;;  %vm12834_vm14 = vnez %v12833_v26  ;;  %v9526_v31 = vmax.f32 %v12755_v17, %v2724_v15  ;;  %v12835_v44 = vrot.slane %v9028_v52, 1  ;;  %v12839_v17 = vld [vmem:[#allocation108_spill] sm:$0xff] }
 0x238   : > { %v2942_v61 = vsel %vm12834_vm14, %v2921_v28, -1e+30  ;;  %vm12836_vm3 = vcmp.lt.s32.totalorder %v7195_v45, 7  ;;  %v3103_v51 = vrot.slane %v9253_v47, 2  ;;  %v3480_v35 = vmax.f32 %v3352_v8, %v9518_v58  ;;  %6514 = vmatmul.mubr.msk.f32.gmra.mrb[46].mxu0 %vm12828_vm10, %v9521_v0 }
 0x239   : > { %v2974_v29 = vmax.f32 %v2846_v59, %v2942_v61  ;;  %v3048_v53 = vsel %vm12836_vm3, %v12835_v44, %v3007_v3  ;;  %v9537_v43 = vmax.f32 %v9085_v12, %v3229_v7  ;;  %v12840_v23 = vmax.f32 %v12838_v46, %v12839_v17  ;;  %vm12841_vm3 = vmmov %vm12828_vm10  ;;  %v12845_v17 = vld [vmem:[#allocation102_spill] sm:$0xff] }
 0x23a   : > { %v2783_v59 = vrot.slane %v9253_v47, 6  ;;  %6516 = vmatprep.mubr.msk.f32.mxu0 %vm12841_vm3, %v9526_v31  ;;  %v9551_v12 = vmax.f32 %v9228_v22, %v3480_v35  ;;  %vm12844_vm10 = vcmp.lt.s32.totalorder %v7195_v45, 6  ;;  %v12846_v28 = vrot.slane %v9028_v52, 6 }
 0x23b   : > { %v2217_v15 = vmax.f32 %v12840_v23, %v12837_v16  ;;  %v9555_v7 = vmax.f32 %v9423_v38, %v9537_v43  ;;  %v12843_v16 = vrot.slane %v9028_v52, 2  ;;  %vm12847_vm3 = vcmp.lt.s32.totalorder %v7195_v45, 2 }
 0x23c   : > { %12842 = vst [vmem:[#allocation63_spill] sm:$0xff] %v9551_v12  ;;  %v2824_v8 = vsel %vm12847_vm3, %v12846_v28, %v2783_v59  ;;  %v2879_v22 = vrot.slane %v9253_v47, 7  ;;  %v12848_v35 = vrot.slane %v9311_v36, 1  ;;  %vm12849_vm14 = vcmp.lt.s32.totalorder %v7195_v45, 7 }
 0x23d   : > { %v3144_v46 = vsel %vm12844_vm10, %v12843_v16, %v3103_v51  ;;  %v9562_v23 = vmax.f32 %v12845_v17, %v2217_v15  ;;  %vm12850_vm11 = vcmask 15360   ;;  %v3481_v16 = vmax.f32 %v3353_v60, %v9555_v7  ;;  %v12851_v15 = vld [vmem:[#allocation2_spill] sm:$0xff] }
 0x23e   : > { %v3198_v61 = vmax.f32 %v3048_v53, %v3144_v46  ;;  %v3047_v44 = vsel %vm12849_vm14, %v3007_v3, %v12848_v35  ;;  %6598 = vmatprep.mubr.msk.f32.mxu1 %vm12850_vm11, %v9551_v12  ;;  %vm12852_vm10 = vnez %v12851_v15  ;;  %v12853_v28 = vrot.slane %v9311_v36, 2 }
 0x23f   : > { %v9578_v53 = vmax.f32 %v9460_v54, %v9562_v23  ;;  %v3071_v46 = vsel %vm12852_vm10, %v3047_v44, -1e+30  ;;  %vm12854_vm3 = vcmp.lt.s32.totalorder %v7195_v45, 6  ;;  %v12855_v3 = vrot.slane %v9028_v52, 7 }
 0x240   : > { %v3143_v17 = vsel %vm12854_vm3, %v3103_v51, %v12853_v28  ;;  %v3230_v26 = vmax.f32 %v2974_v29, %v3198_v61  ;;  %vm12856_vm14 = vcmp.lt.s32.totalorder %v7195_v45, 1  ;;  %vm12858_vm11 = vnez %v12857_v10 }
 0x241   : > { %v2920_v35 = vsel %vm12856_vm14, %v12855_v3, %v2879_v22  ;;  %v3167_v60 = vsel %vm12858_vm11, %v3143_v17, -1e+30  ;;  %v9594_v12 = vmax.f32 %v12825_v50, %v12859_v41  ;;  %v9597_v44 = vmax.f32 %v9332_v6, %v3481_v16 }
 0x242   : > { %v2725_v15 = vmax.f32 %v9218_v30, %v9578_v53  ;;  %v2975_v51 = vmax.f32 %v2824_v8, %v2920_v35  ;;  %v3199_v29 = vmax.f32 %v3071_v46, %v3167_v60  ;;  %v9602_v61 = vmax.f32 %v9028_v52, %v3230_v26  ;;  %v12864_v26 = vld [vmem:[#allocation66_spill] sm:$0xff]  ;;  %v12866_v8 = vld [vmem:[#allocation67_spill] sm:$0xff]  ;;  %v12868_v35 = vld [vmem:[#allocation120_spill] sm:$0xff] }
 0x243   : > { %v2726_v28 = vmax.f32 %v9285_v2, %v9594_v12  ;;  %v12860_v17 = vrot.slane %v9311_v36, 6  ;;  %vm12861_vm3 = vcmp.lt.s32.totalorder %v7195_v45, 2  ;;  %v12862_v10 = vrot.slane %v9311_v36, 7  ;;  %v12869_v60 = vld [vmem:[#allocation113_spill] sm:$0xff] }
 0x244   : > { %vm12863_vm11 = vcmask 15360   ;;  %v9617_v30 = vmax.f32 %v9361_v34, %v2725_v15  ;;  %v3231_v52 = vmax.f32 %v2975_v51, %v3199_v29  ;;  %vm12865_vm10 = vnez %v12864_v26  ;;  %v12870_v51 = vld [vmem:[#allocation114_spill] sm:$0xff] }
 0x245   : > { %v2823_v3 = vsel %vm12861_vm3, %v2783_v59, %v12860_v17  ;;  %v2919_v6 = vsel %vm12856_vm14, %v2879_v22, %v12862_v10  ;;  %6599 = vmatmul.mubr.msk.f32.gmra.mrb[20].mxu1 %vm12863_vm11, %v9597_v44  ;;  %vm12867_vm0 = vnez %v12866_v8  ;;  %v9625_v59 = vmax.f32 %v9497_v40, %v9602_v61  ;;  %vm12872_vm3 = vmmov %vm12863_vm11 }
 0x246   : > { %v2848_v2 = vsel %vm12865_vm10, %v2823_v3, -1e+30  ;;  %v2944_v16 = vsel %vm12867_vm0, %v2919_v6, -1e+30  ;;  %v9628_v46 = vmax.f32 %v12793_v14, %v2726_v28  ;;  %v3009_v22 = vrot.slane %v9417_v4, 1  ;;  %6517 = vmatmul.mubr.msk.f32.gmra.mrb[48].mxu0 %vm12863_vm11, %v9617_v30 }
 0x247   : > { %v2976_v10 = vmax.f32 %v2848_v2, %v2944_v16  ;;  %v9634_v34 = vmax.f32 %v9253_v47, %v3231_v52  ;;  %v3105_v15 = vrot.slane %v9417_v4, 2  ;;  %v12871_v29 = vmax.f32 %v12869_v60, %v12870_v51 }
 0x248   : > { %v2785_v3 = vrot.slane %v9417_v4, 6  ;;  %v3482_v14 = vmax.f32 %v9244_v39, %v9625_v59  ;;  %6519 = vmatprep.mubr.msk.f32.mxu0 %vm12872_vm3, %v9628_v46  ;;  %v12873_v16 = vrot.slane %v9311_v36, 1  ;;  %vm12874_vm14 = vcmp.lt.s32.totalorder %v7195_v45, 7 }
 0x249   : > { %v2219_v17 = vmax.f32 %v12871_v29, %v12868_v35  ;;  %v9651_v47 = vmax.f32 %v9537_v43, %v9634_v34  ;;  %v12875_v35 = vrot.slane %v9311_v36, 2  ;;  %vm12876_vm11 = vcmp.lt.s32.totalorder %v7195_v45, 6 }
 0x24a   : > { %v3046_v39 = vsel %vm12874_vm14, %v12873_v16, %v3009_v22  ;;  %v9663_v51 = vmax.f32 %v9380_v1, %v3482_v14  ;;  %v12877_v28 = vrot.slane %v9311_v36, 6  ;;  %vm12878_vm3 = vcmp.lt.s32.totalorder %v7195_v45, 2 }
 0x24b   : > { %v3142_v60 = vsel %vm12876_vm11, %v12875_v35, %v3105_v15  ;;  %v9666_v6 = vmax.f32 %v8321_v13, %v2219_v17  ;;  %v3483_v16 = vmax.f32 %v9342_v11, %v9651_v47  ;;  %v2881_v2 = vrot.slane %v9417_v4, 7  ;;  %v12882_v11 = vld [vmem:[#allocation3_spill] sm:$0xff]  ;;  %v12884_v35 = vld [vmem:[#allocation85_spill] sm:$0xff] }
 0x24c   : > { %v3200_v29 = vmax.f32 %v3046_v39, %v3142_v60  ;;  %v2822_v52 = vsel %vm12878_vm3, %v12877_v28, %v2785_v3  ;;  %v12879_v8 = vrot.slane %v9426_v27, 1  ;;  %v12880_v14 = vrot.slane %v9426_v27, 2 }
 0x24d   : > { %vm12881_vm0 = vcmask 15360   ;;  %v9687_v28 = vmax.f32 %v9562_v23, %v9666_v6  ;;  %vm12883_vm3 = vnez %v12882_v11  ;;  %vm12885_vm10 = vnez %v12884_v35 }
 0x24e   : > { %v3045_v1 = vsel %vm12874_vm14, %v3009_v22, %v12879_v8  ;;  %v3141_v13 = vsel %vm12876_vm11, %v3105_v15, %v12880_v14  ;;  %6601 = vmatprep.mubr.msk.f32.mxu1 %vm12881_vm0, %v9663_v51  ;;  %v3232_v17 = vmax.f32 %v2976_v10, %v3200_v29  ;;  %v9694_v8 = vmax.f32 %v9423_v38, %v3483_v16  ;;  %v12888_v10 = vld [vmem:[#allocation121_spill] sm:$0xff] }
 0x24f   : > { %v3073_v39 = vsel %vm12883_vm3, %v3045_v1, -1e+30  ;;  %v3169_v60 = vsel %vm12885_vm10, %v3141_v13, -1e+30  ;;  %v12886_v22 = vrot.slane %v9311_v36, 7  ;;  %vm12887_vm14 = vcmp.lt.s32.totalorder %v7195_v45, 1 }
 0x250   : > { %v3201_v14 = vmax.f32 %v3073_v39, %v3169_v60  ;;  %v9702_v29 = vmax.f32 %v12859_v41, %v12888_v10  ;;  %v9705_v26 = vmax.f32 %v9311_v36, %v3232_v17  ;;  %v2727_v1 = vmax.f32 %v9384_v49, %v9687_v28  ;;  %v12892_v60 = vld [vmem:[#allocation4_spill] sm:$0xff] }
 0x251   : > { %v2918_v15 = vsel %vm12887_vm14, %v12886_v22, %v2881_v2  ;;  %v12889_v38 = vrot.slane %v9426_v27, 6  ;;  %vm12890_vm0 = vcmp.lt.s32.totalorder %v7195_v45, 2  ;;  %vm12891_vm11 = vcmask 15360  }
 0x252   : > { %v2977_v13 = vmax.f32 %v2822_v52, %v2918_v15  ;;  %6602 = vmatmul.mubr.msk.f32.gmra.mrb[22].mxu1 %vm12891_vm11, %v9694_v8  ;;  %v2728_v39 = vmax.f32 %v9388_v37, %v9702_v29  ;;  %vm12893_vm14 = vnez %v12892_v60  ;;  %v12894_v36 = vrot.slane %v9426_v27, 7 }
 0x253   : > { %v2821_v16 = vsel %vm12890_vm0, %v2785_v3, %v12889_v38  ;;  %vm12895_vm10 = vcmp.lt.s32.totalorder %v7195_v45, 1  ;;  %v3011_v52 = vrot.slane %v9521_v0, 1  ;;  %v9726_v17 = vmax.f32 %v9602_v61, %v9705_v26  ;;  %v12896_v38 = vld [vmem:[#allocation76_spill] sm:$0xff] }
 0x254   : > { %v2850_v22 = vsel %vm12893_vm14, %v2821_v16, -1e+30  ;;  %v2917_v49 = vsel %vm12895_vm10, %v2881_v2, %v12894_v36  ;;  %v9729_v3 = vmax.f32 %v9460_v54, %v2727_v1  ;;  %v3233_v15 = vmax.f32 %v2977_v13, %v3201_v14  ;;  %v12901_v14 = vld [vmem:[#allocation118_spill] sm:$0xff] }
 0x255   : > { %vm12897_vm0 = vnez %v12896_v38  ;;  %v9734_v16 = vmax.f32 %v12825_v50, %v2728_v39  ;;  %v12898_v35 = vrot.slane %v9426_v27, 1  ;;  %vm12899_vm10 = vcmp.lt.s32.totalorder %v7195_v45, 7  ;;  %v12900_v50 = vld [vmem:[#allocation117_spill] sm:$0xff] }
 0x256   : > { %v2946_v37 = vsel %vm12897_vm0, %v2917_v49, -1e+30  ;;  %v3107_v36 = vrot.slane %v9521_v0, 2  ;;  %v3484_v11 = vmax.f32 %v9402_v42, %v9726_v17  ;;  %6520 = vmatmul.mubr.msk.f32.gmra.mrb[50].mxu0 %vm12891_vm11, %v9729_v3  ;;  %v9746_v54 = vmax.f32 %v9417_v4, %v3233_v15  ;;  %v12917_v49 = vld [vmem:[#allocation92_spill] sm:$0xff] }
 0x257   : > { %v2978_v60 = vmax.f32 %v2850_v22, %v2946_v37  ;;  %v3044_v2 = vsel %vm12899_vm10, %v12898_v35, %v3011_v52  ;;  %v12902_v1 = vmax.f32 %v12900_v50, %v12901_v14  ;;  %v2787_v39 = vrot.slane %v9521_v0, 6  ;;  %vm12903_vm10 = vmmov %vm12891_vm11 }
 0x258   : > { %6522 = vmatprep.mubr.msk.f32.mxu0 %vm12903_vm10, %v9734_v16  ;;  %v9760_v4 = vmax.f32 %v9497_v40, %v3484_v11  ;;  %v9764_v15 = vmax.f32 %v9634_v34, %v9746_v54  ;;  %vm12905_vm11 = vcmp.lt.s32.totalorder %v7195_v45, 6  ;;  %vm12907_vm10 = vcmp.lt.s32.totalorder %v7195_v45, 2 }
 0x259   : > { %v2221_v13 = vmax.f32 %v12902_v1, %v8792_v9  ;;  %v12904_v9 = vrot.slane %v9426_v27, 2  ;;  %v12906_v1 = vrot.slane %v9426_v27, 6  ;;  %v2883_v40 = vrot.slane %v9521_v0, 7 }
 0x25a   : > { %v12908_v11 = vrot.slane %v9526_v31, 1  ;;  %vm12909_vm0 = vcmp.lt.s32.totalorder %v7195_v45, 7  ;;  %vm12910_vm14 = vcmask 15360   ;;  %v9804_v38 = vmax.f32 %v12888_v10, %v8814_v5 }
 0x25b   : > { %v3140_v37 = vsel %vm12905_vm11, %v12904_v9, %v3107_v36  ;;  %v9771_v50 = vmax.f32 %v8380_v48, %v2221_v13  ;;  %v2820_v22 = vsel %vm12907_vm10, %v12906_v1, %v2787_v39  ;;  %6604 = vmatprep.mubr.msk.f32.mxu1 %vm12910_vm14, %v9760_v4  ;;  %v3485_v48 = vmax.f32 %v9449_v55, %v9764_v15  ;;  %v12911_v13 = vld [vmem:[#allocation5_spill] sm:$0xff] }
 0x25c   : > { %v3202_v14 = vmax.f32 %v3044_v2, %v3140_v37  ;;  %v3043_v35 = vsel %vm12909_vm0, %v3011_v52, %v12908_v11  ;;  %vm12912_vm11 = vnez %v12911_v13  ;;  %v12913_v37 = vrot.slane %v9526_v31, 2 }
 0x25d   : > { %v9788_v2 = vmax.f32 %v9666_v6, %v9771_v50  ;;  %v3075_v9 = vsel %vm12912_vm11, %v3043_v35, -1e+30  ;;  %vm12914_vm10 = vcmp.lt.s32.totalorder %v7195_v45, 6  ;;  %v12915_v52 = vrot.slane %v9426_v27, 7 }
 0x25e   : > { %v3139_v1 = vsel %vm12914_vm10, %v3107_v36, %v12913_v37  ;;  %v3234_v42 = vmax.f32 %v2978_v60, %v3202_v14  ;;  %vm12916_vm14 = vcmp.lt.s32.totalorder %v7195_v45, 1  ;;  %vm12918_vm0 = vnez %v12917_v49 }
 0x25f   : > { %v2916_v11 = vsel %vm12916_vm14, %v12915_v52, %v2883_v40  ;;  %v3171_v55 = vsel %vm12918_vm0, %v3139_v1, -1e+30  ;;  %v9807_v35 = vmax.f32 %v9537_v43, %v3485_v48  ;;  %v2729_v13 = vmax.f32 %v9481_v33, %v9788_v2 }
 0x260   : > { %v2979_v36 = vmax.f32 %v2820_v22, %v2916_v11  ;;  %v3203_v60 = vmax.f32 %v3075_v9, %v3171_v55  ;;  %v9812_v14 = vmax.f32 %v9426_v27, %v3234_v42  ;;  %v2730_v37 = vmax.f32 %v9494_v18, %v9804_v38  ;;  %v12923_v22 = vld [vmem:[#allocation6_spill] sm:$0xff]  ;;  %v12925_v42 = vld [vmem:[#allocation84_spill] sm:$0xff] }
 0x261   : > { %v12919_v1 = vrot.slane %v9526_v31, 6  ;;  %vm12920_vm10 = vcmp.lt.s32.totalorder %v7195_v45, 2  ;;  %v12921_v49 = vrot.slane %v9526_v31, 7  ;;  %vm12922_vm0 = vcmask 15360  }
 0x262   : > { %6605 = vmatmul.mubr.msk.f32.gmra.mrb[24].mxu1 %vm12922_vm0, %v9807_v35  ;;  %v9827_v33 = vmax.f32 %v9562_v23, %v2729_v13  ;;  %v3235_v27 = vmax.f32 %v2979_v36, %v3203_v60  ;;  %vm12924_vm11 = vnez %v12923_v22  ;;  %vm12926_vm3 = vnez %v12925_v42 }
 0x263   : > { %v2819_v52 = vsel %vm12920_vm10, %v2787_v39, %v12919_v1  ;;  %v2915_v43 = vsel %vm12916_vm14, %v2883_v40, %v12921_v49  ;;  %v9835_v39 = vmax.f32 %v9705_v26, %v9812_v14  ;;  %v9838_v9 = vmax.f32 %v12859_v41, %v2730_v37  ;;  %vm12927_vm10 = vmmov %vm12922_vm0 }
 0x264   : > { %v2852_v18 = vsel %vm12924_vm11, %v2819_v52, -1e+30  ;;  %v2948_v48 = vsel %vm12926_vm3, %v2915_v43, -1e+30  ;;  %v3013_v40 = vrot.slane %v9617_v30, 1  ;;  %6523 = vmatmul.mubr.msk.f32.gmra.mrb[52].mxu0 %vm12922_vm0, %v9827_v33  ;;  %v9844_v23 = vmax.f32 %v9521_v0, %v3235_v27 }
 0x265   : > { %v2980_v49 = vmax.f32 %v2852_v18, %v2948_v48  ;;  %v3109_v13 = vrot.slane %v9617_v30, 2  ;;  %v9849_v11 = vmax.f32 %v9771_v50, %v8903_v25  ;;  %v2789_v55 = vrot.slane %v9617_v30, 6  ;;  %6525 = vmatprep.mubr.msk.f32.mxu0 %vm12927_vm10, %v9838_v9 }
 0x266   : > { %v3486_v41 = vmax.f32 %v9518_v58, %v9835_v39  ;;  %v9861_v0 = vmax.f32 %v9746_v54, %v9844_v23  ;;  %v12928_v52 = vrot.slane %v9526_v31, 1  ;;  %vm12929_vm14 = vcmp.lt.s32.totalorder %v7195_v45, 7 }
 0x267   : > { %v12930_v43 = vrot.slane %v9526_v31, 2  ;;  %vm12931_vm0 = vcmp.lt.s32.totalorder %v7195_v45, 6  ;;  %v2731_v60 = vmax.f32 %v9578_v53, %v9849_v11  ;;  %v12932_v36 = vmov %v12919_v1 }
 0x268   : > { %v3042_v58 = vsel %vm12929_vm14, %v12928_v52, %v3013_v40  ;;  %v9873_v18 = vmax.f32 %v9602_v61, %v3486_v41  ;;  %vm12933_vm10 = vcmp.lt.s32.totalorder %v7195_v45, 2  ;;  %v3487_v52 = vmax.f32 %v9555_v7, %v9861_v0  ;;  %v12937_v7 = vld [vmem:[#allocation7_spill] sm:$0xff] }
 0x269   : > { %v3138_v27 = vsel %vm12931_vm0, %v12930_v43, %v3109_v13  ;;  %v2818_v1 = vsel %vm12933_vm10, %v12932_v36, %v2789_v55  ;;  %v2885_v37 = vrot.slane %v9617_v30, 7  ;;  %v12934_v42 = vrot.slane %v9628_v46, 1 }
 0x26a   : > { %v3204_v48 = vmax.f32 %v3042_v58, %v3138_v27  ;;  %v12935_v41 = vrot.slane %v9628_v46, 2  ;;  %vm12936_vm3 = vcmask 15360   ;;  %v9895_v36 = vmax.f32 %v9666_v6, %v2731_v60  ;;  %v12939_v27 = vld [vmem:[#allocation94_spill] sm:$0xff] }
 0x26b   : > { %v3041_v61 = vsel %vm12929_vm14, %v3013_v40, %v12934_v42  ;;  %6607 = vmatprep.mubr.msk.f32.mxu1 %vm12936_vm3, %v9873_v18  ;;  %vm12938_vm10 = vnez %v12937_v7  ;;  %vm12940_vm11 = vnez %v12939_v27  ;;  %v9902_v42 = vmax.f32 %v9634_v34, %v3487_v52 }
 0x26c   : > { %v3137_v53 = vsel %vm12931_vm0, %v3109_v13, %v12935_v41  ;;  %v3236_v58 = vmax.f32 %v2980_v49, %v3204_v48  ;;  %v3077_v43 = vsel %vm12938_vm10, %v3041_v61, -1e+30  ;;  %v12941_v40 = vrot.slane %v9526_v31, 7  ;;  %6526 = vmatmul.mubr.msk.f32.gmra.mrb[54].mxu0 %vm12936_vm3, %v9895_v36  ;;  %v12947_v61 = vld [vmem:[#allocation8_spill] sm:$0xff] }
 0x26d   : > { %v3173_v22 = vsel %vm12940_vm11, %v3137_v53, -1e+30  ;;  %vm12942_vm14 = vcmp.lt.s32.totalorder %v7195_v45, 1  ;;  %v9910_v49 = vmax.f32 %v8814_v5, %v8892_v62  ;;  %v12943_v34 = vrot.slane %v9628_v46, 6  ;;  %vm12946_vm11 = vmmov %vm12936_vm3 }
 0x26e   : > { %v2914_v13 = vsel %vm12942_vm14, %v12941_v40, %v2885_v37  ;;  %v3205_v41 = vmax.f32 %v3077_v43, %v3173_v22  ;;  %v9913_v6 = vmax.f32 %v9526_v31, %v3236_v58  ;;  %vm12944_vm0 = vcmp.lt.s32.totalorder %v7195_v45, 2  ;;  %6608 = vmatmul.mubr.msk.f32.gmra.mrb[26].mxu1 %vm12946_vm11, %v9902_v42 }
 0x26f   : > { %v2981_v60 = vmax.f32 %v2818_v1, %v2914_v13  ;;  %v2817_v48 = vsel %vm12944_vm0, %v2789_v55, %v12943_v34  ;;  %v12945_v52 = vrot.slane %v9628_v46, 7  ;;  %v2732_v31 = vmax.f32 %v9594_v12, %v9910_v49  ;;  %v12949_v1 = vld [vmem:[#allocation91_spill] sm:$0xff] }
 0x270   : > { %vm12948_vm10 = vnez %v12947_v61  ;;  %vm12950_vm3 = vnez %v12949_v1  ;;  %v3015_v43 = vrot.slane %v9729_v3, 1  ;;  %v9936_v55 = vmax.f32 %v9812_v14, %v9913_v6 }
 0x271   : > { %v2913_v22 = vsel %vm12942_vm14, %v2885_v37, %v12945_v52  ;;  %v2854_v53 = vsel %vm12948_vm10, %v2817_v48, -1e+30  ;;  %v3237_v40 = vmax.f32 %v2981_v60, %v3205_v41  ;;  %v3111_v13 = vrot.slane %v9729_v3, 2 }
 0x272   : > { %v2950_v58 = vsel %vm12950_vm3, %v2913_v22, -1e+30  ;;  %v9940_v34 = vmax.f32 %v12888_v10, %v2732_v31  ;;  %v12951_v12 = vrot.slane %v9628_v46, 1  ;;  %vm12952_vm11 = vcmp.lt.s32.totalorder %v7195_v45, 7 }
 0x273   : > { %v2982_v37 = vmax.f32 %v2854_v53, %v2950_v58  ;;  %v2733_v52 = vmax.f32 %v9687_v28, %v9132_v21  ;;  %v2791_v22 = vrot.slane %v9729_v3, 6  ;;  %v3488_v1 = vmax.f32 %v9625_v59, %v9936_v55 }
 0x274   : > { %v3040_v48 = vsel %vm12952_vm11, %v12951_v12, %v3015_v43  ;;  %v9952_v41 = vmax.f32 %v9617_v30, %v3237_v40  ;;  %v12953_v60 = vrot.slane %v9628_v46, 2  ;;  %vm12954_vm0 = vcmp.lt.s32.totalorder %v7195_v45, 6 }
 0x275   : > { %v2887_v31 = vrot.slane %v9729_v3, 7  ;;  %vm12955_vm14 = vcmask 15360   ;;  %v9966_v30 = vmax.f32 %v9705_v26, %v3488_v1  ;;  %v9973_v12 = vmax.f32 %v9771_v50, %v2733_v52 }
 0x276   : > { %v3136_v10 = vsel %vm12954_vm0, %v12953_v60, %v3111_v13  ;;  %6528 = vmatprep.mubr.msk.f32.mxu0 %vm12955_vm14, %v9940_v34  ;;  %v9970_v59 = vmax.f32 %v9844_v23, %v9952_v41  ;;  %v12956_v60 = vrot.slane %v9628_v46, 6  ;;  %vm12957_vm11 = vcmp.lt.s32.totalorder %v7195_v45, 2 }
 0x277   : > { %v3206_v40 = vmax.f32 %v3040_v48, %v3136_v10  ;;  %v12958_v53 = vrot.slane %v9628_v46, 7  ;;  %vm12959_vm0 = vcmp.lt.s32.totalorder %v7195_v45, 1  ;;  %v12960_v26 = vrot.slane %v9734_v16, 1 }
 0x278   : > { %v2816_v58 = vsel %vm12957_vm11, %v12956_v60, %v2791_v22  ;;  %vm12961_vm14 = vcmp.lt.s32.totalorder %v7195_v45, 7  ;;  %v12962_v48 = vrot.slane %v9734_v16, 2  ;;  %vm12963_vm3 = vcmp.lt.s32.totalorder %v7195_v45, 6  ;;  %v12966_v60 = vld [vmem:[#allocation9_spill] sm:$0xff] }
 0x279   : > { %v2912_v28 = vsel %vm12959_vm0, %v12958_v53, %v2887_v31  ;;  %v3039_v1 = vsel %vm12961_vm14, %v3015_v43, %v12960_v26  ;;  %vm12964_vm10 = vcmask 15360   ;;  %v3489_v52 = vmax.f32 %v9651_v47, %v9970_v59  ;;  %v12968_v43 = vld [vmem:[#allocation99_spill] sm:$0xff] }
 0x27a   : > { %v3135_v50 = vsel %vm12963_vm3, %v3111_v13, %v12962_v48  ;;  %6610 = vmatprep.mubr.msk.f32.mxu1 %vm12964_vm10, %v9966_v30  ;;  %v3238_v10 = vmax.f32 %v2982_v37, %v3206_v40  ;;  %vm12965_vm11 = vmmov %vm12964_vm10  ;;  %v2983_v53 = vmax.f32 %v2816_v58, %v2912_v28  ;;  %vm12967_vm0 = vnez %v12966_v60  ;;  %v12976_v60 = vld [vmem:[#allocation97_spill] sm:$0xff] }
 0x27b   : > { %6529 = vmatmul.mubr.msk.f32.gmra.mrb[56].mxu0 %vm12965_vm11, %v9973_v12  ;;  %v3079_v21 = vsel %vm12967_vm0, %v3039_v1, -1e+30  ;;  %vm12969_vm14 = vnez %v12968_v43  ;;  %v2702_v13 = vmax.f32 %v8892_v62, %v9095_v63  ;;  %v12970_v48 = vrot.slane %v9734_v16, 6  ;;  %v12974_v1 = vld [vmem:[#allocation10_spill] sm:$0xff] }
 0x27c   : > { %v3175_v26 = vsel %vm12969_vm14, %v3135_v50, -1e+30  ;;  %vm12971_vm10 = vcmp.lt.s32.totalorder %v7195_v45, 2  ;;  %v12972_v47 = vrot.slane %v9734_v16, 7  ;;  %vm12973_vm3 = vcmp.lt.s32.totalorder %v7195_v45, 1 }
 0x27d   : > { %v2815_v61 = vsel %vm12971_vm10, %v2791_v22, %v12970_v48  ;;  %v10012_v58 = vmax.f32 %v9746_v54, %v3489_v52  ;;  %v10015_v28 = vmax.f32 %v9628_v46, %v3238_v10  ;;  %v3207_v40 = vmax.f32 %v3079_v21, %v3175_v26  ;;  %v12979_v21 = vld [vmem:[#allocation71_spill] sm:$0xff] }
 0x27e   : > { %v2911_v37 = vsel %vm12973_vm3, %v2887_v31, %v12972_v47  ;;  %vm12975_vm11 = vnez %v12974_v1  ;;  %v2734_v43 = vmax.f32 %v9702_v29, %v2702_v13  ;;  %vm12977_vm14 = vnez %v12976_v60 }
 0x27f   : > { %v2856_v50 = vsel %vm12975_vm11, %v2815_v61, -1e+30  ;;  %v2952_v22 = vsel %vm12977_vm14, %v2911_v37, -1e+30  ;;  %v3017_v48 = vrot.slane %v9827_v33, 1  ;;  %v3113_v27 = vrot.slane %v9827_v33, 2 }
 0x280   : > { %vm12978_vm10 = vcmask 15360   ;;  %v10028_v46 = vmax.f32 %v9913_v6, %v10015_v28  ;;  %v3239_v54 = vmax.f32 %v2983_v53, %v3207_v40  ;;  %v2984_v31 = vmax.f32 %v2856_v50, %v2952_v22  ;;  %v12980_v61 = vld [vmem:[#allocation78_spill] sm:$0xff] }
 0x281   : > { %6611 = vmatmul.mubr.msk.f32.gmra.mrb[28].mxu1 %vm12978_vm10, %v10012_v58  ;;  %v2703_v52 = vmax.f32 %v12980_v61, %v12979_v21  ;;  %v10033_v29 = vmax.f32 %v8814_v5, %v2734_v43  ;;  %v12981_v10 = vrot.slane %v9734_v16, 1  ;;  %vm12982_vm3 = vcmp.lt.s32.totalorder %v7195_v45, 7 }
 0x282   : > { %v12983_v13 = vrot.slane %v9734_v16, 2  ;;  %vm12984_vm10 = vcmp.lt.s32.totalorder %v7195_v45, 6  ;;  %v2793_v37 = vrot.slane %v9827_v33, 6  ;;  %v3490_v53 = vmax.f32 %v9726_v17, %v10028_v46 }
 0x283   : > { %v3038_v26 = vsel %vm12982_vm3, %v12981_v10, %v3017_v48  ;;  %v10047_v40 = vmax.f32 %v9729_v3, %v3239_v54  ;;  %v2735_v43 = vmax.f32 %v9788_v2, %v2703_v52  ;;  %vm12985_vm3 = vcmask 15360  }
 0x284   : > { %v3134_v47 = vsel %vm12984_vm10, %v12983_v13, %v3113_v27  ;;  %6531 = vmatprep.mubr.msk.f32.mxu0 %vm12985_vm3, %v10033_v29  ;;  %v10057_v13 = vmax.f32 %v9812_v14, %v3490_v53  ;;  %v12986_v54 = vrot.slane %v9734_v16, 6  ;;  %vm12987_vm10 = vcmp.lt.s32.totalorder %v7195_v45, 2 }
 0x285   : > { %v3208_v5 = vmax.f32 %v3038_v26, %v3134_v47  ;;  %v10061_v17 = vmax.f32 %v9952_v41, %v10047_v40  ;;  %v10064_v2 = vmax.f32 %v8903_v25, %v2735_v43  ;;  %v2889_v26 = vrot.slane %v9827_v33, 7  ;;  %v12994_v43 = vld [vmem:[#allocation11_spill] sm:$0xff] }
 0x286   : > { %v2814_v52 = vsel %vm12987_vm10, %v12986_v54, %v2793_v37  ;;  %v12988_v47 = vrot.slane %v9838_v9, 1  ;;  %vm12989_vm3 = vcmp.lt.s32.totalorder %v7195_v45, 7  ;;  %v12990_v53 = vrot.slane %v9838_v9, 2  ;;  %v12996_v54 = vld [vmem:[#allocation109_spill] sm:$0xff] }
 0x287   : > { %v3240_v3 = vmax.f32 %v2984_v31, %v3208_v5  ;;  %vm12991_vm14 = vcmp.lt.s32.totalorder %v7195_v45, 6  ;;  %vm12992_vm11 = vcmask 15360   ;;  %v3491_v25 = vmax.f32 %v9764_v15, %v10061_v17 }
 0x288   : > { %v3037_v14 = vsel %vm12989_vm3, %v3017_v48, %v12988_v47  ;;  %v3133_v31 = vsel %vm12991_vm14, %v3113_v27, %v12990_v53  ;;  %6613 = vmatprep.mubr.msk.f32.mxu1 %vm12992_vm11, %v10057_v13  ;;  %vm12993_vm10 = vmmov %vm12992_vm11  ;;  %vm12995_vm0 = vnez %v12994_v43  ;;  %vm12997_vm3 = vnez %v12996_v54 }
 0x289   : > { %v10084_v5 = vmax.f32 %v9734_v16, %v3240_v3  ;;  %6532 = vmatmul.mubr.msk.f32.gmra.mrb[58].mxu0 %vm12993_vm10, %v10064_v2  ;;  %v3081_v48 = vsel %vm12995_vm0, %v3037_v14, -1e+30  ;;  %v3177_v47 = vsel %vm12997_vm3, %v3133_v31, -1e+30  ;;  %v12998_v27 = vrot.slane %v9734_v16, 7  ;;  %v13002_v16 = vld [vmem:[#allocation12_spill] sm:$0xff] }
 0x28a   : > { %vm12999_vm14 = vcmp.lt.s32.totalorder %v7195_v45, 1  ;;  %v3209_v22 = vmax.f32 %v3081_v48, %v3177_v47  ;;  %v2704_v15 = vmax.f32 %v9095_v63, -1e+30  ;;  %v13000_v3 = vrot.slane %v9838_v9, 6 }
 0x28b   : > { %v2910_v53 = vsel %vm12999_vm14, %v12998_v27, %v2889_v26  ;;  %vm13001_vm11 = vcmp.lt.s32.totalorder %v7195_v45, 2  ;;  %v10102_v60 = vmax.f32 %v9844_v23, %v3491_v25  ;;  %v10106_v14 = vmax.f32 %v10015_v28, %v10084_v5 }
 0x28c   : > { %v2813_v50 = vsel %vm13001_vm11, %v2793_v37, %v13000_v3  ;;  %v2985_v31 = vmax.f32 %v2814_v52, %v2910_v53  ;;  %vm13003_vm10 = vnez %v13002_v16  ;;  %v2736_v48 = vmax.f32 %v9804_v38, %v2704_v15  ;;  %v13006_v53 = vld [vmem:[#allocation106_spill] sm:$0xff] }
 0x28d   : > { %v2858_v10 = vsel %vm13003_vm10, %v2813_v50, -1e+30  ;;  %v13004_v47 = vrot.slane %v9838_v9, 7  ;;  %v3019_v37 = vrot.slane %v9895_v36, 1  ;;  %v3115_v23 = vrot.slane %v9895_v36, 2 }
 0x28e   : > { %vm13005_vm11 = vcmask 15360   ;;  %v3492_v52 = vmax.f32 %v9835_v39, %v10106_v14  ;;  %v3241_v25 = vmax.f32 %v2985_v31, %v3209_v22  ;;  %vm13007_vm10 = vnez %v13006_v53 }
 0x28f   : > { %v2909_v27 = vsel %vm12999_vm14, %v2889_v26, %v13004_v47  ;;  %6614 = vmatmul.mubr.msk.f32.gmra.mrb[30].mxu1 %vm13005_vm11, %v10102_v60  ;;  %v2705_v38 = vmax.f32 %v12979_v21, -1e+30  ;;  %v10125_v15 = vmax.f32 %v8892_v62, %v2736_v48  ;;  %v13008_v3 = vrot.slane %v9838_v9, 1 }
 0x290   : > { %v2954_v50 = vsel %vm13007_vm10, %v2909_v27, -1e+30  ;;  %vm13009_vm14 = vcmp.lt.s32.totalorder %v7195_v45, 7  ;;  %v13010_v16 = vrot.slane %v9838_v9, 2  ;;  %vm13011_vm11 = vcmp.lt.s32.totalorder %v7195_v45, 6 }
 0x291   : > { %v2986_v26 = vmax.f32 %v2858_v10, %v2954_v50  ;;  %v3036_v47 = vsel %vm13009_vm14, %v13008_v3, %v3019_v37  ;;  %v10136_v22 = vmax.f32 %v9913_v6, %v3492_v52  ;;  %v10139_v31 = vmax.f32 %v9827_v33, %v3241_v25 }
 0x292   : > { %v3132_v39 = vsel %vm13011_vm11, %v13010_v16, %v3115_v23  ;;  %v2737_v62 = vmax.f32 %v9849_v11, %v2705_v38  ;;  %vm13012_vm14 = vcmask 15360   ;;  %v2795_v16 = vrot.slane %v9895_v36, 6 }
 0x293   : > { %v3210_v21 = vmax.f32 %v3036_v47, %v3132_v39  ;;  %6534 = vmatprep.mubr.msk.f32.mxu0 %vm13012_vm14, %v10125_v15  ;;  %vm13013_vm11 = vmmov %vm13012_vm14  ;;  %v10152_v33 = vmax.f32 %v10047_v40, %v10139_v31  ;;  %v2891_v52 = vrot.slane %v9895_v36, 7  ;;  %v13014_v25 = vrot.slane %v9940_v34, 1 }
 0x294   : > { %6616 = vmatprep.mubr.msk.f32.mxu1 %vm13013_vm11, %v10136_v22  ;;  %v10155_v11 = vmax.f32 %v12980_v61, %v2737_v62  ;;  %vm13015_vm10 = vcmp.lt.s32.totalorder %v7195_v45, 7  ;;  %v13016_v3 = vrot.slane %v9940_v34, 2  ;;  %vm13017_vm14 = vcmp.lt.s32.totalorder %v7195_v45, 6  ;;  %v13020_v62 = vld [vmem:[#allocation13_spill] sm:$0xff] }
 0x295   : > { %v3242_v6 = vmax.f32 %v2986_v26, %v3210_v21  ;;  %v3035_v38 = vsel %vm13015_vm10, %v3019_v37, %v13014_v25  ;;  %v2738_v39 = vmax.f32 %v9910_v49, -1e+30  ;;  %v3493_v61 = vmax.f32 %v9861_v0, %v10152_v33  ;;  %v13024_v0 = vld [vmem:[#allocation112_spill] sm:$0xff] }
 0x296   : > { %v3131_v47 = vsel %vm13017_vm14, %v3115_v23, %v13016_v3  ;;  %6535 = vmatmul.mubr.msk.f32.gmra.mrb[60].mxu0 %vm13013_vm11, %v10155_v11  ;;  %v13018_v21 = vrot.slane %v9838_v9, 6  ;;  %vm13019_vm10 = vcmp.lt.s32.totalorder %v7195_v45, 2  ;;  %vm13021_vm3 = vnez %v13020_v62 }
 0x297   : > { %v10171_v26 = vmax.f32 %v9838_v9, %v3242_v6  ;;  %v3083_v25 = vsel %vm13021_vm3, %v3035_v38, -1e+30  ;;  %v13022_v23 = vrot.slane %v9838_v9, 7  ;;  %vm13023_vm14 = vcmp.lt.s32.totalorder %v7195_v45, 1  ;;  %vm13027_vm11 = vmmov %vm13019_vm10 }
 0x298   : > { %v2812_v37 = vsel %vm13019_vm10, %v13018_v21, %v2795_v16  ;;  %vm13025_vm0 = vnez %v13024_v0  ;;  %v10188_v3 = vmax.f32 %v9095_v63, %v2738_v39  ;;  %v13026_v48 = vrot.slane %v9940_v34, 6 }
 0x299   : > { %v2908_v49 = vsel %vm13023_vm14, %v13022_v23, %v2891_v52  ;;  %v3179_v6 = vsel %vm13025_vm0, %v3131_v47, -1e+30  ;;  %v10195_v21 = vmax.f32 %v9952_v41, %v3493_v61  ;;  %v10199_v9 = vmax.f32 %v10084_v5, %v10171_v26 }
 0x29a   : > { %v2811_v10 = vsel %vm13027_vm11, %v2795_v16, %v13026_v48  ;;  %v2987_v38 = vmax.f32 %v2812_v37, %v2908_v49  ;;  %v3211_v23 = vmax.f32 %v3083_v25, %v3179_v6  ;;  %vm13028_vm10 = vcmask 15360   ;;  %v13030_v16 = vld [vmem:[#allocation14_spill] sm:$0xff]  ;;  %v13035_v49 = vld [vmem:[#allocation111_spill] sm:$0xff] }
 0x29b   : > { %6537 = vmatprep.mubr.msk.f32.mxu0 %vm13028_vm10, %v10188_v3  ;;  %vm13029_vm14 = vmmov %vm13028_vm10  ;;  %v3494_v41 = vmax.f32 %v9936_v55, %v10199_v9  ;;  %vm13031_vm11 = vnez %v13030_v16  ;;  %v13032_v37 = vrot.slane %v9940_v34, 7  ;;  %vm13033_vm0 = vcmp.lt.s32.totalorder %v7195_v45, 1 }
 0x29c   : > { %6617 = vmatmul.mubr.msk.f32.gmra.mrb[0].mxu1 %vm13029_vm14, %v10195_v21  ;;  %v3243_v48 = vmax.f32 %v2987_v38, %v3211_v23  ;;  %v2860_v61 = vsel %vm13031_vm11, %v2811_v10, -1e+30  ;;  %vm13034_vm3 = vmmov %vm13028_vm10  ;;  %vm13036_vm10 = vnez %v13035_v49  ;;  %v3021_v47 = vrot.slane %v9973_v12, 1  ;;  %v13037_v38 = vld [vmem:[#allocation17_spill] sm:$0xff]  ;;  %v13052_v49 = vld [vmem:[#allocation16_spill] sm:$0xff] }
 0x29d   : > { %v2907_v25 = vsel %vm13033_vm0, %v2891_v52, %v13032_v37  ;;  %6538 = vmatmul.mubr.msk.f32.gmra.mrb[62].mxu0 %vm13034_vm3, %v9165_v24  ;;  %v3117_v50 = vrot.slane %v9973_v12, 2  ;;  %v2797_v55 = vrot.slane %v9973_v12, 6  ;;  %vm13038_vm14 = vmmov %vm13034_vm3  ;;  %v10227_v10 = vmax.f32 %v10015_v28, %v3494_v41 }
 0x29e   : > { %v2956_v6 = vsel %vm13036_vm10, %v2907_v25, -1e+30  ;;  %6542 = vmatprep.mubr.msk.f32.mxu0 %vm13038_vm14, %v13037_v38  ;;  %v10230_v52 = vmax.f32 %v9895_v36, %v3243_v48  ;;  %v2893_v37 = vrot.slane %v9973_v12, 7  ;;  %v13039_v25 = vrot.slane %v9940_v34, 1 }
 0x29f   : > { %v2988_v23 = vmax.f32 %v2860_v61, %v2956_v6  ;;  %vm13040_vm0 = vcmp.lt.s32.totalorder %v7195_v45, 7  ;;  %v13041_v63 = vrot.slane %v9940_v34, 2  ;;  %vm13042_vm3 = vcmp.lt.s32.totalorder %v7195_v45, 6 }
 0x2a0   : > { %v3034_v39 = vsel %vm13040_vm0, %v13039_v25, %v3021_v47  ;;  %v13043_v38 = vrot.slane %v9940_v34, 6  ;;  %vm13044_vm14 = vcmp.lt.s32.totalorder %v7195_v45, 2  ;;  %v13045_v36 = vrot.slane %v10033_v29, 1  ;;  %vm13046_vm10 = vmmov %vm13040_vm0  ;;  %v13050_v25 = vld [vmem:[#allocation33_spill] sm:$0xff] }
 0x2a1   : > { %v3130_v27 = vsel %vm13042_vm3, %v13041_v63, %v3117_v50  ;;  %vm13047_vm11 = vcmask 15360   ;;  %v10253_v48 = vmax.f32 %v10139_v31, %v10230_v52  ;;  %v13048_v63 = vrot.slane %v9940_v34, 7 }
 0x2a2   : > { %v2810_v28 = vsel %vm13044_vm14, %v13043_v38, %v2797_v55  ;;  %v3033_v41 = vsel %vm13046_vm10, %v3021_v47, %v13045_v36  ;;  %6619 = vmatprep.mubr.msk.f32.mxu1 %vm13047_vm11, %v10227_v10  ;;  %v3212_v61 = vmax.f32 %v3034_v39, %v3130_v27  ;;  %vm13049_vm0 = vcmp.lt.s32.totalorder %v7195_v45, 1  ;;  %vm13053_vm14 = vmmov %vm13047_vm11 }
 0x2a3   : > { %v2906_v6 = vsel %vm13049_vm0, %v13048_v63, %v2893_v37  ;;  %vm13051_vm3 = vnez %v13050_v25  ;;  %6543 = vmatmul.mubr.msk.f32.vlgmr.msra.gmra.mrb[32].mxu0 %vm13053_vm14, %v13052_v49  ;;  %v13054_v36 = vrot.slane %v10033_v29, 2  ;;  %vm13055_vm11 = vcmp.lt.s32.totalorder %v7195_v45, 6 }
 0x2a4   : > { %v3085_v38 = vsel %vm13051_vm3, %v3033_v41, -1e+30  ;;  %v2989_v47 = vmax.f32 %v2810_v28, %v2906_v6  ;;  %v13056_v0 = vrot.slane %v10033_v29, 6  ;;  %vm13057_vm10 = vcmp.lt.s32.totalorder %v7195_v45, 2  ;;  %v13059_v41 = vld [vmem:[#allocation23_spill] sm:$0xff]  ;;  %vm13060_vm3 = vmmov %vm13053_vm14  ;;  %v13061_v6 = vld [vmem:[#allocation32_spill] sm:$0xff] }
 0x2a5   : > { %v3129_v16 = vsel %vm13055_vm11, %v3117_v50, %v13054_v36  ;;  %v13058_v39 = vrot.slane %v10033_v29, 7  ;;  %6545 = vmatprep.mubr.msk.f32.mxu0 %vm13060_vm3, %v13059_v41  ;;  %v3495_v49 = vmax.f32 %v9970_v59, %v10253_v48  ;;  %v3244_v28 = vmax.f32 %v2988_v23, %v3212_v61  ;;  %v13063_v36 = vld [vmem:[#allocation122_spill] sm:$0xff]  ;;  %v13067_v61 = vld [vmem:[#allocation21_spill] sm:$0xff] }
 0x2a6   : > { %v2809_v27 = vsel %vm13057_vm10, %v2797_v55, %v13056_v0  ;;  %vm13062_vm14 = vnez %v13061_v6  ;;  %vm13064_vm11 = vnez %v13063_v36  ;;  %v13065_v0 = vld [vmem:[#allocation123_spill] sm:$0xff]  ;;  %v3023_v53 = vrot.slane %v10064_v2, 1 }
 0x2a7   : > { %v2905_v63 = vsel %vm13049_vm0, %v2893_v37, %v13058_v39  ;;  %v3181_v50 = vsel %vm13062_vm14, %v3129_v16, -1e+30  ;;  %v2862_v25 = vsel %vm13064_vm11, %v2809_v27, -1e+30  ;;  %vm13066_vm10 = vnez %v13065_v0  ;;  %6546 = vmatmul.mubr.msk.f32.gmra.mrb[34].mxu0 %vm13060_vm3, %v13067_v61  ;;  %vm13073_vm11 = vmmov %vm13060_vm3  ;;  %v13085_v36 = vld [vmem:[#allocation27_spill] sm:$0xff] }
 0x2a8   : > { %v3213_v62 = vmax.f32 %v3085_v38, %v3181_v50  ;;  %v2958_v55 = vsel %vm13066_vm10, %v2905_v63, -1e+30  ;;  %v3119_v37 = vrot.slane %v10064_v2, 2  ;;  %v10288_v39 = vmax.f32 %v10047_v40, %v3495_v49  ;;  %v13072_v49 = vld [vmem:[#allocation35_spill] sm:$0xff]  ;;  %vm13074_vm14 = vmmov %vm13060_vm3 }
 0x2a9   : > { %v10291_v59 = vmax.f32 %v9940_v34, %v3244_v28  ;;  %v2990_v23 = vmax.f32 %v2862_v25, %v2958_v55  ;;  %v2799_v16 = vrot.slane %v10064_v2, 6  ;;  %v13068_v27 = vrot.slane %v10033_v29, 1  ;;  %6548 = vmatprep.mubr.msk.f32.mxu0 %vm13073_vm11, %v13072_v49 }
 0x2aa   : > { %v3245_v38 = vmax.f32 %v2989_v47, %v3213_v62  ;;  %vm13069_vm0 = vcmp.lt.s32.totalorder %v7195_v45, 7  ;;  %v13070_v41 = vrot.slane %v10033_v29, 2  ;;  %vm13071_vm10 = vcmp.lt.s32.totalorder %v7195_v45, 6  ;;  %6620 = vmatmul.mubr.msk.f32.gmra.mrb[2].mxu1 %vm13074_vm14, %v10288_v39 }
 0x2ab   : > { %v3032_v63 = vsel %vm13069_vm0, %v13068_v27, %v3023_v53  ;;  %v2895_v34 = vrot.slane %v10064_v2, 7  ;;  %v10311_v62 = vmax.f32 %v10171_v26, %v10291_v59  ;;  %v13075_v47 = vrot.slane %v10033_v29, 6 }
 0x2ac   : > { %v3128_v40 = vsel %vm13071_vm10, %v13070_v41, %v3119_v37  ;;  %vm13076_vm3 = vcmp.lt.s32.totalorder %v7195_v45, 2  ;;  %v13077_v50 = vrot.slane %v10125_v15, 1  ;;  %vm13078_vm10 = vmmov %vm13069_vm0  ;;  %v10322_v61 = vmax.f32 %v9973_v12, %v3245_v38 }
 0x2ad   : > { %v3214_v25 = vmax.f32 %v3032_v63, %v3128_v40  ;;  %v2808_v28 = vsel %vm13076_vm3, %v13075_v47, %v2799_v16  ;;  %v13079_v27 = vrot.slane %v10033_v29, 7  ;;  %vm13080_vm14 = vcmp.lt.s32.totalorder %v7195_v45, 1 }
 0x2ae   : > { %v3031_v55 = vsel %vm13078_vm10, %v3023_v53, %v13077_v50  ;;  %v13082_v40 = vrot.slane %v10125_v15, 2  ;;  %vm13083_vm11 = vcmp.lt.s32.totalorder %v7195_v45, 6  ;;  %v3496_v0 = vmax.f32 %v10028_v46, %v10311_v62  ;;  %vm13089_vm10 = vmmov %vm13080_vm14 }
 0x2af   : > { %v2904_v41 = vsel %vm13080_vm14, %v13079_v27, %v2895_v34  ;;  %v3087_v63 = vsel %vm8708_vm15, %v3031_v55, -1e+30  ;;  %v3246_v53 = vmax.f32 %v2990_v23, %v3214_v25  ;;  %vm13086_vm0 = vcmask 15360   ;;  %v13090_v25 = vld [vmem:[#allocation47_spill] sm:$0xff] }
 0x2b0   : > { %v3127_v47 = vsel %vm13083_vm11, %v3119_v37, %v13082_v40  ;;  %v2991_v50 = vmax.f32 %v2808_v28, %v2904_v41  ;;  %6549 = vmatmul.mubr.msk.f32.gmra.mrb[36].mxu0 %vm13086_vm0, %v13085_v36  ;;  %v10342_v27 = vmax.f32 %v10230_v52, %v10322_v61  ;;  %v13087_v49 = vrot.slane %v10125_v15, 6  ;;  %vm13091_vm14 = vmmov %vm13086_vm0  ;;  %v13092_v41 = vld [vmem:[#allocation26_spill] sm:$0xff]  ;;  %v13094_v40 = vld [vmem:[#allocation45_spill] sm:$0xff] }
 0x2b1   : > { %v3183_v38 = vsel %vm8714_vm5, %v3127_v47, -1e+30  ;;  %v13088_v46 = vrot.slane %v10125_v15, 7  ;;  %6551 = vmatprep.mubr.msk.f32.mxu0 %vm13091_vm14, %v13090_v25  ;;  %v10355_v36 = vmax.f32 %v10084_v5, %v3496_v0  ;;  %v10358_v28 = vmax.f32 %v10033_v29, %v3246_v53 }
 0x2b2   : > { %v3215_v55 = vmax.f32 %v3087_v63, %v3183_v38  ;;  %v2807_v37 = vsel %vm13076_vm3, %v2799_v16, %v13087_v49  ;;  %vm13093_vm11 = vnez %v13092_v41  ;;  %vm13095_vm0 = vnez %v13094_v40  ;;  %vm13096_vm3 = vmmov %vm13091_vm14 }
 0x2b3   : > { %v2903_v23 = vsel %vm13089_vm10, %v2895_v34, %v13088_v46  ;;  %v2864_v63 = vsel %vm13093_vm11, %v2807_v37, -1e+30  ;;  %v3497_v49 = vmax.f32 %v10061_v17, %v10342_v27  ;;  %v3025_v38 = vrot.slane %v10155_v11, 1  ;;  %6622 = vmatprep.mubr.msk.f32.mxu1 %vm13096_vm3, %v10355_v36  ;;  %v13097_v37 = vld [vmem:[#allocation46_spill] sm:$0xff]  ;;  %vm13098_vm10 = vmmov %vm13096_vm3 }
 0x2b4   : > { %v2960_v16 = vsel %vm13095_vm0, %v2903_v23, -1e+30  ;;  %v3247_v47 = vmax.f32 %v2991_v50, %v3215_v55  ;;  %v10371_v29 = vmax.f32 %v10291_v59, %v10358_v28  ;;  %v3121_v5 = vrot.slane %v10155_v11, 2  ;;  %6552 = vmatmul.mubr.msk.f32.gmra.mrb[38].mxu0 %vm13098_vm10, %v13097_v37  ;;  %vm13104_vm0 = vmmov %vm13098_vm10 }
 0x2b5   : > { %v2992_v34 = vmax.f32 %v2864_v63, %v2960_v16  ;;  %v2801_v0 = vrot.slane %v10155_v11, 6  ;;  %v2897_v53 = vrot.slane %v10155_v11, 7  ;;  %v10379_v17 = vmax.f32 %v10139_v31, %v3497_v49  ;;  %v13103_v63 = vld [vmem:[#allocation55_spill] sm:$0xff] }
 0x2b6   : > { %v10382_v50 = vmax.f32 %v10064_v2, %v3247_v47  ;;  %v13099_v55 = vrot.slane %v10125_v15, 1  ;;  %vm13100_vm14 = vcmp.lt.s32.totalorder %v7195_v45, 7  ;;  %v13101_v23 = vrot.slane %v10188_v3, 1  ;;  %6554 = vmatprep.mubr.msk.f32.mxu0 %vm13104_vm0, %v13103_v63 }
 0x2b7   : > { %vm13102_vm3 = vmmov %vm13100_vm14  ;;  %v3498_v31 = vmax.f32 %v10106_v14, %v10371_v29  ;;  %v13105_v16 = vrot.slane %v10125_v15, 2  ;;  %vm13106_vm10 = vcmp.lt.s32.totalorder %v7195_v45, 6  ;;  %v13107_v49 = vrot.slane %v10125_v15, 6  ;;  %6623 = vmatmul.mubr.msk.f32.gmra.mrb[4].mxu1 %vm13104_vm0, %v10379_v17 }
 0x2b8   : > { %v3030_v46 = vsel %vm13100_vm14, %v13099_v55, %v3025_v38  ;;  %v3029_v25 = vsel %vm13102_vm3, %v3025_v38, %v13101_v23  ;;  %vm13108_vm14 = vcmp.lt.s32.totalorder %v7195_v45, 2  ;;  %v13109_v37 = vrot.slane %v10125_v15, 7 }
 0x2b9   : > { %v3126_v2 = vsel %vm13106_vm10, %v13105_v16, %v3121_v5  ;;  %v2806_v47 = vsel %vm13108_vm14, %v13107_v49, %v2801_v0  ;;  %vm13110_vm3 = vcmp.lt.s32.totalorder %v7195_v45, 1  ;;  %v10412_v14 = vmax.f32 %v10322_v61, %v10382_v50 }
 0x2ba   : > { %v2902_v38 = vsel %vm13110_vm3, %v13109_v37, %v2897_v53  ;;  %v3216_v55 = vmax.f32 %v3030_v46, %v3126_v2  ;;  %v3089_v16 = vsel %vm8958_vm2, %v3029_v25, -1e+30  ;;  %v10417_v40 = vmax.f32 %v10171_v26, %v3498_v31  ;;  %v13115_v2 = vld [vmem:[#allocation52_spill] sm:$0xff]  ;;  %v13141_v31 = vld [vmem:[#allocation15_spill] sm:$0xff] }
 0x2bb   : > { %v2993_v23 = vmax.f32 %v2806_v47, %v2902_v38  ;;  %v13112_v49 = vrot.slane %v10188_v3, 2  ;;  %v13113_v41 = vrot.slane %v10188_v3, 6  ;;  %v13114_v6 = vrot.slane %v10188_v3, 7  ;;  %6555 = vmatmul.mubr.msk.f32.gmra.mrb[40].mxu0 %vm13104_vm0, %v13115_v2 }
 0x2bc   : > { %v3499_v26 = vmax.f32 %v10152_v33, %v10412_v14  ;;  %v3248_v25 = vmax.f32 %v2992_v34, %v3216_v55  ;;  %v3123_v33 = vrot.slane %v9165_v24, 2  ;;  %v13124_v2 = vrot.slane %v10188_v3, 6 }
 0x2bd   : > { %v3125_v37 = vsel %vm13106_vm10, %v3121_v5, %v13112_v49  ;;  %v2805_v12 = vsel %vm13108_vm14, %v2801_v0, %v13113_v41  ;;  %v2901_v46 = vsel %vm13110_vm3, %v2897_v53, %v13114_v6  ;;  %v13118_v49 = vld [vmem:[#allocation65_spill] sm:$0xff]  ;;  %vm13119_vm10 = vmmov %vm13104_vm0  ;;  %v13121_v41 = vld [vmem:[#allocation70_spill] sm:$0xff]  ;;  %v3027_v53 = vrot.slane %v9165_v24, 1 }
 0x2be   : > { %v3185_v5 = vsel %vm8964_vm12, %v3125_v37, -1e+30  ;;  %v2866_v38 = vsel %vm8935_vm7, %v2805_v12, -1e+30  ;;  %6557 = vmatprep.mubr.msk.f32.mxu0 %vm13119_vm10, %v13118_v49  ;;  %vm13120_vm14 = vmmov %vm13104_vm0  ;;  %vm13122_vm3 = vnez %v13121_v41  ;;  %v10448_v34 = vmax.f32 %v10230_v52, %v3499_v26 }
 0x2bf   : > { %6625 = vmatprep.mubr.msk.f32.mxu1 %vm13120_vm14, %v10417_v40  ;;  %v3217_v6 = vmax.f32 %v3089_v16, %v3185_v5  ;;  %v2962_v0 = vsel %vm13122_vm3, %v2901_v46, -1e+30  ;;  %v3280_v55 = vmax.f32 %v10125_v15, %v3248_v25  ;;  %v13123_v37 = vrot.slane %v9165_v24, 6 }
 0x2c0   : > { %v2994_v12 = vmax.f32 %v2866_v38, %v2962_v0  ;;  %vm13125_vm0 = vcmp.lt.s32.totalorder %v7195_v45, 2  ;;  %v13126_v46 = vrot.slane %v10188_v3, 1  ;;  %vm13127_vm10 = vcmp.lt.s32.totalorder %v7195_v45, 7  ;;  %v13133_v38 = vld [vmem:[#allocation64_spill] sm:$0xff] }
 0x2c1   : > { %v2804_v16 = vsel %vm13125_vm0, %v13124_v2, %v13123_v37  ;;  %v3249_v5 = vmax.f32 %v2993_v23, %v3217_v6  ;;  %v13128_v41 = vrot.slane %v10188_v3, 2  ;;  %vm13129_vm14 = vcmp.lt.s32.totalorder %v7195_v45, 6 }
 0x2c2   : > { %v3028_v49 = vsel %vm13127_vm10, %v13126_v46, %v3027_v53  ;;  %v13130_v15 = vrot.slane %v9165_v24, 7  ;;  %v13131_v26 = vrot.slane %v10188_v3, 7  ;;  %vm13132_vm3 = vcmp.lt.s32.totalorder %v7195_v45, 1  ;;  %v13137_v46 = vld [vmem:[#allocation49_spill] sm:$0xff] }
 0x2c3   : > { %v3124_v52 = vsel %vm13129_vm14, %v13128_v41, %v3123_v33  ;;  %vm13134_vm0 = vcmask 15360   ;;  %v3378_v23 = vmax.f32 %v10358_v28, %v3280_v55  ;;  %v13136_v37 = vrot.slane %v8986_v32, 1 }
 0x2c4   : > { %v2900_v25 = vsel %vm13132_vm3, %v13131_v26, %v13130_v15  ;;  %6558 = vmatmul.mubr.msk.f32.gmra.mrb[42].mxu0 %vm13134_vm0, %v13133_v38  ;;  %vm13135_vm7 = vmmov %vm13134_vm0  ;;  %v3218_v6 = vmax.f32 %v3028_v49, %v3124_v52  ;;  %v3281_v2 = vmax.f32 %v10155_v11, %v3249_v5  ;;  %vm13138_vm14 = vnez %v13137_v46  ;;  %v13143_v52 = vld [vmem:[#allocation24_spill] sm:$0xff] }
 0x2c5   : > { %6626 = vmatmul.mubr.msk.f32.gmra.mrb[6].mxu1 %vm13135_vm7, %v10448_v34  ;;  %v2995_v0 = vmax.f32 %v2804_v16, %v2900_v25  ;;  %v3059_v41 = vsel %vm13127_vm10, %v3027_v53, %v13136_v37  ;;  %v13139_v26 = vrot.slane %v8986_v32, 2  ;;  %vm13140_vm3 = vcmp.lt.s32.totalorder %v7195_v45, 6  ;;  %vm13142_vm7 = vmmov %vm13134_vm0 }
 0x2c6   : > { %v3091_v15 = vsel %vm13138_vm14, %v3059_v41, -1e+30  ;;  %v12074_v47 = vrot.slane %v9288_v57, 6  ;;  %6560 = vmatprep.mubr.msk.f32.mxu0 %vm13142_vm7, %v13141_v31  ;;  %v3500_v16 = vmax.f32 %v10199_v9, %v3378_v23  ;;  %v3250_v49 = vmax.f32 %v2994_v12, %v3218_v6  ;;  %vm13146_vm10 = vmmov %vm13142_vm7  ;;  %v13147_v12 = vld [vmem:[#allocation63_spill] sm:$0xff] }
 0x2c7   : > { %v3155_v38 = vsel %vm13140_vm3, %v3123_v33, %v13139_v26  ;;  %vm13144_vm0 = vnez %v13143_v52  ;;  %v3506_v11 = vmax.f32 %v3378_v23, -1e+30  ;;  %v3379_v5 = vmax.f32 %v10382_v50, %v3281_v2  ;;  %v13145_v33 = vld [vmem:[#allocation69_spill] sm:$0xff]  ;;  %v13148_v23 = vld [vmem:[#allocation22_spill] sm:$0xff]  ;;  %vm13149_vm3 = vmmov %vm13142_vm7 }
 0x2c8   : > { %v3187_v53 = vsel %vm13144_vm0, %v3155_v38, -1e+30  ;;  %v12065_v32 = vrot.slane %v9377_v56, 6  ;;  %v12066_v37 = vrot.slane %v9437_v20, 6  ;;  %6561 = vmatmul.mubr.msk.f32.gmra.mrb[44].mxu0 %vm13146_vm10, %v13145_v33  ;;  %v10499_v41 = vmax.f32 %v10291_v59, %v3500_v16  ;;  %vm13151_vm10 = vmmov %vm13149_vm3 }
 0x2c9   : > { %v3219_v25 = vmax.f32 %v3091_v15, %v3187_v53  ;;  %v3282_v9 = vmax.f32 %v10188_v3, %v3250_v49  ;;  %v12075_v31 = vrot.slane %v9486_v19, 6  ;;  %v12076_v6 = vrot.slane %v13147_v12, 6  ;;  %6563 = vmatprep.mubr.msk.f32.mxu0 %vm13149_vm3, %v13148_v23 }
 0x2ca   : > { %v3501_v15 = vmax.f32 %v10253_v48, %v3379_v5  ;;  %v3507_v38 = vmax.f32 %v3379_v5, -1e+30  ;;  %vm13150_vm7 = vcmp.lt.s32.totalorder %v7195_v45, 2  ;;  %6628 = vmatprep.mubr.msk.f32.mxu1 %vm13151_vm10, %v10499_v41  ;;  %v13186_v63 = vrot.slane %v13147_v12, 6 }
 0x2cb   : > { %v3251_v26 = vmax.f32 %v2995_v0, %v3219_v25  ;;  %v3601_v59 = vsel %vm13150_vm7, %v12065_v32, %v12066_v37  ;;  %v3470_v3 = vmax.f32 %v3280_v55, %v3282_v9  ;;  %v3472_v16 = vmax.f32 %v3282_v9, -1e+30  ;;  %vm13153_vm3 = vmmov %vm13150_vm7 }
 0x2cc   : > { %v10515_v49 = vmax.f32 %v3282_v9, %v3506_v11  ;;  %v3599_v48 = vsel %vm13153_vm3, %v12075_v31, %v12076_v6  ;;  %v10524_v0 = vmax.f32 %v10322_v61, %v3501_v15  ;;  %v3606_v25 = vsel %vm7345_vm6, %v3601_v59, -1e+30  ;;  %v13156_v11 = vld [vmem:[#allocation20_spill] sm:$0xff]  ;;  %vm13157_vm7 = vmmov %vm13151_vm10 }
 0x2cd   : > { %v3283_v53 = vmax.f32 %v9165_v24, %v3251_v26  ;;  %v3608_v23 = vsel %vm7408_vm9, %v3599_v48, -1e+30  ;;  %6564 = vmatmul.mubr.msk.f32.gmra.mrb[46].mxu0 %vm13157_vm7, %v13156_v11  ;;  %v3502_v9 = vmax.f32 %v10311_v62, %v3470_v3  ;;  %v3504_v32 = vmax.f32 %v10371_v29, %v3472_v16  ;;  %vm13158_vm10 = vmmov %vm13157_vm7 }
 0x2ce   : > { %13152 = vst [vmem:[#allocation80_spill] sm:$0xff] %v10515_v49  ;;  %v12073_v37 = vrot.slane %v9288_v57, 7  ;;  %v12069_v61 = vrot.slane %v9377_v56, 7  ;;  %6629 = vmatmul.mubr.msk.f32.gmra.mrb[8].mxu1 %vm13158_vm10, %v10524_v0  ;;  %v12070_v59 = vrot.slane %v9437_v20, 7  ;;  %v3639_v62 = vrot.slane %v9486_v19, 7  ;;  %vm13160_vm6 = vmmov %vm13157_vm7 }
 0x2cf   : > { %v3471_v24 = vmax.f32 %v3281_v2, %v3283_v53  ;;  %v3473_v15 = vmax.f32 %v3283_v53, -1e+30  ;;  %v10539_v26 = vmax.f32 %v3283_v53, %v3507_v38  ;;  %v10543_v48 = vmax.f32 %v10358_v28, %v3502_v9 }
 0x2d0   : > { %v10545_v5 = vmax.f32 %v3280_v55, %v3504_v32  ;;  %v12068_v29 = vrot.slane %v13147_v12, 7  ;;  %vm13161_vm9 = vcmp.lt.s32.totalorder %v7195_v45, 1  ;;  %v3765_v55 = vrot.slane %v9377_v56, 1 }
 0x2d1   : > { %v3503_v3 = vmax.f32 %v10342_v27, %v3471_v24  ;;  %v3505_v16 = vmax.f32 %v10412_v14, %v3473_v15  ;;  %v12067_v33 = vrot.slane %v10539_v26, 6  ;;  %v12072_v38 = vrot.slane %v10539_v26, 7  ;;  %6631 = vmatprep.mubr.msk.f32.mxu1 %vm13160_vm6, %v10543_v48  ;;  %vm13162_vm3 = vmmov %vm13161_vm9 }
 0x2d2   : > { %13159 = vst [vmem:[#allocation74_spill] sm:$0xff] %v10545_v5  ;;  %v3695_v28 = vsel %vm13161_vm9, %v3639_v62, %v12068_v29  ;;  %v3697_v27 = vsel %vm13162_vm3, %v12069_v61, %v12070_v59  ;;  %v12071_v14 = vrot.slane %v9288_v57, 1  ;;  %vm13164_vm7 = vcmp.lt.s32.totalorder %v7195_v45, 2  ;;  %vm13165_vm10 = vmmov %vm13162_vm3 }
 0x2d3   : > { %v10568_v32 = vmax.f32 %v10382_v50, %v3503_v3  ;;  %v10570_v53 = vmax.f32 %v3281_v2, %v3505_v16  ;;  %v3603_v11 = vsel %vm13164_vm7, %v12067_v33, %v12074_v47  ;;  %v3699_v9 = vsel %vm13165_vm10, %v12072_v38, %v12073_v37  ;;  %v13168_v3 = vld [vmem:[#allocation19_spill] sm:$0xff]  ;;  %v13171_v33 = vld [vmem:[#allocation29_spill] sm:$0xff] }
 0x2d4   : > { %v3604_v50 = vsel %vm8774_vm13, %v3603_v11, -1e+30  ;;  %v3700_v2 = vsel %vm8780_vm1, %v3699_v9, -1e+30  ;;  %vm13169_vm6 = vnez %v13168_v3  ;;  %vm13170_vm9 = vcmask 15360  }
 0x2d5   : > { %13163 = vst [vmem:[#allocation75_spill] sm:$0xff] %v10570_v53  ;;  %v3702_v16 = vsel %vm13169_vm6, %v3697_v27, -1e+30  ;;  %6632 = vmatmul.mubr.msk.f32.gmra.mrb[10].mxu1 %vm13170_vm9, %v10568_v32  ;;  %vm13172_vm3 = vnez %v13171_v33  ;;  %v3732_v61 = vmax.f32 %v3604_v50, %v3700_v2  ;;  %v3766_v59 = vrot.slane %v9437_v20, 1  ;;  %vm13174_vm13 = vmmov %vm13170_vm9 }
 0x2d6   : > { %v3704_v29 = vsel %vm13172_vm3, %v3695_v28, -1e+30  ;;  %vm13173_vm7 = vcmp.lt.s32.totalorder %v7195_v45, 7  ;;  %6634 = vmatprep.mubr.msk.f32.mxu1 %vm13174_vm13, %v10545_v5  ;;  %v3734_v9 = vmax.f32 %v3606_v25, %v3702_v16  ;;  %v3767_v27 = vrot.slane %v9486_v19, 1 }
 0x2d7   : > { %v3826_v11 = vsel %vm13173_vm7, %v12071_v14, %v3765_v55  ;;  %v3768_v24 = vrot.slane %v13147_v12, 1  ;;  %v3769_v15 = vrot.slane %v9597_v44, 1  ;;  %v3736_v33 = vmax.f32 %v3608_v23, %v3704_v29  ;;  %vm13175_vm1 = vmmov %vm13173_vm7 }
 0x2d8   : > { %v12077_v28 = vrot.slane %v9663_v51, 1  ;;  %v12078_v50 = vrot.slane %v9288_v57, 2  ;;  %v3861_v2 = vrot.slane %v9377_v56, 2  ;;  %vm13176_vm10 = vmmov %vm13175_vm1  ;;  %v3862_v16 = vrot.slane %v9437_v20, 2 }
 0x2d9   : > { %v3822_v3 = vsel %vm13175_vm1, %v3768_v24, %v3769_v15  ;;  %v3823_v14 = vsel %vm13176_vm10, %v3767_v27, %v3768_v24  ;;  %vm13177_vm6 = vmmov %vm13175_vm1  ;;  %6635 = vmatmul.mubr.msk.f32.gmra.mrb[12].mxu1 %vm13170_vm9, %v10570_v53  ;;  %v3863_v29 = vrot.slane %v9486_v19, 2  ;;  %v3864_v38 = vrot.slane %v13147_v12, 2 }
 0x2da   : > { %v3825_v25 = vsel %vm13177_vm6, %v3765_v55, %v3766_v59  ;;  %vm13178_vm3 = vmmov %vm13175_vm1  ;;  %v3865_v37 = vrot.slane %v9597_v44, 2  ;;  %v3866_v24 = vrot.slane %v9663_v51, 2  ;;  %v13189_v53 = vrot.slane %v9486_v19, 6 }
 0x2db   : > { %v3824_v23 = vsel %vm13178_vm3, %v3766_v59, %v3767_v27  ;;  %vm13179_vm7 = vmmov %vm13170_vm9  ;;  %v3545_v27 = vrot.slane %v9597_v44, 6  ;;  %v13190_v5 = vrot.slane %v9437_v20, 6 }
 0x2dc   : > { %6637 = vmatprep.mubr.msk.f32.mxu1 %vm13179_vm7, %v10515_v49  ;;  %vm13180_vm13 = vmmov %vm13175_vm1  ;;  %vm13181_vm1 = vcmp.lt.s32.totalorder %v7195_v45, 6  ;;  %vm13187_vm7 = vcmp.lt.s32.totalorder %v7195_v45, 2 }
 0x2dd   : > { %v3821_v55 = vsel %vm13180_vm13, %v3769_v15, %v12077_v28  ;;  %v3922_v59 = vsel %vm13181_vm1, %v12078_v50, %v3861_v2  ;;  %vm13182_vm10 = vmmov %vm13181_vm1  ;;  %v3598_v50 = vsel %vm13187_vm7, %v13186_v63, %v3545_v27  ;;  %vm13188_vm13 = vcmask 15360  }
 0x2de   : > { %v3918_v47 = vsel %vm13182_vm10, %v3864_v38, %v3865_v37  ;;  %vm13183_vm6 = vmmov %vm13181_vm1  ;;  %v3956_v52 = vmax.f32 %v3826_v11, %v3922_v59  ;;  %6638 = vmatmul.mubr.msk.f32.gmra.mrb[14].mxu1 %vm13188_vm13, %v10539_v26  ;;  %v3641_v63 = vrot.slane %v9597_v44, 7 }
 0x2df   : > { %v3920_v31 = vsel %vm13183_vm6, %v3862_v16, %v3863_v29  ;;  %vm13184_vm9 = vmmov %vm13181_vm1  ;;  %v3960_v46 = vmax.f32 %v3822_v3, %v3918_v47  ;;  %v13193_v47 = vrot.slane %v9288_v57, 6  ;;  %vm13196_vm6 = vcmp.lt.s32.totalorder %v7195_v45, 1 }
 0x2e0   : > { %v3921_v6 = vsel %vm13184_vm9, %v3861_v2, %v3862_v16  ;;  %vm13185_vm3 = vmmov %vm13181_vm1  ;;  %v3958_v28 = vmax.f32 %v3824_v23, %v3920_v31  ;;  %v3988_v49 = vmax.f32 %v3732_v61, %v3956_v52  ;;  %v13195_v52 = vrot.slane %v9437_v20, 7 }
 0x2e1   : > { %v3919_v15 = vsel %vm13185_vm3, %v3863_v29, %v3864_v38  ;;  %vm13191_vm1 = vmmov %vm13187_vm7  ;;  %v13192_v38 = vrot.slane %v9377_v56, 6  ;;  %v3992_v3 = vmax.f32 %v3736_v33, %v3960_v46  ;;  %v13197_v16 = vrot.slane %v9377_v56, 7 }
 0x2e2   : > { %v3600_v11 = vsel %vm13191_vm1, %v13190_v5, %v13189_v53  ;;  %vm13194_vm10 = vmmov %vm13191_vm1  ;;  %v3990_v2 = vmax.f32 %v3734_v9, %v3958_v28  ;;  %v3696_v61 = vsel %vm13196_vm6, %v13195_v52, %v3639_v62  ;;  %v13198_v5 = vrot.slane %v9288_v57, 7 }
 0x2e3   : > { %v3602_v31 = vsel %vm13194_vm10, %v13193_v47, %v13192_v38  ;;  %vm13199_vm9 = vmmov %vm13196_vm6  ;;  %v3917_v23 = vsel %vm13185_vm3, %v3865_v37, %v3866_v24  ;;  %v10673_v29 = vmax.f32 %v9288_v57, %v3988_v49  ;;  %v13200_v46 = vrot.slane %v13147_v12, 7  ;;  %v13206_v57 = vld [vmem:[#allocation30_spill] sm:$0xff] }
 0x2e4   : > { %v3698_v53 = vsel %vm13199_vm9, %v13198_v5, %v13197_v16  ;;  %vm13201_vm7 = vmmov %vm13196_vm6  ;;  %v10680_v62 = vmax.f32 %v9437_v20, %v3990_v2  ;;  %v10683_v28 = vmax.f32 %v13147_v12, %v3992_v3  ;;  %v3735_v59 = vmax.f32 %v3600_v11, %v3696_v61  ;;  %v13204_v16 = vld [vmem:[#allocation50_spill] sm:$0xff]  ;;  %v13210_v2 = vld [vmem:[#allocation51_spill] sm:$0xff] }
 0x2e5   : > { %v3694_v9 = vsel %vm13201_vm7, %v13200_v46, %v3641_v63  ;;  %v3733_v33 = vmax.f32 %v3602_v31, %v3698_v53  ;;  %v3829_v47 = vsel %vm7390_vm8, %v3825_v25, -1e+30  ;;  %v3831_v49 = vsel %vm12749_vm4, %v3823_v14, -1e+30  ;;  %v13208_v12 = vld [vmem:[#allocation42_spill] sm:$0xff]  ;;  %vm13213_vm4 = vmmov %vm13201_vm7 }
 0x2e6   : > { %v3737_v37 = vmax.f32 %v3598_v50, %v3694_v9  ;;  %vm13205_vm13 = vnez %v13204_v16  ;;  %vm13207_vm1 = vnez %v13206_v57  ;;  %v10695_v20 = vmax.f32 %v10680_v62, %v10683_v28  ;;  %v13216_v16 = vld [vmem:[#allocation44_spill] sm:$0xff] }
 0x2e7   : > { %v3833_v5 = vsel %vm13205_vm13, %v3821_v55, -1e+30  ;;  %v3925_v31 = vsel %vm13207_vm1, %v3921_v6, -1e+30  ;;  %vm13209_vm10 = vnez %v13208_v12  ;;  %vm13211_vm6 = vnez %v13210_v2 }
 0x2e8   : > { %v3927_v11 = vsel %vm13209_vm10, %v3919_v15, -1e+30  ;;  %v3929_v25 = vsel %vm13211_vm6, %v3917_v23, -1e+30  ;;  %v3957_v50 = vmax.f32 %v3829_v47, %v3925_v31  ;;  %v3546_v14 = vrot.slane %v9663_v51, 6  ;;  %vm13223_vm6 = vmmov %vm13213_vm4 }
 0x2e9   : > { %v3959_v3 = vmax.f32 %v3831_v49, %v3927_v11  ;;  %v3961_v61 = vmax.f32 %v3833_v5, %v3929_v25  ;;  %v3642_v55 = vrot.slane %v9663_v51, 7  ;;  %v4244_v57 = vmax.f32 %v10695_v20, -1e+30  ;;  %v13214_v49 = vld [vmem:[#allocation43_spill] sm:$0xff] }
 0x2ea   : > { %v3989_v6 = vmax.f32 %v3733_v33, %v3957_v50  ;;  %v3771_v53 = vrot.slane %v9694_v8, 1  ;;  %v3867_v46 = vrot.slane %v9694_v8, 2  ;;  %vm13212_vm8 = vcmp.lt.s32.totalorder %v7195_v45, 2 }
 0x2eb   : > { %v3991_v9 = vmax.f32 %v3735_v59, %v3959_v3  ;;  %v3993_v38 = vmax.f32 %v3737_v37, %v3961_v61  ;;  %v3597_v15 = vsel %vm13212_vm8, %v3545_v27, %v3546_v14  ;;  %v3693_v23 = vsel %vm13213_vm4, %v3641_v63, %v3642_v55  ;;  %vm13222_vm10 = vmmov %vm13212_vm8 }
 0x2ec   : > { %v4276_v47 = vmax.f32 %v10673_v29, %v4244_v57  ;;  %v10712_v52 = vmax.f32 %v9377_v56, %v3989_v6  ;;  %vm13215_vm9 = vnez %v13214_v49  ;;  %vm13217_vm3 = vnez %v13216_v16 }
 0x2ed   : > { %v3610_v33 = vsel %vm13215_vm9, %v3597_v15, -1e+30  ;;  %v3706_v5 = vsel %vm13217_vm3, %v3693_v23, -1e+30  ;;  %v10719_v59 = vmax.f32 %v9486_v19, %v3991_v9  ;;  %v10722_v37 = vmax.f32 %v9597_v44, %v3993_v38  ;;  %v13225_v23 = vld [vmem:[#allocation56_spill] sm:$0xff]  ;;  %vm13228_vm3 = vmmov %vm13222_vm10 }
 0x2ee   : > { %v3738_v27 = vmax.f32 %v3610_v33, %v3706_v5  ;;  %v13218_v63 = vrot.slane %v9663_v51, 1  ;;  %vm13219_vm7 = vcmp.lt.s32.totalorder %v7195_v45, 7  ;;  %vm13220_vm13 = vcmask 15360   ;;  %v13229_v5 = vld [vmem:[#allocation57_spill] sm:$0xff] }
 0x2ef   : > { %6642 = vmatprep.mubr.msk.f32.mxu1 %vm13220_vm13, %v4276_v47  ;;  %vm13221_vm1 = vcmp.lt.s32.totalorder %v7195_v45, 6  ;;  %v4118_v12 = vmax.f32 %v10673_v29, -1e+30  ;;  %v3547_v11 = vrot.slane %v9694_v8, 6  ;;  %v3643_v19 = vrot.slane %v9694_v8, 7  ;;  %vm13224_vm8 = vmmov %vm13219_vm7 }
 0x2f0   : > { %v3820_v31 = vsel %vm13219_vm7, %v13218_v63, %v3771_v53  ;;  %v3916_v56 = vsel %vm13221_vm1, %v3866_v24, %v3867_v46  ;;  %v10736_v44 = vmax.f32 %v10719_v59, %v10722_v37  ;;  %v3772_v25 = vrot.slane %v9760_v4, 1  ;;  %vm13227_vm9 = vmmov %vm13221_vm1 }
 0x2f1   : > { %v3962_v2 = vmax.f32 %v3820_v31, %v3916_v56  ;;  %v3868_v50 = vrot.slane %v9760_v4, 2  ;;  %v3596_v3 = vsel %vm13222_vm10, %v3546_v14, %v3547_v11  ;;  %v3692_v24 = vsel %vm13223_vm6, %v3642_v55, %v3643_v19  ;;  %vm13233_vm1 = vmmov %vm13223_vm6 }
 0x2f2   : > { %v4119_v61 = vmax.f32 %v10712_v52, -1e+30  ;;  %v3548_v57 = vrot.slane %v9760_v4, 6  ;;  %v4245_v6 = vmax.f32 %v10736_v44, -1e+30  ;;  %v3739_v38 = vmax.f32 %v3596_v3, %v3692_v24 }
 0x2f3   : > { %v3994_v9 = vmax.f32 %v3738_v27, %v3962_v2  ;;  %v3819_v15 = vsel %vm13224_vm8, %v3771_v53, %v3772_v25  ;;  %vm13226_vm4 = vnez %v13225_v23  ;;  %v3915_v14 = vsel %vm13227_vm9, %v3867_v46, %v3868_v50  ;;  %v13231_v53 = vld [vmem:[#allocation53_spill] sm:$0xff]  ;;  %v13235_v2 = vld [vmem:[#allocation54_spill] sm:$0xff] }
 0x2f4   : > { %v3835_v47 = vsel %vm13226_vm4, %v3819_v15, -1e+30  ;;  %v3595_v55 = vsel %vm13228_vm3, %v3547_v11, %v3548_v57  ;;  %v3644_v49 = vrot.slane %v9760_v4, 7  ;;  %v4277_v33 = vmax.f32 %v10712_v52, %v4245_v6  ;;  %vm13237_vm4 = vmmov %vm13227_vm9 }
 0x2f5   : > { %v10758_v16 = vmax.f32 %v9663_v51, %v3994_v9  ;;  %vm13230_vm7 = vnez %v13229_v5  ;;  %vm13232_vm13 = vnez %v13231_v53  ;;  %v3773_v56 = vrot.slane %v9807_v35, 1  ;;  %vm13238_vm9 = vmmov %vm13228_vm3 }
 0x2f6   : > { %v3931_v27 = vsel %vm13230_vm7, %v3915_v14, -1e+30  ;;  %v3612_v63 = vsel %vm13232_vm13, %v3595_v55, -1e+30  ;;  %v3691_v46 = vsel %vm13233_vm1, %v3643_v19, %v3644_v49  ;;  %v3869_v11 = vrot.slane %v9807_v35, 2  ;;  %vm13239_vm3 = vmmov %vm13233_vm1 }
 0x2f7   : > { %v3963_v31 = vmax.f32 %v3835_v47, %v3931_v27  ;;  %vm13234_vm10 = vcmask 15360   ;;  %v10771_v51 = vmax.f32 %v10683_v28, %v10758_v16  ;;  %vm13236_vm6 = vnez %v13235_v2  ;;  %vm13240_vm7 = vmmov %vm13224_vm8 }
 0x2f8   : > { %6643 = vmatmul.mubr.msk.f32.vlgmr.msra.gmra.mrb[16].mxu1 %vm13234_vm10, %v4277_v33  ;;  %v3708_v3 = vsel %vm13236_vm6, %v3691_v46, -1e+30  ;;  %v4120_v24 = vmax.f32 %v10673_v29, %v10680_v62  ;;  %v3549_v6 = vrot.slane %v9807_v35, 6  ;;  %v3818_v15 = vsel %vm13224_vm8, %v3772_v25, %v3773_v56  ;;  %vm13241_vm13 = vmmov %vm13237_vm4  ;;  %v13245_v46 = vld [vmem:[#allocation73_spill] sm:$0xff] }
 0x2f9   : > { %v3995_v9 = vmax.f32 %v3739_v38, %v3963_v31  ;;  %v3740_v19 = vmax.f32 %v3612_v63, %v3708_v3  ;;  %v3914_v23 = vsel %vm13237_vm4, %v3868_v50, %v3869_v11  ;;  %v4246_v47 = vmax.f32 %v4118_v12, %v10771_v51  ;;  %vm13242_vm1 = vmmov %vm13234_vm10 }
 0x2fa   : > { %v3964_v14 = vmax.f32 %v3818_v15, %v3914_v23  ;;  %v3594_v55 = vsel %vm13238_vm9, %v3548_v57, %v3549_v6  ;;  %v3645_v33 = vrot.slane %v9807_v35, 7  ;;  %v3774_v38 = vrot.slane %v9873_v18, 1  ;;  %vm13247_vm8 = vmmov %vm13238_vm9 }
 0x2fb   : > { %v10787_v29 = vmax.f32 %v9694_v8, %v3995_v9  ;;  %v3870_v5 = vrot.slane %v9873_v18, 2  ;;  %v4121_v25 = vmax.f32 %v10712_v52, %v10719_v59  ;;  %v4278_v50 = vmax.f32 %v10680_v62, %v4246_v47  ;;  %v13243_v52 = vld [vmem:[#allocation72_spill] sm:$0xff]  ;;  %vm13250_vm9 = vmmov %vm13239_vm3 }
 0x2fc   : > { %v3996_v27 = vmax.f32 %v3740_v19, %v3964_v14  ;;  %v3690_v12 = vsel %vm13239_vm3, %v3644_v49, %v3645_v33  ;;  %v3550_v57 = vrot.slane %v9873_v18, 6  ;;  %v3817_v63 = vsel %vm13240_vm7, %v3773_v56, %v3774_v38  ;;  %v13248_v19 = vld [vmem:[#allocation60_spill] sm:$0xff] }
 0x2fd   : > { %v10799_v53 = vmax.f32 %v10722_v37, %v10787_v29  ;;  %v3741_v8 = vmax.f32 %v3594_v55, %v3690_v12  ;;  %v3913_v31 = vsel %vm13241_vm13, %v3869_v11, %v3870_v5  ;;  %6645 = vmatprep.mubr.msk.f32.mxu1 %vm13242_vm1, %v4278_v50  ;;  %vm13244_vm10 = vnez %v13243_v52  ;;  %v13251_v12 = vld [vmem:[#allocation61_spill] sm:$0xff] }
 0x2fe   : > { %v10807_v62 = vmax.f32 %v9760_v4, %v3996_v27  ;;  %v3837_v49 = vsel %vm13244_vm10, %v3817_v63, -1e+30  ;;  %vm13246_vm6 = vnez %v13245_v46  ;;  %v3593_v3 = vsel %vm13247_vm8, %v3549_v6, %v3550_v57  ;;  %vm13253_vm10 = vmmov %vm13247_vm8 }
 0x2ff   : > { %v3933_v2 = vsel %vm13246_vm6, %v3913_v31, -1e+30  ;;  %v4247_v9 = vmax.f32 %v4119_v61, %v10799_v53  ;;  %vm13249_vm4 = vnez %v13248_v19  ;;  %v3646_v15 = vrot.slane %v9873_v18, 7  ;;  %vm13254_vm6 = vmmov %vm13250_vm9 }
 0x300   : > { %v3965_v56 = vmax.f32 %v3837_v49, %v3933_v2  ;;  %v3614_v11 = vsel %vm13249_vm4, %v3593_v3, -1e+30  ;;  %v10821_v4 = vmax.f32 %v10758_v16, %v10807_v62  ;;  %v3775_v23 = vrot.slane %v9902_v42, 1  ;;  %vm13255_vm8 = vmmov %vm13242_vm1 }
 0x301   : > { %v3871_v47 = vrot.slane %v9902_v42, 2  ;;  %v3551_v14 = vrot.slane %v9902_v42, 6  ;;  %v4279_v6 = vmax.f32 %v10719_v59, %v4247_v9  ;;  %v3689_v61 = vsel %vm13250_vm9, %v3645_v33, %v3646_v15  ;;  %vm13256_vm4 = vmmov %vm13240_vm7 }
 0x302   : > { %v3997_v55 = vmax.f32 %v3741_v8, %v3965_v56  ;;  %v3647_v50 = vrot.slane %v9902_v42, 7  ;;  %v4248_v27 = vmax.f32 %v4120_v24, %v10821_v4  ;;  %vm13252_vm3 = vnez %v13251_v12  ;;  %vm13257_vm9 = vmmov %vm13241_vm13 }
 0x303   : > { %v3710_v63 = vsel %vm13252_vm3, %v3689_v61, -1e+30  ;;  %v3816_v31 = vsel %vm13240_vm7, %v3774_v38, %v3775_v23  ;;  %v3912_v52 = vsel %vm13241_vm13, %v3870_v5, %v3871_v47  ;;  %6646 = vmatmul.mubr.msk.f32.gmra.mrb[18].mxu1 %vm13242_vm1, %v4279_v6  ;;  %v3592_v49 = vsel %vm13253_vm10, %v3550_v57, %v3551_v14  ;;  %v13258_v6 = vld [vmem:[#allocation2_spill] sm:$0xff]  ;;  %v13260_v61 = vld [vmem:[#allocation31_spill] sm:$0xff]  ;;  %vm13262_vm13 = vmmov %vm13253_vm10 }
 0x304   : > { %v10839_v59 = vmax.f32 %v9807_v35, %v3997_v55  ;;  %v3742_v8 = vmax.f32 %v3614_v11, %v3710_v63  ;;  %v3966_v33 = vmax.f32 %v3816_v31, %v3912_v52  ;;  %v4280_v24 = vmax.f32 %v10683_v28, %v4248_v27  ;;  %vm13263_vm1 = vmmov %vm13254_vm6  ;;  %v13265_v31 = vld [vmem:[#allocation66_spill] sm:$0xff] }
 0x305   : > { %v3688_v46 = vsel %vm13254_vm6, %v3646_v15, %v3647_v50  ;;  %v3776_v38 = vrot.slane %v9966_v30, 1  ;;  %v3872_v2 = vrot.slane %v9966_v30, 2  ;;  %v3552_v9 = vrot.slane %v9966_v30, 6  ;;  %vm13264_vm10 = vmmov %vm13256_vm4 }
 0x306   : > { %v10850_v5 = vmax.f32 %v10787_v29, %v10839_v59  ;;  %v3998_v35 = vmax.f32 %v3742_v8, %v3966_v33  ;;  %v3743_v3 = vmax.f32 %v3592_v49, %v3688_v46  ;;  %6648 = vmatprep.mubr.msk.f32.mxu1 %vm13255_vm8, %v4280_v24  ;;  %v3648_v56 = vrot.slane %v9966_v30, 7  ;;  %v13267_v8 = vld [vmem:[#allocation67_spill] sm:$0xff] }
 0x307   : > { %v3815_v28 = vsel %vm13256_vm4, %v3775_v23, %v3776_v38  ;;  %v3911_v57 = vsel %vm13257_vm9, %v3871_v47, %v3872_v2  ;;  %v3777_v19 = vrot.slane %v10012_v58, 1  ;;  %vm13259_vm3 = vnez %v13258_v6 }
 0x308   : > { %v4249_v11 = vmax.f32 %v4121_v25, %v10850_v5  ;;  %v10862_v15 = vmax.f32 %v9873_v18, %v3998_v35  ;;  %v3839_v55 = vsel %vm13259_vm3, %v3815_v28, -1e+30  ;;  %vm13261_vm7 = vnez %v13260_v61  ;;  %vm13270_vm3 = vmmov %vm13262_vm13 }
 0x309   : > { %v3935_v27 = vsel %vm13261_vm7, %v3911_v57, -1e+30  ;;  %v3591_v23 = vsel %vm13262_vm13, %v3551_v14, %v3552_v9  ;;  %v3687_v47 = vsel %vm13263_vm1, %v3647_v50, %v3648_v56  ;;  %v3814_v63 = vsel %vm13264_vm10, %v3776_v38, %v3777_v19  ;;  %vm13271_vm7 = vmmov %vm13263_vm1 }
 0x30a   : > { %v3967_v12 = vmax.f32 %v3839_v55, %v3935_v27  ;;  %v4281_v25 = vmax.f32 %v10722_v37, %v4249_v11  ;;  %v10877_v18 = vmax.f32 %v10807_v62, %v10862_v15  ;;  %vm13266_vm6 = vnez %v13265_v31  ;;  %vm13272_vm13 = vmmov %vm13264_vm10  ;;  %v13280_v31 = vld [vmem:[#allocation4_spill] sm:$0xff] }
 0x30b   : > { %v3616_v52 = vsel %vm13266_vm6, %v3591_v23, -1e+30  ;;  %vm13268_vm8 = vnez %v13267_v8  ;;  %v3873_v24 = vrot.slane %v10012_v58, 2  ;;  %v3553_v50 = vrot.slane %v10012_v58, 6  ;;  %vm13275_vm10 = vmmov %vm13257_vm9  ;;  %v13277_v23 = vld [vmem:[#allocation85_spill] sm:$0xff] }
 0x30c   : > { %v3712_v33 = vsel %vm13268_vm8, %v3687_v47, -1e+30  ;;  %v3999_v49 = vmax.f32 %v3743_v3, %v3967_v12  ;;  %vm13269_vm4 = vcmask 15360   ;;  %v4250_v37 = vmax.f32 %v10695_v20, %v10877_v18 }
 0x30d   : > { %v3744_v14 = vmax.f32 %v3616_v52, %v3712_v33  ;;  %6649 = vmatmul.mubr.msk.f32.gmra.mrb[20].mxu1 %vm13269_vm4, %v4281_v25  ;;  %v3649_v46 = vrot.slane %v10012_v58, 7  ;;  %v3778_v38 = vrot.slane %v10057_v13, 1  ;;  %v3874_v35 = vrot.slane %v10057_v13, 2  ;;  %vm13276_vm6 = vmmov %vm13269_vm4 }
 0x30e   : > { %v10892_v28 = vmax.f32 %v9902_v42, %v3999_v49  ;;  %v3910_v3 = vsel %vm13257_vm9, %v3872_v2, %v3873_v24  ;;  %v3590_v57 = vsel %vm13270_vm3, %v3552_v9, %v3553_v50  ;;  %v3554_v11 = vrot.slane %v10057_v13, 6  ;;  %v13273_v2 = vld [vmem:[#allocation3_spill] sm:$0xff]  ;;  %vm13279_vm4 = vmmov %vm13270_vm3 }
 0x30f   : > { %v4282_v6 = vmax.f32 %v10758_v16, %v4250_v37  ;;  %v3968_v20 = vmax.f32 %v3814_v63, %v3910_v3  ;;  %v3686_v55 = vsel %vm13271_vm7, %v3648_v56, %v3649_v46  ;;  %v3813_v61 = vsel %vm13272_vm13, %v3777_v19, %v3778_v38  ;;  %vm13282_vm3 = vmmov %vm13271_vm7 }
 0x310   : > { %v10906_v42 = vmax.f32 %v10839_v59, %v10892_v28  ;;  %v3745_v27 = vmax.f32 %v3590_v57, %v3686_v55  ;;  %vm13274_vm1 = vnez %v13273_v2  ;;  %v3909_v9 = vsel %vm13275_vm10, %v3873_v24, %v3874_v35 }
 0x311   : > { %v3841_v12 = vsel %vm13274_vm1, %v3813_v61, -1e+30  ;;  %6651 = vmatprep.mubr.msk.f32.mxu1 %vm13276_vm6, %v4282_v6  ;;  %v4000_v16 = vmax.f32 %v3744_v14, %v3968_v20  ;;  %vm13278_vm8 = vnez %v13277_v23  ;;  %v3589_v19 = vsel %vm13279_vm4, %v3553_v50, %v3554_v11  ;;  %vm13285_vm1 = vmmov %vm13275_vm10 }
 0x312   : > { %v3937_v56 = vsel %vm13278_vm8, %v3909_v9, -1e+30  ;;  %v3650_v47 = vrot.slane %v10057_v13, 7  ;;  %v4251_v63 = vmax.f32 %v10736_v44, %v10906_v42  ;;  %vm13281_vm9 = vnez %v13280_v31  ;;  %v13283_v44 = vld [vmem:[#allocation76_spill] sm:$0xff]  ;;  %vm13286_vm10 = vmmov %vm13279_vm4 }
 0x313   : > { %v3969_v25 = vmax.f32 %v3841_v12, %v3937_v56  ;;  %v3618_v52 = vsel %vm13281_vm9, %v3589_v19, -1e+30  ;;  %v3779_v8 = vrot.slane %v10102_v60, 1  ;;  %v10924_v33 = vmax.f32 %v9966_v30, %v4000_v16  ;;  %vm13287_vm8 = vmmov %vm13282_vm3  ;;  %v13289_v56 = vld [vmem:[#allocation5_spill] sm:$0xff] }
 0x314   : > { %v3685_v49 = vsel %vm13282_vm3, %v3649_v46, %v3650_v47  ;;  %v3875_v14 = vrot.slane %v10102_v60, 2  ;;  %v3555_v24 = vrot.slane %v10102_v60, 6  ;;  %v4283_v50 = vmax.f32 %v10787_v29, %v4251_v63  ;;  %vm13288_vm4 = vmmov %vm13272_vm13 }
 0x315   : > { %v4001_v37 = vmax.f32 %v3745_v27, %v3969_v25  ;;  %vm13284_vm7 = vnez %v13283_v44  ;;  %v3812_v57 = vsel %vm13272_vm13, %v3778_v38, %v3779_v8  ;;  %v10937_v30 = vmax.f32 %v10862_v15, %v10924_v33  ;;  %vm13291_vm3 = vmmov %vm13285_vm1  ;;  %v13299_v44 = vld [vmem:[#allocation84_spill] sm:$0xff] }
 0x316   : > { %v3714_v3 = vsel %vm13284_vm7, %v3685_v49, -1e+30  ;;  %v3908_v46 = vsel %vm13285_vm1, %v3874_v35, %v3875_v14  ;;  %v3588_v20 = vsel %vm13286_vm10, %v3554_v11, %v3555_v24  ;;  %6652 = vmatmul.mubr.msk.f32.gmra.mrb[22].mxu1 %vm13276_vm6, %v4283_v50  ;;  %v3651_v61 = vrot.slane %v10102_v60, 7  ;;  %vm13294_vm13 = vmmov %vm13286_vm10  ;;  %v13296_v49 = vld [vmem:[#allocation6_spill] sm:$0xff] }
 0x317   : > { %v3746_v6 = vmax.f32 %v3618_v52, %v3714_v3  ;;  %v10945_v29 = vmax.f32 %v10012_v58, %v4001_v37  ;;  %v3970_v55 = vmax.f32 %v3812_v57, %v3908_v46  ;;  %v3780_v38 = vrot.slane %v10136_v22, 1  ;;  %v13292_v52 = vld [vmem:[#allocation92_spill] sm:$0xff]  ;;  %vm13295_vm1 = vmmov %vm13276_vm6 }
 0x318   : > { %v4252_v27 = vmax.f32 %v10771_v51, %v10937_v30  ;;  %v3876_v2 = vrot.slane %v10136_v22, 2  ;;  %v3556_v35 = vrot.slane %v10136_v22, 6  ;;  %v3652_v12 = vrot.slane %v10136_v22, 7  ;;  %vm13298_vm6 = vmmov %vm13287_vm8 }
 0x319   : > { %v10956_v11 = vmax.f32 %v10892_v28, %v10945_v29  ;;  %v4002_v58 = vmax.f32 %v3746_v6, %v3970_v55  ;;  %v3684_v9 = vsel %vm13287_vm8, %v3650_v47, %v3651_v61  ;;  %v3811_v16 = vsel %vm13288_vm4, %v3779_v8, %v3780_v38 }
 0x31a   : > { %v4284_v23 = vmax.f32 %v10807_v62, %v4252_v27  ;;  %v3747_v51 = vmax.f32 %v3588_v20, %v3684_v9  ;;  %vm13290_vm9 = vnez %v13289_v56  ;;  %v3907_v63 = vsel %vm13291_vm3, %v3875_v14, %v3876_v2 }
 0x31b   : > { %v3843_v19 = vsel %vm13290_vm9, %v3811_v16, -1e+30  ;;  %v4253_v25 = vmax.f32 %v10799_v53, %v10956_v11  ;;  %v10970_v31 = vmax.f32 %v10057_v13, %v4002_v58  ;;  %vm13293_vm7 = vnez %v13292_v52  ;;  %vm13301_vm9 = vmmov %vm13295_vm1 }
 0x31c   : > { %v3939_v47 = vsel %vm13293_vm7, %v3907_v63, -1e+30  ;;  %v3587_v8 = vsel %vm13294_vm13, %v3555_v24, %v3556_v35  ;;  %6654 = vmatprep.mubr.msk.f32.mxu1 %vm13295_vm1, %v4284_v23  ;;  %vm13297_vm10 = vnez %v13296_v49  ;;  %v3683_v14 = vsel %vm13298_vm6, %v3651_v61, %v3652_v12  ;;  %vm13302_vm7 = vmmov %vm13294_vm13 }
 0x31d   : > { %v3971_v62 = vmax.f32 %v3843_v19, %v3939_v47  ;;  %v3620_v50 = vsel %vm13297_vm10, %v3587_v8, -1e+30  ;;  %v3781_v53 = vrot.slane %v10195_v21, 1  ;;  %v4285_v13 = vmax.f32 %v10839_v59, %v4253_v25  ;;  %vm13303_vm13 = vmmov %vm13298_vm6 }
 0x31e   : > { %v10985_v37 = vmax.f32 %v10924_v33, %v10970_v31  ;;  %vm13300_vm8 = vnez %v13299_v44  ;;  %v3877_v3 = vrot.slane %v10195_v21, 2  ;;  %v3557_v20 = vrot.slane %v10195_v21, 6  ;;  %vm13304_vm1 = vmmov %vm13288_vm4  ;;  %v13315_v44 = vld [vmem:[#allocation91_spill] sm:$0xff] }
 0x31f   : > { %v3716_v24 = vsel %vm13300_vm8, %v3683_v14, -1e+30  ;;  %v4003_v57 = vmax.f32 %v3747_v51, %v3971_v62  ;;  %v3810_v46 = vsel %vm13288_vm4, %v3780_v38, %v3781_v53  ;;  %6655 = vmatmul.mubr.msk.f32.gmra.mrb[24].mxu1 %vm13301_vm9, %v4285_v13  ;;  %v3653_v61 = vrot.slane %v10195_v21, 7  ;;  %vm13306_vm6 = vmmov %vm13301_vm9  ;;  %v13311_v62 = vld [vmem:[#allocation8_spill] sm:$0xff] }
 0x320   : > { %v3748_v6 = vmax.f32 %v3620_v50, %v3716_v24  ;;  %v4254_v59 = vmax.f32 %v10821_v4, %v10985_v37  ;;  %v3906_v55 = vsel %vm13291_vm3, %v3876_v2, %v3877_v3  ;;  %v3782_v27 = vrot.slane %v10227_v10, 1  ;;  %vm13307_vm8 = vmmov %vm13291_vm3 }
 0x321   : > { %v11001_v58 = vmax.f32 %v10102_v60, %v4003_v57  ;;  %v3972_v9 = vmax.f32 %v3810_v46, %v3906_v55  ;;  %v3586_v38 = vsel %vm13302_vm7, %v3556_v35, %v3557_v20  ;;  %v3878_v16 = vrot.slane %v10227_v10, 2  ;;  %vm13308_vm4 = vmmov %vm13302_vm7 }
 0x322   : > { %v4286_v23 = vmax.f32 %v10862_v15, %v4254_v59  ;;  %v3682_v4 = vsel %vm13303_vm13, %v3652_v12, %v3653_v61  ;;  %v3809_v2 = vsel %vm13304_vm1, %v3781_v53, %v3782_v27  ;;  %v3558_v51 = vrot.slane %v10227_v10, 6  ;;  %vm13313_vm7 = vmmov %vm13303_vm13 }
 0x323   : > { %v11014_v60 = vmax.f32 %v10945_v29, %v11001_v58  ;;  %v4004_v56 = vmax.f32 %v3748_v6, %v3972_v9  ;;  %v3749_v19 = vmax.f32 %v3586_v38, %v3682_v4  ;;  %vm13305_vm10 = vnez %v12937_v7  ;;  %v13309_v7 = vld [vmem:[#allocation94_spill] sm:$0xff]  ;;  %vm13314_vm13 = vmmov %vm13304_vm1 }
 0x324   : > { %v3845_v35 = vsel %vm13305_vm10, %v3809_v2, -1e+30  ;;  %6657 = vmatprep.mubr.msk.f32.mxu1 %vm13306_vm6, %v4286_v23  ;;  %v3905_v15 = vsel %vm13307_vm8, %v3877_v3, %v3878_v16  ;;  %v3585_v12 = vsel %vm13308_vm4, %v3557_v20, %v3558_v51  ;;  %v3654_v63 = vrot.slane %v10227_v10, 7  ;;  %vm13317_vm10 = vmmov %vm13307_vm8 }
 0x325   : > { %v3783_v25 = vrot.slane %v10288_v39, 1  ;;  %v4255_v52 = vmax.f32 %v10850_v5, %v11014_v60  ;;  %v11028_v47 = vmax.f32 %v10136_v22, %v4004_v56  ;;  %vm13310_vm9 = vnez %v13309_v7  ;;  %vm13318_vm8 = vmmov %vm13308_vm4 }
 0x326   : > { %v3941_v8 = vsel %vm13310_vm9, %v3905_v15, -1e+30  ;;  %vm13312_vm3 = vnez %v13311_v62  ;;  %v3681_v14 = vsel %vm13313_vm7, %v3653_v61, %v3654_v63  ;;  %v3879_v13 = vrot.slane %v10288_v39, 2  ;;  %vm13319_vm4 = vmmov %vm13313_vm7  ;;  %v13326_v15 = vld [vmem:[#allocation99_spill] sm:$0xff] }
 0x327   : > { %v3622_v49 = vsel %vm13312_vm3, %v3585_v12, -1e+30  ;;  %v3973_v50 = vmax.f32 %v3845_v35, %v3941_v8  ;;  %v3808_v53 = vsel %vm13314_vm13, %v3782_v27, %v3783_v25  ;;  %v4287_v5 = vmax.f32 %v10892_v28, %v4255_v52  ;;  %vm13320_vm9 = vmmov %vm13314_vm13 }
 0x328   : > { %v11042_v22 = vmax.f32 %v10970_v31, %v11028_v47  ;;  %vm13316_vm1 = vnez %v13315_v44  ;;  %v3559_v3 = vrot.slane %v10288_v39, 6  ;;  %v3904_v46 = vsel %vm13317_vm10, %v3878_v16, %v3879_v13  ;;  %vm13323_vm7 = vmmov %vm13317_vm10 }
 0x329   : > { %v3718_v24 = vsel %vm13316_vm1, %v3681_v14, -1e+30  ;;  %v4005_v57 = vmax.f32 %v3749_v19, %v3973_v50  ;;  %v3655_v20 = vrot.slane %v10288_v39, 7  ;;  %6658 = vmatmul.mubr.msk.f32.gmra.mrb[26].mxu1 %vm13306_vm6, %v4287_v5  ;;  %v3974_v59 = vmax.f32 %v3808_v53, %v3904_v46  ;;  %vm13324_vm13 = vmmov %vm13318_vm8 }
 0x32a   : > { %v3750_v6 = vmax.f32 %v3622_v49, %v3718_v24  ;;  %v4256_v28 = vmax.f32 %v10877_v18, %v11042_v22  ;;  %v3584_v55 = vsel %vm13318_vm8, %v3558_v51, %v3559_v3  ;;  %v3784_v61 = vrot.slane %v10355_v36, 1  ;;  %vm13325_vm1 = vmmov %vm13306_vm6 }
 0x32b   : > { %v11057_v27 = vmax.f32 %v10195_v21, %v4005_v57  ;;  %v3680_v9 = vsel %vm13319_vm4, %v3654_v63, %v3655_v20  ;;  %v3880_v38 = vrot.slane %v10355_v36, 2  ;;  %v3560_v16 = vrot.slane %v10355_v36, 6  ;;  %v13321_v21 = vld [vmem:[#allocation9_spill] sm:$0xff]  ;;  %vm13329_vm8 = vmmov %vm13319_vm4 }
 0x32c   : > { %v4288_v23 = vmax.f32 %v10924_v33, %v4256_v28  ;;  %v4006_v4 = vmax.f32 %v3750_v6, %v3974_v59  ;;  %v3751_v18 = vmax.f32 %v3584_v55, %v3680_v9  ;;  %v3807_v2 = vsel %vm13320_vm9, %v3783_v25, %v3784_v61 }
 0x32d   : > { %v11068_v51 = vmax.f32 %v11001_v58, %v11057_v27  ;;  %vm13322_vm3 = vnez %v13321_v21  ;;  %v3903_v19 = vsel %vm13323_vm7, %v3879_v13, %v3880_v38  ;;  %v3583_v35 = vsel %vm13324_vm13, %v3559_v3, %v3560_v16 }
 0x32e   : > { %v3847_v56 = vsel %vm13322_vm3, %v3807_v2, -1e+30  ;;  %6660 = vmatprep.mubr.msk.f32.mxu1 %vm13325_vm1, %v4288_v23  ;;  %v11078_v33 = vmax.f32 %v10227_v10, %v4006_v4  ;;  %vm13327_vm10 = vnez %v13326_v15  ;;  %vm13328_vm6 = vnez %v12974_v1  ;;  %vm13332_vm3 = vmmov %vm13323_vm7 }
 0x32f   : > { %v3943_v12 = vsel %vm13327_vm10, %v3903_v19, -1e+30  ;;  %v3624_v63 = vsel %vm13328_vm6, %v3583_v35, -1e+30  ;;  %v3656_v25 = vrot.slane %v10355_v36, 7  ;;  %v4257_v52 = vmax.f32 %v10906_v42, %v11068_v51  ;;  %v13330_v42 = vld [vmem:[#allocation97_spill] sm:$0xff]  ;;  %vm13333_vm7 = vmmov %vm13324_vm13 }
 0x330   : > { %v3975_v7 = vmax.f32 %v3847_v56, %v3943_v12  ;;  %v3785_v8 = vrot.slane %v10379_v17, 1  ;;  %v3881_v62 = vrot.slane %v10379_v17, 2  ;;  %v11091_v10 = vmax.f32 %v11028_v47, %v11078_v33  ;;  %vm13334_vm13 = vmmov %vm13325_vm1  ;;  %v13342_v56 = vld [vmem:[#allocation12_spill] sm:$0xff] }
 0x331   : > { %v3679_v49 = vsel %vm13329_vm8, %v3655_v20, %v3656_v25  ;;  %v3561_v1 = vrot.slane %v10379_v17, 6  ;;  %v3657_v50 = vrot.slane %v10379_v17, 7  ;;  %v4289_v14 = vmax.f32 %v10945_v29, %v4257_v52  ;;  %vm13335_vm1 = vmmov %vm13329_vm8 }
 0x332   : > { %v4007_v53 = vmax.f32 %v3751_v18, %v3975_v7  ;;  %vm13331_vm4 = vnez %v13330_v42  ;;  %v3806_v5 = vsel %vm13320_vm9, %v3784_v61, %v3785_v8  ;;  %v4258_v44 = vmax.f32 %v10937_v30, %v11091_v10  ;;  %vm13336_vm10 = vmmov %vm13320_vm9 }
 0x333   : > { %v3720_v13 = vsel %vm13331_vm4, %v3679_v49, -1e+30  ;;  %v3902_v3 = vsel %vm13332_vm3, %v3880_v38, %v3881_v62  ;;  %v3582_v57 = vsel %vm13333_vm7, %v3560_v16, %v3561_v1  ;;  %6661 = vmatmul.mubr.msk.f32.gmra.mrb[28].mxu1 %vm13334_vm13, %v4289_v14  ;;  %v3678_v46 = vsel %vm13335_vm1, %v3656_v25, %v3657_v50  ;;  %vm13337_vm6 = vmmov %vm13334_vm13 }
 0x334   : > { %v3752_v24 = vmax.f32 %v3624_v63, %v3720_v13  ;;  %v11110_v29 = vmax.f32 %v10288_v39, %v4007_v53  ;;  %v3976_v6 = vmax.f32 %v3806_v5, %v3902_v3  ;;  %v3786_v20 = vrot.slane %v10417_v40, 1  ;;  %vm13339_vm4 = vmmov %vm13332_vm3 }
 0x335   : > { %v4290_v30 = vmax.f32 %v10970_v31, %v4258_v44  ;;  %v3753_v28 = vmax.f32 %v3582_v57, %v3678_v46  ;;  %v3882_v59 = vrot.slane %v10417_v40, 2  ;;  %v3562_v55 = vrot.slane %v10417_v40, 6  ;;  %vm13340_vm9 = vmmov %vm13333_vm7 }
 0x336   : > { %v11120_v61 = vmax.f32 %v11057_v27, %v11110_v29  ;;  %v4008_v9 = vmax.f32 %v3752_v24, %v3976_v6  ;;  %v3805_v39 = vsel %vm13336_vm10, %v3785_v8, %v3786_v20  ;;  %v3658_v38 = vrot.slane %v10417_v40, 7  ;;  %vm13344_vm13 = vmmov %vm13335_vm1 }
 0x337   : > { %6663 = vmatprep.mubr.msk.f32.mxu1 %vm13337_vm6, %v4290_v30  ;;  %vm13338_vm8 = vnez %v12994_v43  ;;  %v3901_v16 = vsel %vm13339_vm4, %v3881_v62, %v3882_v59  ;;  %v3581_v23 = vsel %vm13340_vm9, %v3561_v1, %v3562_v55  ;;  %v3787_v4 = vrot.slane %v10448_v34, 1  ;;  %vm13345_vm1 = vmmov %vm13336_vm10 }
 0x338   : > { %v3849_v31 = vsel %vm13338_vm8, %v3805_v39, -1e+30  ;;  %v4259_v18 = vmax.f32 %v10956_v11, %v11120_v61  ;;  %v11136_v2 = vmax.f32 %v10355_v36, %v4008_v9  ;;  %vm13341_vm3 = vnez %v12996_v54  ;;  %v13346_v54 = vld [vmem:[#allocation106_spill] sm:$0xff]  ;;  %vm13348_vm6 = vmmov %vm13339_vm4 }
 0x339   : > { %v3945_v21 = vsel %vm13341_vm3, %v3901_v16, -1e+30  ;;  %vm13343_vm7 = vnez %v13342_v56  ;;  %v3677_v35 = vsel %vm13344_vm13, %v3657_v50, %v3658_v38  ;;  %v3804_v15 = vsel %vm13345_vm1, %v3786_v20, %v3787_v4  ;;  %vm13350_vm4 = vmmov %vm13340_vm9  ;;  %v13358_v20 = vld [vmem:[#allocation112_spill] sm:$0xff] }
 0x33a   : > { %v3626_v43 = vsel %vm13343_vm7, %v3581_v23, -1e+30  ;;  %v3977_v19 = vmax.f32 %v3849_v31, %v3945_v21  ;;  %v3883_v12 = vrot.slane %v10448_v34, 2  ;;  %v4291_v11 = vmax.f32 %v11001_v58, %v4259_v18  ;;  %vm13351_vm9 = vmmov %vm13344_vm13 }
 0x33b   : > { %v11150_v36 = vmax.f32 %v11078_v33, %v11136_v2  ;;  %vm13347_vm10 = vnez %v13346_v54  ;;  %v3563_v25 = vrot.slane %v10448_v34, 6  ;;  %v3659_v62 = vrot.slane %v10448_v34, 7  ;;  %vm13352_vm3 = vmmov %vm13345_vm1 }
 0x33c   : > { %v3722_v63 = vsel %vm13347_vm10, %v3677_v35, -1e+30  ;;  %v4009_v52 = vmax.f32 %v3753_v28, %v3977_v19  ;;  %v3900_v8 = vsel %vm13348_vm6, %v3882_v59, %v3883_v12  ;;  %vm13349_vm8 = vcmask 15360   ;;  %vm13355_vm13 = vmmov %vm13348_vm6  ;;  %v13360_v28 = vld [vmem:[#allocation14_spill] sm:$0xff] }
 0x33d   : > { %v3754_v7 = vmax.f32 %v3626_v43, %v3722_v63  ;;  %6664 = vmatmul.mubr.msk.f32.gmra.mrb[30].mxu1 %vm13349_vm8, %v4291_v11  ;;  %v4260_v58 = vmax.f32 %v10985_v37, %v11150_v36  ;;  %v3978_v49 = vmax.f32 %v3804_v15, %v3900_v8  ;;  %v3580_v1 = vsel %vm13350_vm4, %v3562_v55, %v3563_v25  ;;  %vm13356_vm1 = vmmov %vm13350_vm4 }
 0x33e   : > { %v3788_v50 = vrot.slane %v10499_v41, 1  ;;  %v11165_v14 = vmax.f32 %v10379_v17, %v4009_v52  ;;  %v3676_v53 = vsel %vm13351_vm9, %v3658_v38, %v3659_v62  ;;  %v3884_v42 = vrot.slane %v10499_v41, 2  ;;  %v13353_v17 = vld [vmem:[#allocation13_spill] sm:$0xff]  ;;  %vm13357_vm10 = vmmov %vm13349_vm8 }
 0x33f   : > { %v3564_v13 = vrot.slane %v10499_v41, 6  ;;  %v4292_v5 = vmax.f32 %v11028_v47, %v4260_v58  ;;  %v4010_v44 = vmax.f32 %v3754_v7, %v3978_v49  ;;  %v3755_v37 = vmax.f32 %v3580_v1, %v3676_v53  ;;  %vm13362_vm4 = vmmov %vm13351_vm9  ;;  %v13371_v49 = vld [vmem:[#allocation33_spill] sm:$0xff] }
 0x340   : > { %v3803_v24 = vsel %vm13352_vm3, %v3787_v4, %v3788_v50  ;;  %v11176_v3 = vmax.f32 %v11110_v29, %v11165_v14  ;;  %vm13354_vm7 = vnez %v13353_v17  ;;  %v3899_v6 = vsel %vm13355_vm13, %v3883_v12, %v3884_v42 }
 0x341   : > { %v3851_v57 = vsel %vm13354_vm7, %v3803_v24, -1e+30  ;;  %v3579_v46 = vsel %vm13356_vm1, %v3563_v25, %v3564_v13  ;;  %6666 = vmatprep.mubr.msk.f32.mxu1 %vm13357_vm10, %v4292_v5  ;;  %v11186_v47 = vmax.f32 %v10417_v40, %v4010_v44  ;;  %vm13359_vm6 = vnez %v13358_v20  ;;  %vm13365_vm7 = vmmov %vm13355_vm13  ;;  %v13375_v5 = vld [vmem:[#allocation32_spill] sm:$0xff]  ;;  %v13381_v20 = vld [vmem:[#allocation123_spill] sm:$0xff] }
 0x342   : > { %v3947_v30 = vsel %vm13359_vm6, %v3899_v6, -1e+30  ;;  %vm13361_vm8 = vnez %v13360_v28  ;;  %v3660_v55 = vrot.slane %v10499_v41, 7  ;;  %v4261_v9 = vmax.f32 %v11014_v60, %v11176_v3  ;;  %v13363_v60 = vld [vmem:[#allocation111_spill] sm:$0xff]  ;;  %vm13366_vm13 = vmmov %vm13356_vm1 }
 0x343   : > { %v3628_v59 = vsel %vm13361_vm8, %v3579_v46, -1e+30  ;;  %v3979_v39 = vmax.f32 %v3851_v57, %v3947_v30  ;;  %v3789_v38 = vrot.slane %v10524_v0, 1  ;;  %v3885_v31 = vrot.slane %v10524_v0, 2  ;;  %vm13367_vm1 = vmmov %vm13357_vm10 }
 0x344   : > { %v11199_v40 = vmax.f32 %v11136_v2, %v11186_v47  ;;  %v3675_v16 = vsel %vm13362_vm4, %v3659_v62, %v3660_v55  ;;  %v3565_v23 = vrot.slane %v10524_v0, 6  ;;  %v3661_v4 = vrot.slane %v10524_v0, 7  ;;  %vm13368_vm10 = vmmov %vm13362_vm4 }
 0x345   : > { %v4293_v18 = vmax.f32 %v11057_v27, %v4261_v9  ;;  %v4011_v21 = vmax.f32 %v3755_v37, %v3979_v39  ;;  %vm13364_vm9 = vnez %v13363_v60  ;;  %v3802_v43 = vsel %vm13352_vm3, %v3788_v50, %v3789_v38  ;;  %vm13369_vm6 = vmmov %vm13352_vm3  ;;  %v13377_v37 = vld [vmem:[#allocation122_spill] sm:$0xff] }
 0x346   : > { %v3724_v56 = vsel %vm13364_vm9, %v3675_v16, -1e+30  ;;  %v4262_v19 = vmax.f32 %v11042_v22, %v11199_v40  ;;  %v3898_v15 = vsel %vm13365_vm7, %v3884_v42, %v3885_v31  ;;  %v3578_v12 = vsel %vm13366_vm13, %v3564_v13, %v3565_v23  ;;  %vm13370_vm8 = vmmov %vm13367_vm1  ;;  %v13386_v16 = vld [vmem:[#allocation74_spill] sm:$0xff] }
 0x347   : > { %v3756_v35 = vmax.f32 %v3628_v59, %v3724_v56  ;;  %6667 = vmatmul.mubr.msk.f32.gmra.mrb[0].mxu1 %vm13367_vm1, %v4293_v18  ;;  %v11218_v27 = vmax.f32 %v10448_v34, %v4011_v21  ;;  %v3980_v11 = vmax.f32 %v3802_v43, %v3898_v15  ;;  %v3674_v54 = vsel %vm13368_vm10, %v3660_v55, %v3661_v4  ;;  %vm13373_vm9 = vmmov %vm13365_vm7 }
 0x348   : > { %v3790_v63 = vrot.slane %v10543_v48, 1  ;;  %v4294_v22 = vmax.f32 %v11078_v33, %v4262_v19  ;;  %v3757_v25 = vmax.f32 %v3578_v12, %v3674_v54  ;;  %v3886_v52 = vrot.slane %v10543_v48, 2  ;;  %vm13374_vm3 = vmmov %vm13366_vm13 }
 0x349   : > { %v3566_v7 = vrot.slane %v10543_v48, 6  ;;  %v11228_v8 = vmax.f32 %v11165_v14, %v11218_v27  ;;  %v4012_v62 = vmax.f32 %v3756_v35, %v3980_v11  ;;  %v3662_v58 = vrot.slane %v10543_v48, 7  ;;  %vm13379_vm1 = vmmov %vm13368_vm10 }
 0x34a   : > { %v3801_v34 = vsel %vm13369_vm6, %v3789_v38, %v3790_v63  ;;  %6669 = vmatprep.mubr.msk.f32.mxu1 %vm13370_vm8, %v4294_v22  ;;  %vm13372_vm4 = vnez %v13371_v49  ;;  %v3897_v1 = vsel %vm13373_vm9, %v3885_v31, %v3886_v52  ;;  %v3791_v53 = vrot.slane %v10568_v32, 1  ;;  %vm13380_vm10 = vmmov %vm13369_vm6 }
 0x34b   : > { %v3853_v33 = vsel %vm13372_vm4, %v3801_v34, -1e+30  ;;  %v3577_v50 = vsel %vm13374_vm3, %v3565_v23, %v3566_v7  ;;  %v4263_v42 = vmax.f32 %v11068_v51, %v11228_v8  ;;  %v11244_v13 = vmax.f32 %v10499_v41, %v4012_v62  ;;  %vm13383_vm8 = vmmov %vm13373_vm9  ;;  %v13395_v34 = vld [vmem:[#allocation75_spill] sm:$0xff] }
 0x34c   : > { %vm13376_vm7 = vnez %v13375_v5  ;;  %vm13378_vm13 = vnez %v13377_v37  ;;  %v3673_v57 = vsel %vm13379_vm1, %v3661_v4, %v3662_v58  ;;  %v3800_v6 = vsel %vm13380_vm10, %v3790_v63, %v3791_v53  ;;  %vm13385_vm9 = vmmov %vm13374_vm3  ;;  %v13397_v5 = vld [vmem:[#allocation45_spill] sm:$0xff] }
 0x34d   : > { %v3949_v44 = vsel %vm13376_vm7, %v3897_v1, -1e+30  ;;  %v3630_v24 = vsel %vm13378_vm13, %v3577_v50, -1e+30  ;;  %v3887_v46 = vrot.slane %v10568_v32, 2  ;;  %v4295_v51 = vmax.f32 %v11110_v29, %v4263_v42  ;;  %vm13387_vm3 = vmmov %vm13379_vm1 }
 0x34e   : > { %v3981_v17 = vmax.f32 %v3853_v33, %v3949_v44  ;;  %v11258_v41 = vmax.f32 %v11186_v47, %v11244_v13  ;;  %vm13382_vm6 = vnez %v13381_v20  ;;  %v3567_v28 = vrot.slane %v10568_v32, 6  ;;  %vm13388_vm7 = vmmov %vm13380_vm10 }
 0x34f   : > { %v3726_v30 = vsel %vm13382_vm6, %v3673_v57, -1e+30  ;;  %v3896_v9 = vsel %vm13383_vm8, %v3886_v52, %v3887_v46  ;;  %v3663_v39 = vrot.slane %v10568_v32, 7  ;;  %vm13384_vm4 = vcmask 15360   ;;  %vm13390_vm13 = vmmov %vm13383_vm8 }
 0x350   : > { %v4013_v59 = vmax.f32 %v3757_v25, %v3981_v17  ;;  %v3758_v55 = vmax.f32 %v3630_v24, %v3726_v30  ;;  %6670 = vmatmul.mubr.msk.f32.gmra.mrb[2].mxu1 %vm13384_vm4, %v4295_v51  ;;  %v4264_v29 = vmax.f32 %v11091_v10, %v11258_v41  ;;  %v3982_v38 = vmax.f32 %v3800_v6, %v3896_v9  ;;  %vm13391_vm1 = vmmov %vm13385_vm9  ;;  %v13403_v30 = vld [vmem:[#allocation80_spill] sm:$0xff] }
 0x351   : > { %v3576_v31 = vsel %vm13385_vm9, %v3566_v7, %v3567_v28  ;;  %v3792_v23 = vrot.slane %v13386_v16, 1  ;;  %v3672_v18 = vsel %vm13387_vm3, %v3662_v58, %v3663_v39  ;;  %v3888_v21 = vrot.slane %v13386_v16, 2  ;;  %vm13392_vm10 = vmmov %vm13384_vm4 }
 0x352   : > { %v11273_v4 = vmax.f32 %v10524_v0, %v4013_v59  ;;  %v3568_v60 = vrot.slane %v13386_v16, 6  ;;  %v4296_v56 = vmax.f32 %v11136_v2, %v4264_v29  ;;  %v4014_v43 = vmax.f32 %v3758_v55, %v3982_v38  ;;  %vm13400_vm6 = vmmov %vm13383_vm8 }
 0x353   : > { %v3759_v10 = vmax.f32 %v3576_v31, %v3672_v18  ;;  %v3799_v19 = vsel %vm13388_vm7, %v3791_v53, %v3792_v23  ;;  %v3895_v12 = vsel %vm13390_vm13, %v3887_v46, %v3888_v21  ;;  %v3664_v52 = vrot.slane %v13386_v16, 7  ;;  %v11313_v53 = vpop.f32.mrb[48].mxu0  ;;  %vm13401_vm8 = vmmov %vm13391_vm1 }
 0x354   : > { %v11284_v35 = vmax.f32 %v11218_v27, %v11273_v4  ;;  %v3855_v15 = vsel %vm8708_vm15, %v3799_v19, -1e+30  ;;  %v3575_v11 = vsel %vm13391_vm1, %v3567_v28, %v3568_v60  ;;  %6672 = vmatprep.mubr.msk.f32.mxu1 %vm13392_vm10, %v4296_v56  ;;  %v11294_v2 = vmax.f32 %v10543_v48, %v4014_v43  ;;  %vm13396_vm15 = vmmov %vm13387_vm3  ;;  %v11320_v24 = vpop.f32.mrb[49].mxu0  ;;  %v13409_v19 = vld [vmem:[#allocation68_spill] sm:$0xff] }
 0x355   : > { %v3951_v63 = vsel %vm8714_vm5, %v3895_v12, -1e+30  ;;  %v3632_v25 = vsel %vm13093_vm11, %v3575_v11, -1e+30  ;;  %v3793_v58 = vrot.slane %v13395_v34, 1  ;;  %v3889_v49 = vrot.slane %v13395_v34, 2  ;;  %vm13399_vm11 = vmmov %vm13388_vm7 }
 0x356   : > { %v4265_v7 = vmax.f32 %v11120_v61, %v11284_v35  ;;  %v3983_v62 = vmax.f32 %v3855_v15, %v3951_v63  ;;  %v11307_v48 = vmax.f32 %v11244_v13, %v11294_v2  ;;  %v3671_v33 = vsel %vm13396_vm15, %v3663_v39, %v3664_v52  ;;  %vm13402_vm9 = vmmov %vm13387_vm3 }
 0x357   : > { %v3569_v1 = vrot.slane %v13395_v34, 6  ;;  %v3665_v50 = vrot.slane %v13395_v34, 7  ;;  %vm13398_vm5 = vnez %v13397_v5  ;;  %v3798_v37 = vsel %vm13399_vm11, %v3792_v23, %v3793_v58  ;;  %vm13404_vm3 = vmmov %vm13388_vm7  ;;  %v11382_v5 = vpop.f32.mrb[50].mxu0 }
 0x358   : > { %v4297_v61 = vmax.f32 %v11165_v14, %v4265_v7  ;;  %v4015_v42 = vmax.f32 %v3759_v10, %v3983_v62  ;;  %v3728_v44 = vsel %vm13398_vm5, %v3671_v33, -1e+30  ;;  %v4266_v17 = vmax.f32 %v11150_v36, %v11307_v48  ;;  %vm13405_vm7 = vmmov %vm13384_vm4 }
 0x359   : > { %v3760_v57 = vmax.f32 %v3632_v25, %v3728_v44  ;;  %v3894_v6 = vsel %vm13400_vm6, %v3888_v21, %v3889_v49  ;;  %v3574_v46 = vsel %vm13401_vm8, %v3568_v60, %v3569_v1  ;;  %v3670_v20 = vsel %vm13402_vm9, %v3664_v52, %v3665_v50  ;;  %vm13407_vm13 = vmmov %vm13400_vm6 }
 0x35a   : > { %6673 = vmatmul.mubr.msk.f32.gmra.mrb[4].mxu1 %vm13384_vm4, %v4297_v61  ;;  %v11330_v14 = vmax.f32 %v10568_v32, %v4015_v42  ;;  %v3984_v51 = vmax.f32 %v3798_v37, %v3894_v6  ;;  %v3794_v28 = vrot.slane %v13403_v30, 1  ;;  %v4298_v36 = vmax.f32 %v11186_v47, %v4266_v17  ;;  %vm13412_vm15 = vmmov %vm13404_vm3  ;;  %v11457_v17 = vld [vmem:[%s11697_s4] ss:$0 sm:$0xff] }
 0x35b   : > { %v3761_v59 = vmax.f32 %v3574_v46, %v3670_v20  ;;  %v3890_v55 = vrot.slane %v13403_v30, 2  ;;  %v3570_v9 = vrot.slane %v13403_v30, 6  ;;  %v3666_v38 = vrot.slane %v13403_v30, 7  ;;  %vm13417_vm11 = vmmov %vm13400_vm6 }
 0x35c   : > { %v4145_v39 = vmax.f32 %v11273_v4, %v11330_v14  ;;  %v4016_v29 = vmax.f32 %v3760_v57, %v3984_v51  ;;  %v3797_v32 = vsel %vm13404_vm3, %v3793_v58, %v3794_v28  ;;  %6675 = vmatprep.mubr.msk.f32.mxu1 %vm13405_vm7, %v4298_v36  ;;  %v3795_v21 = vrot.slane %v10539_v26, 1  ;;  %vm13420_vm8 = vmmov %vm13384_vm4 }
 0x35d   : > { %v3857_v23 = vsel %vm8958_vm2, %v3797_v32, -1e+30  ;;  %v3893_v47 = vsel %vm13407_vm13, %v3889_v49, %v3890_v55  ;;  %v3573_v18 = vsel %vm13391_vm1, %v3569_v1, %v3570_v9  ;;  %vm13410_vm10 = vnez %v13409_v19  ;;  %vm13411_vm2 = vmmov %vm13402_vm9 }
 0x35e   : > { %v4267_v60 = vmax.f32 %v11176_v3, %v4145_v39  ;;  %v4048_v56 = vmax.f32 %v13386_v16, %v4016_v29  ;;  %v3953_v10 = vsel %vm8964_vm12, %v3893_v47, -1e+30  ;;  %v3634_v0 = vsel %vm13410_vm10, %v3573_v18, -1e+30  ;;  %v13413_v16 = vld [vmem:[#allocation70_spill] sm:$0xff]  ;;  %vm13416_vm12 = vmmov %vm13391_vm1 }
 0x35f   : > { %v3985_v15 = vmax.f32 %v3857_v23, %v3953_v10  ;;  %v3669_v12 = vsel %vm13411_vm2, %v3665_v50, %v3666_v38  ;;  %v3796_v11 = vsel %vm13412_vm15, %v3794_v28, %v3795_v21  ;;  %v3891_v54 = vrot.slane %v10539_v26, 2  ;;  %vm13419_vm6 = vmmov %vm13411_vm2  ;;  %v13421_v50 = vld [vmem:[#allocation62_spill] sm:$0xff] }
 0x360   : > { %v4299_v63 = vmax.f32 %v11218_v27, %v4267_v60  ;;  %v4146_v3 = vmax.f32 %v11294_v2, %v4048_v56  ;;  %vm13414_vm5 = vnez %v13413_v16  ;;  %v13415_v25 = vrot.slane %v10539_v26, 6  ;;  %vm13423_vm4 = vmmov %vm13404_vm3 }
 0x361   : > { %v3730_v22 = vsel %vm13414_vm5, %v3669_v12, -1e+30  ;;  %v4017_v7 = vmax.f32 %v3761_v59, %v3985_v15  ;;  %v3892_v58 = vsel %vm13417_vm11, %v3890_v55, %v3891_v54  ;;  %v13418_v49 = vrot.slane %v10539_v26, 7  ;;  %vm13426_vm9 = vmmov %vm13417_vm11 }
 0x362   : > { %v3572_v52 = vsel %vm13416_vm12, %v3570_v9, %v13415_v25  ;;  %v3762_v62 = vmax.f32 %v3634_v0, %v3730_v22  ;;  %6676 = vmatmul.mubr.msk.f32.gmra.mrb[6].mxu1 %vm13420_vm8, %v4299_v63  ;;  %v4268_v33 = vmax.f32 %v11199_v40, %v4146_v3  ;;  %v3986_v1 = vmax.f32 %v3796_v11, %v3892_v58  ;;  %v11391_v40 = vpop.f32.mrb[51].mxu0  ;;  %vm13428_vm3 = vmmov %vm13405_vm7 }
 0x363   : > { %v3668_v27 = vsel %vm13419_vm6, %v3666_v38, %v13418_v49  ;;  %v13422_v61 = vrot.slane %v13421_v50, 1  ;;  %v4049_v44 = vmax.f32 %v13395_v34, %v4017_v7  ;;  %v13425_v6 = vrot.slane %v13421_v50, 2 }
 0x364   : > { %v3763_v37 = vmax.f32 %v3572_v52, %v3668_v27  ;;  %v4300_v51 = vmax.f32 %v11244_v13, %v4268_v33  ;;  %v4018_v20 = vmax.f32 %v3762_v62, %v3986_v1  ;;  %v4274_v43 = vmax.f32 %v4146_v3, -1e+30 }
 0x365   : > { %v3827_v42 = vsel %vm13423_vm4, %v3795_v21, %v13422_v61  ;;  %v3923_v46 = vsel %vm13426_vm9, %v3891_v54, %v13425_v6  ;;  %v4147_v59 = vmax.f32 %v11330_v14, %v4049_v44  ;;  %vm5940_vm15 = vcmask 64512  }
 0x366   : > { %v3859_v57 = vsel %vm13138_vm14, %v3827_v42, -1e+30  ;;  %v3955_v36 = vsel %vm13144_vm0, %v3923_v46, -1e+30  ;;  %6678 = vmatprep.mubr.msk.f32.mxu1 %vm13428_vm3, %v4300_v51  ;;  %v4050_v55 = vmax.f32 %v13403_v30, %v4018_v20  ;;  %vm13429_vm14 = vmmov %vm13428_vm3  ;;  %v11406_v30 = vpop.f32.mrb[52].mxu0 }
 0x367   : > { %v3987_v34 = vmax.f32 %v3859_v57, %v3955_v36  ;;  %v4269_v9 = vmax.f32 %v11228_v8, %v4147_v59  ;;  %v11409_v60 = vpop.f32.mrb[53].mxu0  ;;  %vm13430_vm0 = vmmov %vm13428_vm3  ;;  %v4275_v10 = vmax.f32 %v4147_v59, -1e+30 }
 0x368   : > { %v4238_v45 = vmax.f32 %v4048_v56, %v4050_v55  ;;  %v4240_v32 = vmax.f32 %v4050_v55, -1e+30  ;;  %vm13431_vm7 = vmmov %vm13430_vm0  ;;  %v4306_v19 = vmax.f32 %v4050_v55, %v4274_v43 }
 0x369   : > { %v4019_v29 = vmax.f32 %v3763_v37, %v3987_v34  ;;  %v4301_v38 = vmax.f32 %v11273_v4, %v4269_v9  ;;  %vm13432_vm13 = vmmov %vm13430_vm0 }
 0x36a   : > { %v4270_v31 = vmax.f32 %v11258_v41, %v4238_v45  ;;  %v4272_v21 = vmax.f32 %v11307_v48, %v4240_v32  ;;  %v11415_v48 = vpop.f32.mrb[54].mxu0  ;;  %vm13433_vm1 = vmmov %vm13430_vm0 }
 0x36b   : > { %v4051_v13 = vmax.f32 %v10539_v26, %v4019_v29  ;;  %6679 = vmatmul.mubr.msk.f32.gmra.mrb[8].mxu1 %vm13429_vm14, %v4301_v38  ;;  %v11417_v0 = vpop.f32.mrb[55].mxu0  ;;  %vm13434_vm10 = vmmov %vm13430_vm0 }
 0x36c   : > { %v4302_v18 = vmax.f32 %v11294_v2, %v4270_v31  ;;  %v4304_v41 = vmax.f32 %v4048_v56, %v4272_v21  ;;  %vm13435_vm2 = vmmov %vm13430_vm0 }
 0x36d   : > { %v4239_v23 = vmax.f32 %v4049_v44, %v4051_v13  ;;  %v4241_v47 = vmax.f32 %v4051_v13, -1e+30 }
 0x36e   : > { %6681 = vmatprep.mubr.msk.f32.mxu1 %vm13430_vm0, %v4302_v18 }
 0x36f   : > { %v4271_v8 = vmax.f32 %v11284_v35, %v4239_v23  ;;  %v4273_v4 = vmax.f32 %v4145_v39, %v4241_v47  ;;  %v4307_v35 = vmax.f32 %v4051_v13, %v4275_v10 }
 0x371   : > { %v4303_v26 = vmax.f32 %v11330_v14, %v4271_v8  ;;  %v4305_v2 = vmax.f32 %v4049_v44, %v4273_v4  ;;  %v11422_v14 = vpop.f32.mrb[56].mxu0 }
 0x372   : > { %v11424_v39 = vpop.f32.mrb[57].mxu0 }
 0x373   : > { %6682 = vmatmul.mubr.msk.f32.gmra.mrb[10].mxu1 %vm13431_vm7, %v4303_v26  ;;  %v11426_v56 = vpop.f32.mrb[58].mxu0 }
 0x374   : > { %6684 = vmatprep.mubr.msk.f32.mxu1 %vm13432_vm13, %v4304_v41  ;;  %v11428_v15 = vpop.f32.mrb[59].mxu0 }
 0x375   : > { %v11430_v12 = vpop.f32.mrb[60].mxu0 }
 0x376   : > { %v11432_v11 = vpop.f32.mrb[61].mxu0 }
 0x377   : > { %6685 = vmatmul.mubr.msk.f32.gmra.mrb[12].mxu1 %vm13433_vm1, %v4305_v2  ;;  %v11434_v54 = vpop.f32.mrb[62].mxu0 }
 0x378   : > { %6687 = vmatprep.mubr.msk.f32.mxu1 %vm13434_vm10, %v4306_v19  ;;  %v11436_v63 = vpop.f32.mrb[63].mxu0 }
 0x379   : > { %v6544_v3 = vpop.f32.mrb[32].mxu0 }
 0x37a   : > { %v4802_v16 = vpop.f32.mrb[33].mxu0 }
 0x37b   : > { %6688 = vmatmul.mubr.msk.f32.gmra.mrb[14].mxu1 %vm13435_vm2, %v4307_v35  ;;  %v6547_v22 = vpop.f32.mrb[34].mxu0 }
 0x37c   : > { %v4812_v25 = vpop.f32.mrb[35].mxu0 }
 0x383   : > { %v6550_v52 = vpop.f32.mrb[36].mxu0 }
 0x384   : > { %v4822_v7 = vpop.f32.mrb[37].mxu0 }
 0x387   : > { %v6553_v62 = vpop.f32.mrb[38].mxu0 }
 0x388   : > { %v4832_v58 = vpop.f32.mrb[39].mxu0 }
 0x38e   : > { %v11438_v49 = vpop.f32.mrb[40].mxu0 }
 0x38f   : > { %v11440_v27 = vpop.f32.mrb[41].mxu0 }
 0x397   : > { %v11442_v33 = vpop.f32.mrb[42].mxu0 }
 0x398   : > { %v11444_v1 = vpop.f32.mrb[43].mxu0 }
 0x39b   : > { %v11446_v50 = vpop.f32.mrb[44].mxu0 }
 0x39c   : > { %v11448_v61 = vpop.f32.mrb[45].mxu0 }
 0x3a0   : > { %v11450_v42 = vpop.f32.mrb[46].mxu0 }
 0x3a1   : > { %v11452_v44 = vpop.f32.mrb[47].mxu0 }
 0x3cb   : > { %v6644_v37 = vpop.f32.mrb[16].mxu1 }
 0x3cc   : > { %v6692_v57 = vadd.f32 %v6644_v37, %v6544_v3  ;;  %v5486_v6 = vpop.f32.mrb[17].mxu1 }
 0x3cd   : > { %v6693_v46 = vadd.f32 %v5486_v6, %v4802_v16 }
 0x3ce   : > { %v5685_v51 = vadd.f32 %v6692_v57, %v11457_v17 }
 0x3cf   : > { %v5684_v20 = vadd.f32 %v6693_v46, %v11457_v17 }
 0x3d0   : > { %v6240_v28 = vmul.f32 -1.442695, %v5685_v51 }
 0x3d1   : > { %v6239_v36 = vmul.f32 -1.442695, %v5684_v20 }
 0x3d2   : > { %6924 = vpow2.f32 %v6240_v28 }
 0x3d3   : > { %6926 = vpow2.f32 %v6239_v36 }
 0x3d6   : > { %v6647_v59 = vpop.f32.mrb[18].mxu1 }
 0x3d7   : > { %v6694_v34 = vadd.f32 %v6647_v59, %v6547_v22  ;;  %v5496_v55 = vpop.f32.mrb[19].mxu1 }
 0x3d8   : > { %v6695_v9 = vadd.f32 %v5496_v55, %v4812_v25 }
 0x3d9   : > { %v5687_v29 = vadd.f32 %v6694_v34, %v11457_v17 }
 0x3da   : > { %v5686_v45 = vadd.f32 %v6695_v9, %v11457_v17 }
 0x3db   : > { %v6242_v32 = vmul.f32 -1.442695, %v5687_v29 }
 0x3dc   : > { %v6925_v38 = vpop.eup %6924  ;;  %v6241_v13 = vmul.f32 -1.442695, %v5686_v45 }
 0x3dd   : > { %v6927_v31 = vpop.eup %6926  ;;  %v5813_v23 = vadd.f32 1.0, %v6925_v38  ;;  %6928 = vpow2.f32 %v6242_v32 }
 0x3de   : > { %v5812_v47 = vadd.f32 1.0, %v6927_v31  ;;  %6930 = vpow2.f32 %v6241_v13 }
 0x3df   : > { %6932 = vrcp.f32 %v5813_v23 }
 0x3e0   : > { %v6650_v18 = vpop.f32.mrb[20].mxu1  ;;  %6934 = vrcp.f32 %v5812_v47 }
 0x3e1   : > { %v6696_v21 = vadd.f32 %v6650_v18, %v6550_v52  ;;  %v5506_v8 = vpop.f32.mrb[21].mxu1 }
 0x3e2   : > { %v6697_v26 = vadd.f32 %v5506_v8, %v4822_v7 }
 0x3e3   : > { %v11464_v4 = vadd.f32 %v6696_v21, %v11457_v17 }
 0x3e4   : > { %v11467_v41 = vadd.f32 %v6697_v26, %v11457_v17 }
 0x3e5   : > { %v6244_v43 = vmul.f32 -1.442695, %v11464_v4 }
 0x3e6   : > { %v6243_v2 = vmul.f32 -1.442695, %v11467_v41 }
 0x3e7   : > { %6936 = vpow2.f32 %v6244_v43  ;;  %v6929_v10 = vpop.eup %6928 }
 0x3e8   : > { %6938 = vpow2.f32 %v6243_v2  ;;  %v6931_v35 = vpop.eup %6930  ;;  %v5815_v3 = vadd.f32 1.0, %v6929_v10 }
 0x3e9   : > { %v6653_v19 = vpop.f32.mrb[22].mxu1  ;;  %v6933_v25 = vpop.eup %6932  ;;  %v5814_v52 = vadd.f32 1.0, %v6931_v35 }
 0x3ea   : > { %v6698_v16 = vadd.f32 %v6653_v19, %v6553_v62  ;;  %v5516_v22 = vpop.f32.mrb[23].mxu1  ;;  %v6935_v37 = vpop.eup %6934  ;;  %v5909_v57 = vmul.f32 %v6933_v25, %v5685_v51  ;;  %6940 = vrcp.f32 %v5815_v3 }
 0x3eb   : > { %v6699_v7 = vadd.f32 %v5516_v22, %v4832_v58  ;;  %v5908_v62 = vmul.f32 %v6935_v37, %v5684_v20  ;;  %6942 = vrcp.f32 %v5814_v52 }
 0x3ec   : > { %v11479_v6 = vadd.f32 %v6698_v16, %v11457_v17  ;;  %5942 = vst.msk [vmem:[%s11476_s17 + $0x8] sm:$0xff] %vm5940_vm15, %v5909_v57 }
 0x3ed   : > { %v11482_v46 = vadd.f32 %v6699_v7, %v11457_v17  ;;  %5941 = vst.msk [vmem:[%s11476_s17] sm:$0xff] %vm5940_vm15, %v5908_v62 }
 0x3ee   : > { %v6246_v28 = vmul.f32 -1.442695, %v11479_v6 }
 0x3ef   : > { %v6245_v36 = vmul.f32 -1.442695, %v11482_v46 }
 0x3f0   : > { %6944 = vpow2.f32 %v6246_v28 }
 0x3f1   : > { %v6937_v58 = vpop.eup %6936  ;;  %6946 = vpow2.f32 %v6245_v36 }
 0x3f2   : > { %v6656_v51 = vpop.f32.mrb[24].mxu1  ;;  %v6939_v59 = vpop.eup %6938  ;;  %v5817_v34 = vadd.f32 1.0, %v6937_v58 }
 0x3f3   : > { %v6700_v20 = vadd.f32 %v6656_v51, %v11438_v49  ;;  %v5526_v55 = vpop.f32.mrb[25].mxu1  ;;  %v5816_v9 = vadd.f32 1.0, %v6939_v59 }
 0x3f4   : > { %v6701_v32 = vadd.f32 %v5526_v55, %v11440_v27  ;;  %6948 = vrcp.f32 %v5817_v34  ;;  %v6941_v31 = vpop.eup %6940 }
 0x3f5   : > { %v11493_v38 = vadd.f32 %v6700_v20, %v11457_v17  ;;  %6950 = vrcp.f32 %v5816_v9  ;;  %v6943_v47 = vpop.eup %6942  ;;  %v5911_v18 = vmul.f32 %v6941_v31, %v5687_v29 }
 0x3f6   : > { %v11496_v13 = vadd.f32 %v6701_v32, %v11457_v17  ;;  %v5910_v21 = vmul.f32 %v6943_v47, %v5686_v45 }
 0x3f7   : > { %v6248_v23 = vmul.f32 -1.442695, %v11493_v38  ;;  %5944 = vst.msk [vmem:[%s11476_s17 + $0x18] sm:$0xff] %vm5940_vm15, %v5911_v18 }
 0x3f8   : > { %v6247_v49 = vmul.f32 -1.442695, %v11496_v13  ;;  %5943 = vst.msk [vmem:[%s11476_s17 + $0x10] sm:$0xff] %vm5940_vm15, %v5910_v21 }
 0x3f9   : > { %6952 = vpow2.f32 %v6248_v23 }
 0x3fa   : > { %6954 = vpow2.f32 %v6247_v49  ;;  %v6945_v27 = vpop.eup %6944 }
 0x3fb   : > { %v6947_v26 = vpop.eup %6946  ;;  %v5819_v43 = vadd.f32 1.0, %v6945_v27 }
 0x3fc   : > { %v6659_v8 = vpop.f32.mrb[26].mxu1  ;;  %v5818_v19 = vadd.f32 1.0, %v6947_v26 }
 0x3fd   : > { %v6702_v2 = vadd.f32 %v6659_v8, %v11442_v33  ;;  %v5536_v10 = vpop.f32.mrb[27].mxu1  ;;  %6956 = vrcp.f32 %v5819_v43 }
 0x3fe   : > { %v6703_v29 = vadd.f32 %v5536_v10, %v11444_v1  ;;  %v6949_v35 = vpop.eup %6948  ;;  %6958 = vrcp.f32 %v5818_v19 }
 0x3ff   : > { %v11507_v45 = vadd.f32 %v6702_v2, %v11457_v17  ;;  %v6951_v16 = vpop.eup %6950  ;;  %v5913_v22 = vmul.f32 %v6949_v35, %v11464_v4 }
 0x400   : > { %v11510_v3 = vadd.f32 %v6703_v29, %v11457_v17  ;;  %v5912_v33 = vmul.f32 %v6951_v16, %v11467_v41 }
 0x401   : > { %v6250_v25 = vmul.f32 -1.442695, %v11507_v45  ;;  %5946 = vst.msk [vmem:[%s11476_s17 + $0x28] sm:$0xff] %vm5940_vm15, %v5913_v22 }
 0x402   : > { %v6249_v52 = vmul.f32 -1.442695, %v11510_v3  ;;  %5945 = vst.msk [vmem:[%s11476_s17 + $0x20] sm:$0xff] %vm5940_vm15, %v5912_v33 }
 0x403   : > { %6960 = vpow2.f32 %v6250_v25  ;;  %v6953_v1 = vpop.eup %6952 }
 0x404   : > { %6962 = vpow2.f32 %v6249_v52  ;;  %v6955_v7 = vpop.eup %6954  ;;  %v5821_v37 = vadd.f32 1.0, %v6953_v1 }
 0x405   : > { %v5820_v62 = vadd.f32 1.0, %v6955_v7 }
 0x406   : > { %v6662_v57 = vpop.f32.mrb[28].mxu1  ;;  %6964 = vrcp.f32 %v5821_v37 }
 0x407   : > { %v6704_v4 = vadd.f32 %v6662_v57, %v11446_v50  ;;  %v5546_v28 = vpop.f32.mrb[29].mxu1  ;;  %6966 = vrcp.f32 %v5820_v62  ;;  %v6957_v58 = vpop.eup %6956 }
 0x408   : > { %v6705_v41 = vadd.f32 %v5546_v28, %v11448_v61  ;;  %v6959_v59 = vpop.eup %6958  ;;  %v5915_v34 = vmul.f32 %v6957_v58, %v11479_v6 }
 0x409   : > { %v11523_v36 = vadd.f32 %v6704_v4, %v11457_v17  ;;  %v5914_v50 = vmul.f32 %v6959_v59, %v11482_v46 }
 0x40a   : > { %v11526_v51 = vadd.f32 %v6705_v41, %v11457_v17  ;;  %5948 = vst.msk [vmem:[%s11476_s17 + $0x38] sm:$0xff] %vm5940_vm15, %v5915_v34 }
 0x40b   : > { %v6252_v20 = vmul.f32 -1.442695, %v11523_v36  ;;  %5947 = vst.msk [vmem:[%s11476_s17 + $0x30] sm:$0xff] %vm5940_vm15, %v5914_v50 }
 0x40c   : > { %v6251_v55 = vmul.f32 -1.442695, %v11526_v51 }
 0x40d   : > { %6968 = vpow2.f32 %v6252_v20  ;;  %v6961_v61 = vpop.eup %6960 }
 0x40e   : > { %6970 = vpow2.f32 %v6251_v55  ;;  %v6963_v32 = vpop.eup %6962  ;;  %v5823_v31 = vadd.f32 1.0, %v6961_v61 }
 0x40f   : > { %v5822_v47 = vadd.f32 1.0, %v6963_v32 }
 0x410   : > { %v6665_v9 = vpop.f32.mrb[30].mxu1  ;;  %6972 = vrcp.f32 %v5823_v31  ;;  %v6965_v49 = vpop.eup %6964 }
 0x411   : > { %v6706_v23 = vadd.f32 %v6665_v9, %v11450_v42  ;;  %v5556_v6 = vpop.f32.mrb[31].mxu1  ;;  %6974 = vrcp.f32 %v5822_v47  ;;  %v6967_v27 = vpop.eup %6966  ;;  %v5917_v8 = vmul.f32 %v6965_v49, %v11493_v38 }
 0x412   : > { %v6707_v46 = vadd.f32 %v5556_v6, %v11452_v44  ;;  %v5916_v42 = vmul.f32 %v6967_v27, %v11496_v13 }
 0x413   : > { %v11539_v18 = vadd.f32 %v6706_v23, %v11457_v17  ;;  %5950 = vst.msk [vmem:[%s11476_s17 + $0x48] sm:$0xff] %vm5940_vm15, %v5917_v8 }
 0x414   : > { %v11542_v21 = vadd.f32 %v6707_v46, %v11457_v17  ;;  %5949 = vst.msk [vmem:[%s11476_s17 + $0x40] sm:$0xff] %vm5940_vm15, %v5916_v42 }
 0x415   : > { %v6254_v26 = vmul.f32 -1.442695, %v11539_v18 }
 0x416   : > { %v6253_v43 = vmul.f32 -1.442695, %v11542_v21 }
 0x417   : > { %6976 = vpow2.f32 %v6254_v26  ;;  %v6969_v44 = vpop.eup %6968 }
 0x418   : > { %6978 = vpow2.f32 %v6253_v43  ;;  %v6971_v10 = vpop.eup %6970  ;;  %v5825_v19 = vadd.f32 1.0, %v6969_v44 }
 0x419   : > { %v5824_v35 = vadd.f32 1.0, %v6971_v10 }
 0x41a   : > { %v6668_v2 = vpop.f32.mrb[0].mxu1  ;;  %6980 = vrcp.f32 %v5825_v19  ;;  %v6973_v22 = vpop.eup %6972 }
 0x41b   : > { %v6708_v29 = vadd.f32 %v6668_v2, %v11313_v53  ;;  %v5566_v38 = vpop.f32.mrb[1].mxu1  ;;  %6982 = vrcp.f32 %v5824_v35  ;;  %v6975_v33 = vpop.eup %6974  ;;  %v5919_v52 = vmul.f32 %v6973_v22, %v11507_v45 }
 0x41c   : > { %v6709_v13 = vadd.f32 %v5566_v38, %v11320_v24  ;;  %v5918_v53 = vmul.f32 %v6975_v33, %v11510_v3 }
 0x41d   : > { %v11555_v16 = vadd.f32 %v6708_v29, %v11457_v17  ;;  %5952 = vst.msk [vmem:[%s11476_s17 + $0x58] sm:$0xff] %vm5940_vm15, %v5919_v52 }
 0x41e   : > { %v11558_v25 = vadd.f32 %v6709_v13, %v11457_v17  ;;  %5951 = vst.msk [vmem:[%s11476_s17 + $0x50] sm:$0xff] %vm5940_vm15, %v5918_v53 }
 0x41f   : > { %v6256_v1 = vmul.f32 -1.442695, %v11555_v16 }
 0x420   : > { %v6255_v7 = vmul.f32 -1.442695, %v11558_v25 }
 0x421   : > { %6984 = vpow2.f32 %v6256_v1  ;;  %v6977_v24 = vpop.eup %6976 }
 0x422   : > { %6986 = vpow2.f32 %v6255_v7  ;;  %v6979_v57 = vpop.eup %6978  ;;  %v5827_v62 = vadd.f32 1.0, %v6977_v24 }
 0x423   : > { %v6671_v37 = vpop.f32.mrb[2].mxu1  ;;  %v5826_v28 = vadd.f32 1.0, %v6979_v57 }
 0x424   : > { %v6710_v4 = vadd.f32 %v6671_v37, %v11382_v5  ;;  %v5576_v45 = vpop.f32.mrb[3].mxu1  ;;  %6988 = vrcp.f32 %v5827_v62  ;;  %v6981_v59 = vpop.eup %6980 }
 0x425   : > { %v6711_v3 = vadd.f32 %v5576_v45, %v11391_v40  ;;  %6990 = vrcp.f32 %v5826_v28  ;;  %v6983_v20 = vpop.eup %6982  ;;  %v5921_v50 = vmul.f32 %v6981_v59, %v11523_v36 }
 0x426   : > { %v11571_v41 = vadd.f32 %v6710_v4, %v11457_v17  ;;  %v5920_v55 = vmul.f32 %v6983_v20, %v11526_v51 }
 0x427   : > { %v11574_v58 = vadd.f32 %v6711_v3, %v11457_v17  ;;  %5954 = vst.msk [vmem:[%s11476_s17 + $0x68] sm:$0xff] %vm5940_vm15, %v5921_v50 }
 0x428   : > { %v6258_v34 = vmul.f32 -1.442695, %v11571_v41  ;;  %5953 = vst.msk [vmem:[%s11476_s17 + $0x60] sm:$0xff] %vm5940_vm15, %v5920_v55 }
 0x429   : > { %v6257_v5 = vmul.f32 -1.442695, %v11574_v58 }
 0x42a   : > { %6992 = vpow2.f32 %v6258_v34 }
 0x42b   : > { %6994 = vpow2.f32 %v6257_v5  ;;  %v6985_v40 = vpop.eup %6984 }
 0x42c   : > { %v6987_v9 = vpop.eup %6986  ;;  %v5829_v32 = vadd.f32 1.0, %v6985_v40 }
 0x42d   : > { %v6674_v61 = vpop.f32.mrb[4].mxu1  ;;  %v5828_v36 = vadd.f32 1.0, %v6987_v9 }
 0x42e   : > { %v6712_v31 = vadd.f32 %v6674_v61, %v11406_v30  ;;  %v5586_v23 = vpop.f32.mrb[5].mxu1  ;;  %6996 = vrcp.f32 %v5829_v32  ;;  %v6989_v47 = vpop.eup %6988 }
 0x42f   : > { %v6713_v6 = vadd.f32 %v5586_v23, %v11409_v60  ;;  %6998 = vrcp.f32 %v5828_v36  ;;  %v6991_v49 = vpop.eup %6990  ;;  %v5923_v27 = vmul.f32 %v6989_v47, %v11539_v18 }
 0x430   : > { %v11587_v51 = vadd.f32 %v6712_v31, %v11457_v17  ;;  %v5922_v30 = vmul.f32 %v6991_v49, %v11542_v21 }
 0x431   : > { %v11590_v46 = vadd.f32 %v6713_v6, %v11457_v17  ;;  %5956 = vst.msk [vmem:[%s11476_s17 + $0x78] sm:$0xff] %vm5940_vm15, %v5923_v27 }
 0x432   : > { %v6260_v8 = vmul.f32 -1.442695, %v11587_v51  ;;  %5955 = vst.msk [vmem:[%s11476_s17 + $0x70] sm:$0xff] %vm5940_vm15, %v5922_v30 }
 0x433   : > { %v6259_v26 = vmul.f32 -1.442695, %v11590_v46 }
 0x434   : > { %7000 = vpow2.f32 %v6260_v8  ;;  %v6993_v60 = vpop.eup %6992 }
 0x435   : > { %7002 = vpow2.f32 %v6259_v26  ;;  %v6677_v42 = vpop.f32.mrb[6].mxu1  ;;  %v6995_v43 = vpop.eup %6994  ;;  %v5831_v44 = vadd.f32 1.0, %v6993_v60 }
 0x436   : > { %v6714_v2 = vadd.f32 %v6677_v42, %v11415_v48  ;;  %v5596_v18 = vpop.f32.mrb[7].mxu1  ;;  %v5830_v10 = vadd.f32 1.0, %v6995_v43 }
 0x437   : > { %v6715_v21 = vadd.f32 %v5596_v18, %v11417_v0  ;;  %7004 = vrcp.f32 %v5831_v44 }
 0x438   : > { %v11603_v19 = vadd.f32 %v6714_v2, %v11457_v17  ;;  %7006 = vrcp.f32 %v5830_v10  ;;  %v6997_v38 = vpop.eup %6996 }
 0x439   : > { %v11606_v29 = vadd.f32 %v6715_v21, %v11457_v17  ;;  %v6999_v13 = vpop.eup %6998  ;;  %v5925_v22 = vmul.f32 %v6997_v38, %v11555_v16 }
 0x43a   : > { %v6262_v35 = vmul.f32 -1.442695, %v11603_v19  ;;  %v5924_v33 = vmul.f32 %v6999_v13, %v11558_v25 }
 0x43b   : > { %v6261_v48 = vmul.f32 -1.442695, %v11606_v29  ;;  %5958 = vst.msk [vmem:[%s11476_s17 + $0x88] sm:$0xff] %vm5940_vm15, %v5925_v22 }
 0x43c   : > { %7008 = vpow2.f32 %v6262_v35  ;;  %5957 = vst.msk [vmem:[%s11476_s17 + $0x80] sm:$0xff] %vm5940_vm15, %v5924_v33 }
 0x43d   : > { %7010 = vpow2.f32 %v6261_v48 }
 0x43e   : > { %v7001_v0 = vpop.eup %7000  ;;  %v6680_v52 = vpop.f32.mrb[8].mxu1 }
 0x43f   : > { %v7003_v1 = vpop.eup %7002  ;;  %v5833_v53 = vadd.f32 1.0, %v7001_v0  ;;  %v6716_v7 = vadd.f32 %v6680_v52, %v11422_v14  ;;  %v5606_v24 = vpop.f32.mrb[9].mxu1 }
 0x440   : > { %v5832_v37 = vadd.f32 1.0, %v7003_v1  ;;  %v6717_v16 = vadd.f32 %v5606_v24, %v11424_v39 }
 0x441   : > { %7012 = vrcp.f32 %v5833_v53  ;;  %v11619_v25 = vadd.f32 %v6716_v7, %v11457_v17  ;;  %v7005_v57 = vpop.eup %7004 }
 0x442   : > { %7014 = vrcp.f32 %v5832_v37  ;;  %v11622_v62 = vadd.f32 %v6717_v16, %v11457_v17  ;;  %v7007_v4 = vpop.eup %7006  ;;  %v5927_v45 = vmul.f32 %v7005_v57, %v11571_v41 }
 0x443   : > { %v6264_v28 = vmul.f32 -1.442695, %v11619_v25  ;;  %v5926_v14 = vmul.f32 %v7007_v4, %v11574_v58 }
 0x444   : > { %v6263_v3 = vmul.f32 -1.442695, %v11622_v62  ;;  %5960 = vst.msk [vmem:[%s11476_s17 + $0x98] sm:$0xff] %vm5940_vm15, %v5927_v45 }
 0x445   : > { %7016 = vpow2.f32 %v6264_v28  ;;  %5959 = vst.msk [vmem:[%s11476_s17 + $0x90] sm:$0xff] %vm5940_vm15, %v5926_v14 }
 0x446   : > { %v6683_v39 = vpop.f32.mrb[10].mxu1  ;;  %v7009_v20 = vpop.eup %7008  ;;  %7018 = vpow2.f32 %v6263_v3 }
 0x447   : > { %v6718_v59 = vadd.f32 %v6683_v39, %v11426_v56  ;;  %v5616_v34 = vpop.f32.mrb[11].mxu1  ;;  %v7011_v41 = vpop.eup %7010  ;;  %v5835_v5 = vadd.f32 1.0, %v7009_v20 }
 0x448   : > { %v6719_v50 = vadd.f32 %v5616_v34, %v11428_v15  ;;  %v5834_v58 = vadd.f32 1.0, %v7011_v41 }
 0x449   : > { %v11635_v55 = vadd.f32 %v6718_v59, %v11457_v17  ;;  %7020 = vrcp.f32 %v5835_v5 }
 0x44a   : > { %v11638_v40 = vadd.f32 %v6719_v50, %v11457_v17  ;;  %v6686_v61 = vpop.f32.mrb[12].mxu1  ;;  %7022 = vrcp.f32 %v5834_v58 }
 0x44b   : > { %v6266_v56 = vmul.f32 -1.442695, %v11635_v55  ;;  %v6720_v9 = vadd.f32 %v6686_v61, %v11430_v12  ;;  %v5626_v32 = vpop.f32.mrb[13].mxu1  ;;  %v7013_v23 = vpop.eup %7012 }
 0x44c   : > { %v6265_v15 = vmul.f32 -1.442695, %v11638_v40  ;;  %v6721_v31 = vadd.f32 %v5626_v32, %v11432_v11  ;;  %v7015_v6 = vpop.eup %7014  ;;  %v5929_v47 = vmul.f32 %v7013_v23, %v11587_v51 }
 0x44d   : > { %7024 = vpow2.f32 %v6266_v56  ;;  %v11645_v36 = vadd.f32 %v6720_v9, %v11457_v17  ;;  %v5928_v27 = vmul.f32 %v7015_v6, %v11590_v46 }
 0x44e   : > { %7026 = vpow2.f32 %v6265_v15  ;;  %v11649_v49 = vadd.f32 %v6721_v31, %v11457_v17  ;;  %v6689_v12 = vpop.f32.mrb[14].mxu1  ;;  %5962 = vst.msk [vmem:[%s11476_s17 + $0xa8] sm:$0xff] %vm5940_vm15, %v5929_v47 }
 0x44f   : > { %v6268_v8 = vmul.f32 -1.442695, %v11645_v36  ;;  %v6722_v11 = vadd.f32 %v6689_v12, %v11434_v54  ;;  %v5636_v30 = vpop.f32.mrb[15].mxu1  ;;  %v7017_v42 = vpop.eup %7016  ;;  %5961 = vst.msk [vmem:[%s11476_s17 + $0xa0] sm:$0xff] %vm5940_vm15, %v5928_v27 }
 0x450   : > { %v6267_v26 = vmul.f32 -1.442695, %v11649_v49  ;;  %v6723_v60 = vadd.f32 %v5636_v30, %v11436_v63  ;;  %v7019_v43 = vpop.eup %7018  ;;  %v5837_v44 = vadd.f32 1.0, %v7017_v42 }
 0x451   : > { %7028 = vpow2.f32 %v6268_v8  ;;  %v5715_v51 = vadd.f32 %v6722_v11, %v11457_v17  ;;  %v5836_v54 = vadd.f32 1.0, %v7019_v43 }
 0x452   : > { %7030 = vpow2.f32 %v6267_v26  ;;  %v5714_v46 = vadd.f32 %v6723_v60, %v11457_v17 }
 0x453   : > { %v6270_v2 = vmul.f32 -1.442695, %v5715_v51  ;;  %7032 = vrcp.f32 %v5837_v44  ;;  %v7021_v10 = vpop.eup %7020 }
 0x454   : > { %v6269_v18 = vmul.f32 -1.442695, %v5714_v46  ;;  %7034 = vrcp.f32 %v5836_v54  ;;  %v7023_v63 = vpop.eup %7022  ;;  %v5931_v21 = vmul.f32 %v7021_v10, %v11603_v19 }
 0x455   : > { %7036 = vpow2.f32 %v6270_v2  ;;  %v5930_v35 = vmul.f32 %v7023_v63, %v11606_v29 }
 0x456   : > { %7038 = vpow2.f32 %v6269_v18  ;;  %5964 = vst.msk [vmem:[%s11476_s17 + $0xb8] sm:$0xff] %vm5940_vm15, %v5931_v21 }
 0x457   : > { %v7025_v38 = vpop.eup %7024  ;;  %5963 = vst.msk [vmem:[%s11476_s17 + $0xb0] sm:$0xff] %vm5940_vm15, %v5930_v35 }
 0x458   : > { %v7027_v13 = vpop.eup %7026  ;;  %v5839_v22 = vadd.f32 1.0, %v7025_v38 }
 0x459   : > { %v5838_v17 = vadd.f32 1.0, %v7027_v13 }
 0x45a   : > { %7040 = vrcp.f32 %v5839_v22 }
 0x45b   : > { %v7029_v48 = vpop.eup %7028  ;;  %7042 = vrcp.f32 %v5838_v17 }
 0x45c   : > { %v7031_v33 = vpop.eup %7030  ;;  %v5841_v0 = vadd.f32 1.0, %v7029_v48 }
 0x45d   : > { %v5840_v19 = vadd.f32 1.0, %v7031_v33  ;;  %v7033_v52 = vpop.eup %7032 }
 0x45e   : > { %7044 = vrcp.f32 %v5841_v0  ;;  %v7035_v1 = vpop.eup %7034  ;;  %v5933_v29 = vmul.f32 %v7033_v52, %v11619_v25 }
 0x45f   : > { %7046 = vrcp.f32 %v5840_v19  ;;  %v7037_v53 = vpop.eup %7036  ;;  %v5932_v7 = vmul.f32 %v7035_v1, %v11622_v62 }
 0x460   : > { %v7039_v24 = vpop.eup %7038  ;;  %5966 = vst.msk [vmem:[%s11476_s17 + $0xc8] sm:$0xff] %vm5940_vm15, %v5933_v29  ;;  %v5843_v37 = vadd.f32 1.0, %v7037_v53 }
 0x461   : > { %5965 = vst.msk [vmem:[%s11476_s17 + $0xc0] sm:$0xff] %vm5940_vm15, %v5932_v7  ;;  %v5842_v16 = vadd.f32 1.0, %v7039_v24 }
 0x462   : > { %7048 = vrcp.f32 %v5843_v37 }
 0x463   : > { %7050 = vrcp.f32 %v5842_v16 }
 0x464   : > { %v7041_v57 = vpop.eup %7040 }
 0x465   : > { %v7043_v4 = vpop.eup %7042  ;;  %v5935_v25 = vmul.f32 %v7041_v57, %v11635_v55 }
 0x466   : > { %v5934_v45 = vmul.f32 %v7043_v4, %v11638_v40 }
 0x467   : > { %5968 = vst.msk [vmem:[%s11476_s17 + $0xd8] sm:$0xff] %vm5940_vm15, %v5935_v25 }
 0x468   : > { %v7045_v62 = vpop.eup %7044  ;;  %5967 = vst.msk [vmem:[%s11476_s17 + $0xd0] sm:$0xff] %vm5940_vm15, %v5934_v45 }
 0x469   : > { %v7047_v28 = vpop.eup %7046  ;;  %v5937_v14 = vmul.f32 %v7045_v62, %v11645_v36 }
 0x46a   : > { %v5936_v3 = vmul.f32 %v7047_v28, %v11649_v49 }
 0x46b   : > { %5970 = vst.msk [vmem:[%s11476_s17 + $0xe8] sm:$0xff] %vm5940_vm15, %v5937_v14 }
 0x46c   : > { %5969 = vst.msk [vmem:[%s11476_s17 + $0xe0] sm:$0xff] %vm5940_vm15, %v5936_v3  ;;  %v7049_v39 = vpop.eup %7048 }
 0x46d   : > { %v7051_v59 = vpop.eup %7050  ;;  %v5939_v34 = vmul.f32 %v7049_v39, %v5715_v51 }
 0x46e   : > { %v5938_v20 = vmul.f32 %v7051_v59, %v5714_v46 }
 0x46f   : > { %5972 = vst.msk [vmem:[%s11476_s17 + $0xf8] sm:$0xff] %vm5940_vm15, %v5939_v34 }
 0x470   : > { %5971 = vst.msk [vmem:[%s11476_s17 + $0xf0] sm:$0xff] %vm5940_vm15, %v5938_v20 }
 0x471 PF: > { %s15_s18 = sadd.s32 1, %s7059_s18  }
 0x472   : > { %p12_p4 = scmp.ge.s32.totalorder %s15_s18, 4  }
 0x474   :  { %14 = sbr.rel (!%p12_p4) target bundleno = 1 (0x1), region = 73 }

</bundles_post_ra>
